<compile_context>
chip_gen: v7x
topology: tpu7x:2x2x1
jax: 0.10.0
libtpu: 0.0.40
codegen_flags: <defaults>
</compile_context>

<pallas_src>
import functools

import jax
import jax.numpy as jnp
from jax import lax
from jax.experimental import pallas as pl
from jax.experimental.pallas import tpu as pltpu

BN_EPS = 1e-5


# --------------------------------- kernel ---------------------------------- #

def _bottleneck_kernel(H, W, th, nstrips,
                       x_ref, w1_ref, b1_ref, w2_ref, b2_ref, w3_ref, b3_ref,
                       out_ref, o1s_ref):
    # x_ref  : (H*W, Cin)      whole image, flattened rows
    # out_ref: (th*W, Cexp)    one output row strip
    # o1s_ref: ((th+4)*W, P)   conv1 output, compute dtype.  Layout: padded-strip
    #          row p in [0, th+2) lives at scratch rows [(p+1)*W, (p+2)*W);
    #          p=0 / p=th+1 are the top/bottom halo rows, 1..th the strip rows.
    #          Rows [0,W) and [(th+3)*W, (th+4)*W) are slack that is only ever
    #          read at boundary-masked tap positions.
    Cin = x_ref.shape[1]
    P = w1_ref.shape[1]
    cdtype = w1_ref.dtype                  # MXU compute dtype (f32 or bf16)
    aligned = (W % 8 == 0)

    r = pl.program_id(1)

    w1 = w1_ref[...]                       # (Cin, P)   bn1 scale folded
    b1 = b1_ref[...]                       # (1, P)     f32
    b2 = b2_ref[...]                       # (1, P)     f32
    w3 = w3_ref[...]                       # (P, Cexp)  bn3 scale folded
    b3 = b3_ref[...]                       # (1, Cexp)  f32

    def conv1_bn_relu(rows):               # relu(x) -> conv1 -> bn1 -> relu
        xr = jnp.maximum(rows, 0.0).astype(cdtype)
        y = jnp.dot(xr, w1, preferred_element_type=jnp.float32) + b1
        return jnp.maximum(y, 0.0).astype(o1s_ref.dtype)

    zero_row = jnp.zeros((W, P), o1s_ref.dtype)

    # ---- stage 1: conv1+bn1+relu into the scratch (one matmul, bulk store) -- #
    if nstrips == 1:
        # Whole image in one matmul; both halo rows are outside the image.
        o1s_ref[pl.ds(2 * W, th * W), :] = conv1_bn_relu(x_ref[...])
        o1s_ref[pl.ds(W, W), :] = zero_row                    # top halo
        o1s_ref[pl.ds((th + 2) * W, W), :] = zero_row         # bottom halo
    else:
        row0 = r * th
        start = jnp.clip(row0 - 1, 0, H - (th + 2))   # clamp window inside image
        src = start * W
        dst = (start - row0 + 2) * W                  # in {0, W, 2W}
        if aligned:
            src = pl.multiple_of(src, 8)
            dst = pl.multiple_of(dst, 8)
        win = conv1_bn_relu(x_ref[pl.ds(src, (th + 2) * W), :])
        o1s_ref[pl.ds(dst, (th + 2) * W), :] = win

        @pl.when(r == 0)                              # top halo row is off-image
        def _():
            o1s_ref[pl.ds(W, W), :] = zero_row

        @pl.when(r == nstrips - 1)                    # bottom halo row off-image
        def _():
            o1s_ref[pl.ds((th + 2) * W, W), :] = zero_row

    # ---- stage 2: 3x3 conv (+bn2+relu) as 3 K-folded (K=3P) MXU matmuls ----- #
    # Output flat index j (strip-local) sits at scratch row 2*W + j; the tap
    # (dh, dw) is the contiguous slice starting at (dh+1)*W + (dw-1).  The +-1
    # shifted slices wrap across image-row boundaries; those positions (w==0
    # for dw=0, w==W-1 for dw=2) are out-of-image and masked to zero.
    col = lax.broadcasted_iota(jnp.int32, (th * W, 1), 0) % W
    not_left = col > 0
    not_right = col < (W - 1)

    acc = None
    for dh in range(3):
        off = (dh + 1) * W
        t0 = o1s_ref[pl.ds(off - 1, th * W), :]
        t1 = o1s_ref[pl.ds(off, th * W), :]
        t2 = o1s_ref[pl.ds(off + 1, th * W), :]
        act = jnp.concatenate(
            [jnp.where(not_left, t0, 0), t1, jnp.where(not_right, t2, 0)],
            axis=-1)                                           # (th*W, 3P)
        part = jnp.dot(act, w2_ref[dh], preferred_element_type=jnp.float32)
        acc = part if acc is None else acc + part
    o2 = jnp.maximum(acc + b2, 0.0).astype(cdtype)             # (th*W, P)

    # ---- stage 3: conv3 + bn3 + relu(x) residual (no output relu) ----------- #
    y = jnp.dot(o2, w3, preferred_element_type=jnp.float32) + b3
    if nstrips == 1:
        xc = x_ref[...]
    else:
        roff = pl.program_id(1) * (th * W)
        if (th * W) % 8 == 0:
            roff = pl.multiple_of(roff, 8)
        xc = x_ref[pl.ds(roff, th * W), :]
    out_ref[...] = (y + jnp.maximum(xc.astype(jnp.float32), 0.0)).astype(out_ref.dtype)


# -------------------------------- wrappers ---------------------------------- #

def _pick_rows(H, W, N, rows_per_strip=None, target_rows=256):
    """Pick the strip height th (a divisor of H)."""
    divs = [d for d in range(1, H + 1) if H % d == 0]
    if rows_per_strip is not None:
        cands = [d for d in divs if d <= rows_per_strip]
        th = cands[-1] if cands else H
    else:
        # Smallest divisor giving matmul M = th*W >= target (MXU occupancy),
        # which also keeps the f32 conv2/conv3 accumulators small.
        cands = [d for d in divs if d * W >= target_rows]
        th = cands[0] if cands else H
        if N * (H // th) < 2:       # keep >=2 steps for multi-TensorCore chips
            smaller = [d for d in divs if d < th and (d * W) % 8 == 0
                       and d * W >= 128]
            if smaller:
                th = smaller[-1]
    if th < H and th + 2 > H:       # windowed conv1 needs th+2 rows in-image
        th = H
    return th


def bottleneck_forward_nhwc(x_nhwc, params, *, rows_per_strip=None):
    """Fused Bottleneck forward on an NHWC tensor (stride=1, no downsample)."""
    N, H, W, Cin = x_nhwc.shape
    w1, b1 = params["w1"], params["b1"]
    w2, b2 = params["w2"], params["b2"]
    w3, b3 = params["w3"], params["b3"]
    P = w1.shape[1]
    Cexp = w3.shape[1]
    assert Cexp == Cin, "no-downsample Bottleneck requires inplanes == planes*4"
    assert w1.dtype == x_nhwc.dtype == w2.dtype == w3.dtype

    th = _pick_rows(H, W, N, rows_per_strip)
    nstrips = H // th

    x2 = x_nhwc.reshape(N, H * W, Cin)     # flat row layout (free, contiguous)

    # VMEM budget: estimate generously, cap below physical capacity (v7x: 64MiB).
    ic = jnp.dtype(x_nhwc.dtype).itemsize
    cc = jnp.dtype(w1.dtype).itemsize
    est = (2 * H * W * Cin * ic                               # x image (x2 bufs)
           + 2 * th * W * Cexp * ic                           # out strip (x2 bufs)
           + 2 * (Cin * P + 9 * P * P + P * Cexp) * cc        # folded weights
           + 2 * (2 * P + Cexp) * 4                           # biases
           + (th + 4) * W * P * cc                            # o1 scratch
           + th * W * (3 * P * cc + 8 * P + 4 * Cexp))        # act/acc/o2/y values
    try:
        cap = int(pltpu.get_tpu_info().vmem_capacity_bytes)
    except Exception:
        cap = 64 * 2 ** 20
    vmem_limit = int(min(0.7 * cap, max(32 * 2 ** 20, 2 * est)))

    kernel = functools.partial(_bottleneck_kernel, H, W, th, nstrips)

    out2 = pl.pallas_call(
        kernel,
        out_shape=jax.ShapeDtypeStruct((N, H * W, Cexp), x_nhwc.dtype),
        grid=(N, nstrips),
        in_specs=[
            # whole (flattened) image per batch index; block index ignores the
            # strip axis so it is DMA'd once per image and reused across strips.
            pl.BlockSpec((None, H * W, Cin), lambda n, r: (n, 0, 0)),
            pl.BlockSpec((Cin, P), lambda n, r: (0, 0)),          # w1 (bn1 folded)
            pl.BlockSpec((1, P), lambda n, r: (0, 0)),            # b1
            pl.BlockSpec((3, 3 * P, P), lambda n, r: (0, 0, 0)),  # w2 (bn2 folded, K-folded)
            pl.BlockSpec((1, P), lambda n, r: (0, 0)),            # b2
            pl.BlockSpec((P, Cexp), lambda n, r: (0, 0)),         # w3 (bn3 folded)
            pl.BlockSpec((1, Cexp), lambda n, r: (0, 0)),         # b3
        ],
        out_specs=pl.BlockSpec((None, th * W, Cexp), lambda n, r: (n, r, 0)),
        scratch_shapes=[pltpu.VMEM(((th + 4) * W, P), w1.dtype)],
        compiler_params=pltpu.CompilerParams(
            dimension_semantics=("parallel", "parallel"),
            vmem_limit_bytes=vmem_limit),
    )(x2, w1, b1, w2, b2, w3, b3)

    return out2.reshape(N, H, W, Cexp)


def bottleneck_forward_nchw(x_nchw, params, *, rows_per_strip=None):
    # Layout shim for parity with the PyTorch NCHW module.  In a full ResNet
    # do the NCHW<->NHWC conversion once outside the stack of blocks.
    x = jnp.transpose(x_nchw, (0, 2, 3, 1))
    y = bottleneck_forward_nhwc(x, params, rows_per_strip=rows_per_strip)
    return jnp.transpose(y, (0, 3, 1, 2))


# ------------------------- parameter preparation ---------------------------- #

def fold_bn(gamma, beta, mean, var, eps=BN_EPS):
    scale = gamma / jnp.sqrt(var + eps)
    return scale, beta - mean * scale


def prepare_params(w1_oihw, w2_oihw, w3_oihw, bn1, bn2, bn3,
                   compute_dtype=jnp.float32):
    """Fold inference BatchNorm scales into the conv weights; kernel layouts."""
    s1, b1 = fold_bn(*bn1)
    s2, b2 = fold_bn(*bn2)
    s3, b3 = fold_bn(*bn3)
    planes = w1_oihw.shape[0]
    w1 = jnp.transpose(w1_oihw[:, :, 0, 0]) * s1[None, :]                 # (Cin, P)
    # (O,I,kh,kw) -> (kh, kw, I, O), fold bn2 scale over O, then K-fold the
    # (kw, I) axes so each kh slab is a (3P, P) matmul weight.
    w2 = (jnp.transpose(w2_oihw, (2, 3, 1, 0)) * s2[None, None, None, :]
          ).reshape(3, 3 * planes, planes)                                # (3, 3P, P)
    w3 = jnp.transpose(w3_oihw[:, :, 0, 0]) * s3[None, :]                 # (P, Cexp)
    f32 = jnp.float32
    return {
        "w1": w1.astype(compute_dtype), "b1": b1.reshape(1, -1).astype(f32),
        "w2": w2.astype(compute_dtype), "b2": b2.reshape(1, -1).astype(f32),
        "w3": w3.astype(compute_dtype), "b3": b3.reshape(1, -1).astype(f32),
    }


# ----------------------------- pure-JAX reference --------------------------- #

def reference_forward(x, w1, w2, w3, bn1, bn2, bn3):
    def bn(y, gamma, beta, mean, var):
        inv = (gamma / jnp.sqrt(var + BN_EPS))[None, :, None, None]
        return (y - mean[None, :, None, None]) * inv + beta[None, :, None, None]

    def conv(y, w, pad):
        return lax.conv_general_dilated(
            y, w, (1, 1), [(pad, pad), (pad, pad)],
            dimension_numbers=("NCHW", "OIHW", "NCHW"))

    xr = jax.nn.relu(x)
    o = jax.nn.relu(bn(conv(xr, w1, 0), *bn1))
    o = jax.nn.relu(bn(conv(o, w2, 1), *bn2))
    o = bn(conv(o, w3, 0), *bn3)
    return o + xr


# ----------------------------------- main ----------------------------------- #

if __name__ == "__main__":
    key = jax.random.PRNGKey(0)
    ks = jax.random.split(key, 8)

    planes = 4
    inplanes = planes * 4            # expansion=4, downsample=None -> residual matches
    N, H, W = 2, 16, 16

    x = jax.random.normal(ks[0], (N, inplanes, H, W), jnp.float32)

    # PyTorch-layout (OIHW) conv weights, deterministic.
    w1 = jax.random.normal(ks[1], (planes, inplanes, 1, 1), jnp.float32) * 0.2
    w2 = jax.random.normal(ks[2], (planes, planes, 3, 3), jnp.float32) * 0.2
    w3 = jax.random.normal(ks[3], (planes * 4, planes, 1, 1), jnp.float32) * 0.2

    def bn_params(k, c):
        k1, k2, k3, k4 = jax.random.split(k, 4)
        return (jax.random.uniform(k1, (c,), jnp.float32, 0.5, 1.5),
                jax.random.normal(k2, (c,), jnp.float32) * 0.1,
                jax.random.normal(k3, (c,), jnp.float32) * 0.1,
                jax.random.uniform(k4, (c,), jnp.float32, 0.5, 1.5))

    bn1 = bn_params(ks[4], planes)
    bn2 = bn_params(ks[5], planes)
    bn3 = bn_params(ks[6], planes * 4)

    ref = reference_forward(x, w1, w2, w3, bn1, bn2, bn3)
    fwd = jax.jit(bottleneck_forward_nchw, static_argnames=("rows_per_strip",))

    # float32, auto strip size (exercises the single-strip whole-image path).
    params32 = prepare_params(w1, w2, w3, bn1, bn2, bn3, jnp.float32)
    out_a = jax.block_until_ready(fwd(x, params32))
    assert out_a.shape == (N, planes * 4, H, W)
    err_a = float(jnp.max(jnp.abs(out_a - ref)))
    if err_a > 1e-3:
        raise AssertionError(f"f32 (auto strips) mismatch, max abs err = {err_a}")

    # float32, explicit multi-strip (exercises the windowed conv1 + edge halos).
    out_b = jax.block_until_ready(fwd(x, params32, rows_per_strip=4))
    err_b = float(jnp.max(jnp.abs(out_b - ref)))
    if err_b > 1e-3:
        raise AssertionError(f"f32 (multi-strip) mismatch, max abs err = {err_b}")

    # bfloat16 path (MXU-native, bf16 o1 scratch): looser tolerance vs f32 ref.
    params16 = prepare_params(w1, w2, w3, bn1, bn2, bn3, jnp.bfloat16)
    out_c = jax.block_until_ready(
        fwd(x.astype(jnp.bfloat16), params16, rows_per_strip=4))
    err_c = float(jnp.max(jnp.abs(out_c.astype(jnp.float32) - ref)))
    if err_c > 0.4:
        raise AssertionError(f"bf16 mismatch vs reference, max abs err = {err_c}")

    print("KERNEL_OK")
</pallas_src>

<mosaic_0001>
module attributes {stable_mosaic.version = 11 : i64} {
  func.func @_bottleneck_kernel(%arg0: i32, %arg1: i32, %arg2: memref<1x256x16xf32, #tpu.memory_space<vmem>>, %arg3: memref<16x4xf32, #tpu.memory_space<vmem>>, %arg4: memref<1x4xf32, #tpu.memory_space<vmem>>, %arg5: memref<3x12x4xf32, #tpu.memory_space<vmem>>, %arg6: memref<1x4xf32, #tpu.memory_space<vmem>>, %arg7: memref<4x16xf32, #tpu.memory_space<vmem>>, %arg8: memref<1x16xf32, #tpu.memory_space<vmem>>, %arg9: memref<1x256x16xf32, #tpu.memory_space<vmem>>, %arg10: memref<320x4xf32, #tpu.memory_space<vmem>>) attributes {dimension_semantics = [#tpu.dimension_semantics<parallel>, #tpu.dimension_semantics<parallel>], iteration_bounds = array<i64: 2, 1>, scalar_prefetch = 0 : i64, scratch_operands = 1 : i64, tpu.core_type = #tpu.core_type<tc>, window_params = [{transform_indices = @transform_0, window_bounds = array<i64: 1, 256, 16>}, {pipeline_mode = #tpu.pipeline_mode<synchronous>, transform_indices = @transform_1, window_bounds = array<i64: 16, 4>}, {pipeline_mode = #tpu.pipeline_mode<synchronous>, transform_indices = @transform_2, window_bounds = array<i64: 1, 4>}, {pipeline_mode = #tpu.pipeline_mode<synchronous>, transform_indices = @transform_3, window_bounds = array<i64: 3, 12, 4>}, {pipeline_mode = #tpu.pipeline_mode<synchronous>, transform_indices = @transform_4, window_bounds = array<i64: 1, 4>}, {pipeline_mode = #tpu.pipeline_mode<synchronous>, transform_indices = @transform_5, window_bounds = array<i64: 4, 16>}, {pipeline_mode = #tpu.pipeline_mode<synchronous>, transform_indices = @transform_6, window_bounds = array<i64: 1, 16>}, {transform_indices = @transform_7, window_bounds = array<i64: 1, 256, 16>}]} {
    %c0 = arith.constant 0 : index
    %c0_0 = arith.constant 0 : index
    %0 = vector.load %arg3[%c0, %c0_0] : memref<16x4xf32, #tpu.memory_space<vmem>>, vector<16x4xf32>
    %c0_1 = arith.constant 0 : index
    %c0_2 = arith.constant 0 : index
    %1 = vector.load %arg4[%c0_1, %c0_2] : memref<1x4xf32, #tpu.memory_space<vmem>>, vector<1x4xf32>
    %c0_3 = arith.constant 0 : index
    %c0_4 = arith.constant 0 : index
    %2 = vector.load %arg6[%c0_3, %c0_4] : memref<1x4xf32, #tpu.memory_space<vmem>>, vector<1x4xf32>
    %c0_5 = arith.constant 0 : index
    %c0_6 = arith.constant 0 : index
    %3 = vector.load %arg7[%c0_5, %c0_6] : memref<4x16xf32, #tpu.memory_space<vmem>>, vector<4x16xf32>
    %c0_7 = arith.constant 0 : index
    %c0_8 = arith.constant 0 : index
    %4 = vector.load %arg8[%c0_7, %c0_8] : memref<1x16xf32, #tpu.memory_space<vmem>>, vector<1x16xf32>
    %cst = arith.constant 0.000000e+00 : f32
    %5 = vector.broadcast %cst : f32 to vector<16x4xf32>
    %c0_9 = arith.constant 0 : index
    %c0_10 = arith.constant 0 : index
    %c0_11 = arith.constant 0 : index
    %6 = vector.load %arg2[%c0_9, %c0_10, %c0_11] : memref<1x256x16xf32, #tpu.memory_space<vmem>>, vector<1x256x16xf32>
    %7 = vector.shape_cast %6 : vector<1x256x16xf32> to vector<256x16xf32>
    %cst_12 = arith.constant 0.000000e+00 : f32
    %8 = vector.broadcast %cst_12 : f32 to vector<256x16xf32>
    %9 = arith.maximumf %7, %8 : vector<256x16xf32>
    %cst_13 = arith.constant dense<0.000000e+00> : vector<256x4xf32>
    %10 = tpu.matmul %9, %0, %cst_13 {dimension_numbers = #tpu.dot_dimension_numbers<[1], [0], [0], [1], [0, 0, 1, 1], [], []>} : vector<256x16xf32>, vector<16x4xf32>, vector<256x4xf32> -> vector<256x4xf32>
    %11 = vector.broadcast %1 : vector<1x4xf32> to vector<256x4xf32>
    %12 = arith.addf %10, %11 : vector<256x4xf32>
    %cst_14 = arith.constant 0.000000e+00 : f32
    %13 = vector.broadcast %cst_14 : f32 to vector<256x4xf32>
    %14 = arith.maximumf %12, %13 : vector<256x4xf32>
    %c32 = arith.constant 32 : index
    %c0_15 = arith.constant 0 : index
    %15 = vector.load %arg10[%c32, %c0_15] : memref<320x4xf32, #tpu.memory_space<vmem>>, vector<256x4xf32>
    tpu.vector_store %arg10[%c32, %c0_15], %14 {strides = array<i32>} : memref<320x4xf32, #tpu.memory_space<vmem>>, vector<256x4xf32>,
    %c16 = arith.constant 16 : index
    %c0_16 = arith.constant 0 : index
    %16 = vector.load %arg10[%c16, %c0_16] : memref<320x4xf32, #tpu.memory_space<vmem>>, vector<16x4xf32>
    tpu.vector_store %arg10[%c16, %c0_16], %5 {strides = array<i32>} : memref<320x4xf32, #tpu.memory_space<vmem>>, vector<16x4xf32>,
    %c288 = arith.constant 288 : index
    %c0_17 = arith.constant 0 : index
    %17 = vector.load %arg10[%c288, %c0_17] : memref<320x4xf32, #tpu.memory_space<vmem>>, vector<16x4xf32>
    tpu.vector_store %arg10[%c288, %c0_17], %5 {strides = array<i32>} : memref<320x4xf32, #tpu.memory_space<vmem>>, vector<16x4xf32>,
    %18 = tpu.iota {dimensions = array<i32: 0>} : vector<256x1xi32>
    %c16_i32 = arith.constant 16 : i32
    %c0_i32 = arith.constant 0 : i32
    %19 = arith.cmpi eq, %c16_i32, %c0_i32 : i32
    %c1_i32 = arith.constant 1 : i32
    %20 = arith.select %19, %c1_i32, %c16_i32 : i32
    %21 = vector.broadcast %20 : i32 to vector<256x1xi32>
    %22 = arith.remsi %18, %21 : vector<256x1xi32>
    %c0_i32_18 = arith.constant 0 : i32
    %23 = vector.broadcast %c0_i32_18 : i32 to vector<256x1xi32>
    %24 = arith.cmpi ne, %22, %23 : vector<256x1xi32>
    %c0_i32_19 = arith.constant 0 : i32
    %25 = vector.broadcast %c0_i32_19 : i32 to vector<256x1xi32>
    %26 = arith.cmpi slt, %22, %25 : vector<256x1xi32>
    %c0_i32_20 = arith.constant 0 : i32
    %27 = arith.cmpi slt, %20, %c0_i32_20 : i32
    %28 = vector.broadcast %27 : i1 to vector<256x1xi1>
    %29 = vector.broadcast %28 : vector<256x1xi1> to vector<256x1xi1>
    %30 = arith.xori %26, %29 : vector<256x1xi1>
    %31 = arith.andi %30, %24 : vector<256x1xi1>
    %32 = vector.broadcast %20 : i32 to vector<256x1xi32>
    %33 = arith.addi %22, %32 : vector<256x1xi32>
    %34 = arith.select %31, %33, %22 : vector<256x1xi1>, vector<256x1xi32>
    %c0_i32_21 = arith.constant 0 : i32
    %35 = vector.broadcast %c0_i32_21 : i32 to vector<256x1xi32>
    %36 = arith.cmpi sgt, %34, %35 : vector<256x1xi32>
    %c15_i32 = arith.constant 15 : i32
    %37 = vector.broadcast %c15_i32 : i32 to vector<256x1xi32>
    %38 = arith.cmpi slt, %34, %37 : vector<256x1xi32>
    %c15 = arith.constant 15 : index
    %c0_22 = arith.constant 0 : index
    %39 = vector.load %arg10[%c15, %c0_22] : memref<320x4xf32, #tpu.memory_space<vmem>>, vector<256x4xf32>
    %c16_23 = arith.constant 16 : index
    %c0_24 = arith.constant 0 : index
    %40 = vector.load %arg10[%c16_23, %c0_24] : memref<320x4xf32, #tpu.memory_space<vmem>>, vector<256x4xf32>
    %c17 = arith.constant 17 : index
    %c0_25 = arith.constant 0 : index
    %41 = vector.load %arg10[%c17, %c0_25] : memref<320x4xf32, #tpu.memory_space<vmem>>, vector<256x4xf32>
    %c0_i32_26 = arith.constant 0 : i32
    %42 = arith.sitofp %c0_i32_26 : i32 to f32
    %43 = vector.shape_cast %36 : vector<256x1xi1> to vector<256x1xi1>
    %44 = vector.broadcast %43 : vector<256x1xi1> to vector<256x4xi1>
    %45 = vector.broadcast %42 : f32 to vector<256x4xf32>
    %46 = arith.select %44, %39, %45 : vector<256x4xi1>, vector<256x4xf32>
    %c0_i32_27 = arith.constant 0 : i32
    %47 = arith.sitofp %c0_i32_27 : i32 to f32
    %48 = vector.shape_cast %38 : vector<256x1xi1> to vector<256x1xi1>
    %49 = vector.broadcast %48 : vector<256x1xi1> to vector<256x4xi1>
    %50 = vector.broadcast %47 : f32 to vector<256x4xf32>
    %51 = arith.select %49, %41, %50 : vector<256x4xi1>, vector<256x4xf32>
    %52 = tpu.concatenate %46, %40, %51 in 1 : vector<256x4xf32>, vector<256x4xf32>, vector<256x4xf32> -> vector<256x12xf32>
    %c0_28 = arith.constant 0 : index
    %c0_29 = arith.constant 0 : index
    %c0_30 = arith.constant 0 : index
    %53 = vector.load %arg5[%c0_28, %c0_29, %c0_30] : memref<3x12x4xf32, #tpu.memory_space<vmem>>, vector<1x12x4xf32>
    %54 = vector.shape_cast %53 : vector<1x12x4xf32> to vector<12x4xf32>
    %cst_31 = arith.constant dense<0.000000e+00> : vector<256x4xf32>
    %55 = tpu.matmul %52, %54, %cst_31 {dimension_numbers = #tpu.dot_dimension_numbers<[1], [0], [0], [1], [0, 0, 1, 1], [], []>} : vector<256x12xf32>, vector<12x4xf32>, vector<256x4xf32> -> vector<256x4xf32>
    %c31 = arith.constant 31 : index
    %c0_32 = arith.constant 0 : index
    %56 = vector.load %arg10[%c31, %c0_32] : memref<320x4xf32, #tpu.memory_space<vmem>>, vector<256x4xf32>
    %c32_33 = arith.constant 32 : index
    %c0_34 = arith.constant 0 : index
    %57 = vector.load %arg10[%c32_33, %c0_34] : memref<320x4xf32, #tpu.memory_space<vmem>>, vector<256x4xf32>
    %c33 = arith.constant 33 : index
    %c0_35 = arith.constant 0 : index
    %58 = vector.load %arg10[%c33, %c0_35] : memref<320x4xf32, #tpu.memory_space<vmem>>, vector<256x4xf32>
    %c0_i32_36 = arith.constant 0 : i32
    %59 = arith.sitofp %c0_i32_36 : i32 to f32
    %60 = vector.shape_cast %36 : vector<256x1xi1> to vector<256x1xi1>
    %61 = vector.broadcast %60 : vector<256x1xi1> to vector<256x4xi1>
    %62 = vector.broadcast %59 : f32 to vector<256x4xf32>
    %63 = arith.select %61, %56, %62 : vector<256x4xi1>, vector<256x4xf32>
    %c0_i32_37 = arith.constant 0 : i32
    %64 = arith.sitofp %c0_i32_37 : i32 to f32
    %65 = vector.shape_cast %38 : vector<256x1xi1> to vector<256x1xi1>
    %66 = vector.broadcast %65 : vector<256x1xi1> to vector<256x4xi1>
    %67 = vector.broadcast %64 : f32 to vector<256x4xf32>
    %68 = arith.select %66, %58, %67 : vector<256x4xi1>, vector<256x4xf32>
    %69 = tpu.concatenate %63, %57, %68 in 1 : vector<256x4xf32>, vector<256x4xf32>, vector<256x4xf32> -> vector<256x12xf32>
    %c1 = arith.constant 1 : index
    %c0_38 = arith.constant 0 : index
    %c0_39 = arith.constant 0 : index
    %70 = vector.load %arg5[%c1, %c0_38, %c0_39] : memref<3x12x4xf32, #tpu.memory_space<vmem>>, vector<1x12x4xf32>
    %71 = vector.shape_cast %70 : vector<1x12x4xf32> to vector<12x4xf32>
    %cst_40 = arith.constant dense<0.000000e+00> : vector<256x4xf32>
    %72 = tpu.matmul %69, %71, %cst_40 {dimension_numbers = #tpu.dot_dimension_numbers<[1], [0], [0], [1], [0, 0, 1, 1], [], []>} : vector<256x12xf32>, vector<12x4xf32>, vector<256x4xf32> -> vector<256x4xf32>
    %73 = arith.addf %55, %72 : vector<256x4xf32>
    %c47 = arith.constant 47 : index
    %c0_41 = arith.constant 0 : index
    %74 = vector.load %arg10[%c47, %c0_41] : memref<320x4xf32, #tpu.memory_space<vmem>>, vector<256x4xf32>
    %c48 = arith.constant 48 : index
    %c0_42 = arith.constant 0 : index
    %75 = vector.load %arg10[%c48, %c0_42] : memref<320x4xf32, #tpu.memory_space<vmem>>, vector<256x4xf32>
    %c49 = arith.constant 49 : index
    %c0_43 = arith.constant 0 : index
    %76 = vector.load %arg10[%c49, %c0_43] : memref<320x4xf32, #tpu.memory_space<vmem>>, vector<256x4xf32>
    %c0_i32_44 = arith.constant 0 : i32
    %77 = arith.sitofp %c0_i32_44 : i32 to f32
    %78 = vector.shape_cast %36 : vector<256x1xi1> to vector<256x1xi1>
    %79 = vector.broadcast %78 : vector<256x1xi1> to vector<256x4xi1>
    %80 = vector.broadcast %77 : f32 to vector<256x4xf32>
    %81 = arith.select %79, %74, %80 : vector<256x4xi1>, vector<256x4xf32>
    %c0_i32_45 = arith.constant 0 : i32
    %82 = arith.sitofp %c0_i32_45 : i32 to f32
    %83 = vector.shape_cast %38 : vector<256x1xi1> to vector<256x1xi1>
    %84 = vector.broadcast %83 : vector<256x1xi1> to vector<256x4xi1>
    %85 = vector.broadcast %82 : f32 to vector<256x4xf32>
    %86 = arith.select %84, %76, %85 : vector<256x4xi1>, vector<256x4xf32>
    %87 = tpu.concatenate %81, %75, %86 in 1 : vector<256x4xf32>, vector<256x4xf32>, vector<256x4xf32> -> vector<256x12xf32>
    %c2 = arith.constant 2 : index
    %c0_46 = arith.constant 0 : index
    %c0_47 = arith.constant 0 : index
    %88 = vector.load %arg5[%c2, %c0_46, %c0_47] : memref<3x12x4xf32, #tpu.memory_space<vmem>>, vector<1x12x4xf32>
    %89 = vector.shape_cast %88 : vector<1x12x4xf32> to vector<12x4xf32>
    %cst_48 = arith.constant dense<0.000000e+00> : vector<256x4xf32>
    %90 = tpu.matmul %87, %89, %cst_48 {dimension_numbers = #tpu.dot_dimension_numbers<[1], [0], [0], [1], [0, 0, 1, 1], [], []>} : vector<256x12xf32>, vector<12x4xf32>, vector<256x4xf32> -> vector<256x4xf32>
    %91 = arith.addf %73, %90 : vector<256x4xf32>
    %92 = vector.broadcast %2 : vector<1x4xf32> to vector<256x4xf32>
    %93 = arith.addf %91, %92 : vector<256x4xf32>
    %cst_49 = arith.constant 0.000000e+00 : f32
    %94 = vector.broadcast %cst_49 : f32 to vector<256x4xf32>
    %95 = arith.maximumf %93, %94 : vector<256x4xf32>
    %cst_50 = arith.constant dense<0.000000e+00> : vector<256x16xf32>
    %96 = tpu.matmul %95, %3, %cst_50 {dimension_numbers = #tpu.dot_dimension_numbers<[1], [0], [0], [1], [0, 0, 1, 1], [], []>} : vector<256x4xf32>, vector<4x16xf32>, vector<256x16xf32> -> vector<256x16xf32>
    %97 = vector.broadcast %4 : vector<1x16xf32> to vector<256x16xf32>
    %98 = arith.addf %96, %97 : vector<256x16xf32>
    %c0_51 = arith.constant 0 : index
    %c0_52 = arith.constant 0 : index
    %c0_53 = arith.constant 0 : index
    %99 = vector.load %arg2[%c0_51, %c0_52, %c0_53] : memref<1x256x16xf32, #tpu.memory_space<vmem>>, vector<1x256x16xf32>
    %100 = vector.shape_cast %99 : vector<1x256x16xf32> to vector<256x16xf32>
    %cst_54 = arith.constant 0.000000e+00 : f32
    %101 = vector.broadcast %cst_54 : f32 to vector<256x16xf32>
    %102 = arith.maximumf %100, %101 : vector<256x16xf32>
    %103 = arith.addf %98, %102 : vector<256x16xf32>
    %c0_55 = arith.constant 0 : index
    %c0_56 = arith.constant 0 : index
    %c0_57 = arith.constant 0 : index
    %104 = vector.load %arg9[%c0_55, %c0_56, %c0_57] : memref<1x256x16xf32, #tpu.memory_space<vmem>>, vector<1x256x16xf32>
    %105 = vector.shape_cast %104 : vector<1x256x16xf32> to vector<256x16xf32>
    %106 = vector.shape_cast %103 : vector<256x16xf32> to vector<1x256x16xf32>
    tpu.vector_store %arg9[%c0_55, %c0_56, %c0_57], %106 {strides = array<i32>} : memref<1x256x16xf32, #tpu.memory_space<vmem>>, vector<1x256x16xf32>,
    return
  }
  func.func @transform_0(%arg0: i32, %arg1: i32) -> (i32, i32, i32) {
    %c0_i32 = arith.constant 0 : i32
    %c0_i32_0 = arith.constant 0 : i32
    %c0_i32_1 = arith.constant 0 : i32
    return %arg0, %c0_i32, %c0_i32_0 : i32, i32, i32
  }
  func.func @transform_1(%arg0: i32, %arg1: i32) -> (i32, i32) {
    %c0_i32 = arith.constant 0 : i32
    %c0_i32_0 = arith.constant 0 : i32
    %c0_i32_1 = arith.constant 0 : i32
    return %c0_i32, %c0_i32_0 : i32, i32
  }
  func.func @transform_2(%arg0: i32, %arg1: i32) -> (i32, i32) {
    %c0_i32 = arith.constant 0 : i32
    %c0_i32_0 = arith.constant 0 : i32
    %c0_i32_1 = arith.constant 0 : i32
    return %c0_i32, %c0_i32_0 : i32, i32
  }
  func.func @transform_3(%arg0: i32, %arg1: i32) -> (i32, i32, i32) {
    %c0_i32 = arith.constant 0 : i32
    %c0_i32_0 = arith.constant 0 : i32
    %c0_i32_1 = arith.constant 0 : i32
    %c0_i32_2 = arith.constant 0 : i32
    return %c0_i32, %c0_i32_0, %c0_i32_1 : i32, i32, i32
  }
  func.func @transform_4(%arg0: i32, %arg1: i32) -> (i32, i32) {
    %c0_i32 = arith.constant 0 : i32
    %c0_i32_0 = arith.constant 0 : i32
    %c0_i32_1 = arith.constant 0 : i32
    return %c0_i32, %c0_i32_0 : i32, i32
  }
  func.func @transform_5(%arg0: i32, %arg1: i32) -> (i32, i32) {
    %c0_i32 = arith.constant 0 : i32
    %c0_i32_0 = arith.constant 0 : i32
    %c0_i32_1 = arith.constant 0 : i32
    return %c0_i32, %c0_i32_0 : i32, i32
  }
  func.func @transform_6(%arg0: i32, %arg1: i32) -> (i32, i32) {
    %c0_i32 = arith.constant 0 : i32
    %c0_i32_0 = arith.constant 0 : i32
    %c0_i32_1 = arith.constant 0 : i32
    return %c0_i32, %c0_i32_0 : i32, i32
  }
  func.func @transform_7(%arg0: i32, %arg1: i32) -> (i32, i32, i32) {
    %c0_i32 = arith.constant 0 : i32
    %c0_i32_0 = arith.constant 0 : i32
    return %arg0, %arg1, %c0_i32 : i32, i32, i32
  }
}

</mosaic_0001>

<bundles_post_ra>
// kernel: bottleneck_forward_nchw.1
= control target key start
LH: loop header
LB: loop body
LE: loop exit
PB: predicated region body
PF: predicated region fallthrough
CT: control target
= control target key end

     0   :  { %s5029_s24 = smov 0   ;;  %s5031_s25 = smov 0   ;;  %s7065_s0 = inlined_call_operand.vmem [shape: f32[2,256,16], index: 0, kind: input, shape index: {}]   ;;  %s7066_s1 = inlined_call_operand.vmem [shape: f32[16,4], index: 1, kind: input, shape index: {}]   ;;  %s7067_s2 = inlined_call_operand.vmem [shape: f32[1,4], index: 2, kind: input, shape index: {}]   ;;  %s7068_s3 = inlined_call_operand.vmem [shape: f32[3,12,4], index: 3, kind: input, shape index: {}]   ;;  %s7069_s4 = inlined_call_operand.vmem [shape: f32[1,4], index: 4, kind: input, shape index: {}]   ;;  %s7070_s5 = inlined_call_operand.vmem [shape: f32[4,16], index: 5, kind: input, shape index: {}]   ;;  %s7071_s6 = inlined_call_operand.vmem [shape: f32[1,16], index: 6, kind: input, shape index: {}]   ;;  %s7072_s7 = inlined_call_operand.vmem [shape: f32[2,256,16], index: 7, kind: output, shape index: {}]  }
   0x1   :  { %s5033_s26 = smov 0  }
   0x2 LB: > { %s29_s27 = sadd.s32 1, %s4979_s25  ;;  %p4236_p0 = scmp.ge.s32.totalorder %s4983_s26, 1  ;;  %s4983_s26 = sphi %s5033_s26, %s17_s26   ;;  %s4979_s25 = sphi %s5031_s25, %s7791_s25   ;;  %s4975_s24 = sphi %s5029_s24, %s7790_s24  }
   0x3   : > { %p31_p1 = scmp.ge.s32.totalorder %s29_s27, 2  ;;  %p251_p2 = scmp.lt.s32.totalorder %s4983_s26, 3 }
   0x5   : > { %s7793_s27 = smov (%p31_p1, %s29_s27), 0  ;;  %p252_p3 = pnand %p4236_p0, %p251_p2 }
   0x7   : > { %255 = sbr.rel (%p252_p3) target bundleno = 1143 (0x477), region = 48 }
   0xe   : > { %v302_v0 = vld [vmem:[%s7066_s1] sm:$0xff]  ;;  %v303_v1 = vld [vmem:[%s7066_s1 + $0x8] sm:$0xff]  ;;  %p287_p4 = scmp.lt.s32.totalorder %s4975_s24, 1  ;;  %vm7073_vm0 = vcmask 130048   ;;  %vm7077_vm1 = vcmask 31744   ;;  %s4986_s13 = smov 4  }
   0xf   : > { %v4843_v2 = vpack.c.bf16 %v303_v1, %v302_v0  ;;  %s4987_s14 = smov 8   ;;  %vm7074_vm6 = vcmask 1043456   ;;  %vm4988_vm7 = vmmov 1  }
  0x10   : > { %s7795_s24 = smov (!%p287_p4, %s4975_s24), 1  ;;  %vm5213_vm8 = vmpackc.low %vm7074_vm6, %vm4988_vm7 }
  0x11   : > { %4844 = vmatprep.subr.bf16.mxu0 %v4843_v2  ;;  %s4414_s9 = sshll.u32 %s7795_s24, 8 }
  0x12   : > { %4846 = vmatpush3.bf16.msra.mxu0 %v4843_v2  ;;  %s5061_s12 = scalar_lea.vmem %s7065_s0, %s4414_s9  ;;  %s6931_s20 = scalar_lea.vmem %s7072_s7, %s4414_s9 }
  0x13   : > { %v308_v3 = vld [vmem:[%s5061_s12] sm:$0xff]  ;;  %v309_v4 = vld [vmem:[%s5061_s12 + $0x8] sm:$0xff]  ;;  %v310_v5 = vld [vmem:[%s5061_s12 + $0x10] sm:$0xff] }
  0x14   : > { %v340_v6 = vmax.f32 %v308_v3, 0.0  ;;  %v341_v7 = vmax.f32 %v309_v4, 0.0  ;;  %v342_v8 = vmax.f32 %v310_v5, 0.0  ;;  %v311_v9 = vld [vmem:[%s5061_s12 + $0x18] sm:$0xff]  ;;  %v312_v10 = vld [vmem:[%s5061_s12 + $0x20] sm:$0xff]  ;;  %v313_v13 = vld [vmem:[%s5061_s12 + $0x28] sm:$0xff] }
  0x15   : > { %v343_v11 = vmax.f32 %v311_v9, 0.0  ;;  %v344_v12 = vmax.f32 %v312_v10, 0.0  ;;  %v314_v14 = vld [vmem:[%s5061_s12 + $0x30] sm:$0xff]  ;;  %v345_v15 = vmax.f32 %v313_v13, 0.0  ;;  %v315_v17 = vld [vmem:[%s5061_s12 + $0x38] sm:$0xff]  ;;  %v316_v18 = vld [vmem:[%s5061_s12 + $0x40] sm:$0xff] }
  0x16   : > { %4589 = vmatprep.mubr.msk.f32.mxu0 %vm7073_vm0, %v340_v6  ;;  %v346_v16 = vmax.f32 %v314_v14, 0.0  ;;  %v347_v19 = vmax.f32 %v315_v17, 0.0  ;;  %v348_v20 = vmax.f32 %v316_v18, 0.0  ;;  %v317_v21 = vld [vmem:[%s5061_s12 + $0x48] sm:$0xff]  ;;  %v318_v22 = vld [vmem:[%s5061_s12 + $0x50] sm:$0xff]  ;;  %v319_v25 = vld [vmem:[%s5061_s12 + $0x58] sm:$0xff] }
  0x17   : > { %4590 = vmatmul.mubr.msk.f32.vlgmr.msra.gmra.mrb[0].mxu0 %vm7073_vm0, %v341_v7  ;;  %v349_v23 = vmax.f32 %v317_v21, 0.0  ;;  %v350_v24 = vmax.f32 %v318_v22, 0.0  ;;  %v320_v26 = vld [vmem:[%s5061_s12 + $0x60] sm:$0xff]  ;;  %v351_v27 = vmax.f32 %v319_v25, 0.0  ;;  %v321_v29 = vld [vmem:[%s5061_s12 + $0x68] sm:$0xff]  ;;  %v322_v30 = vld [vmem:[%s5061_s12 + $0x70] sm:$0xff]  ;;  %v769_v7 = vlaneseq }
  0x18   : > { %4592 = vmatprep.mubr.msk.f32.mxu0 %vm7073_vm0, %v342_v8  ;;  %v352_v28 = vmax.f32 %v320_v26, 0.0  ;;  %v353_v31 = vmax.f32 %v321_v29, 0.0  ;;  %v354_v32 = vmax.f32 %v322_v30, 0.0  ;;  %v323_v33 = vld [vmem:[%s5061_s12 + $0x78] sm:$0xff]  ;;  %v324_v34 = vld [vmem:[%s5061_s12 + $0x80] sm:$0xff]  ;;  %v325_v37 = vld [vmem:[%s5061_s12 + $0x88] sm:$0xff] }
  0x19   : > { %v355_v35 = vmax.f32 %v323_v33, 0.0  ;;  %v356_v36 = vmax.f32 %v324_v34, 0.0  ;;  %v326_v38 = vld [vmem:[%s5061_s12 + $0x90] sm:$0xff]  ;;  %v357_v39 = vmax.f32 %v325_v37, 0.0  ;;  %v327_v41 = vld [vmem:[%s5061_s12 + $0x98] sm:$0xff]  ;;  %v328_v42 = vld [vmem:[%s5061_s12 + $0xa0] sm:$0xff] }
  0x1a   : > { %v358_v40 = vmax.f32 %v326_v38, 0.0  ;;  %v359_v43 = vmax.f32 %v327_v41, 0.0  ;;  %v360_v44 = vmax.f32 %v328_v42, 0.0  ;;  %v329_v45 = vld [vmem:[%s5061_s12 + $0xa8] sm:$0xff]  ;;  %v330_v46 = vld [vmem:[%s5061_s12 + $0xb0] sm:$0xff]  ;;  %v331_v49 = vld [vmem:[%s5061_s12 + $0xb8] sm:$0xff] }
  0x1b   : > { %4593 = vmatmul.mubr.msk.f32.gmra.mrb[2].mxu0 %vm7073_vm0, %v343_v11  ;;  %v361_v47 = vmax.f32 %v329_v45, 0.0  ;;  %v362_v48 = vmax.f32 %v330_v46, 0.0  ;;  %v332_v50 = vld [vmem:[%s5061_s12 + $0xc0] sm:$0xff]  ;;  %v363_v51 = vmax.f32 %v331_v49, 0.0  ;;  %v333_v53 = vld [vmem:[%s5061_s12 + $0xc8] sm:$0xff]  ;;  %v334_v54 = vld [vmem:[%s5061_s12 + $0xd0] sm:$0xff] }
  0x1c   : > { %4595 = vmatprep.mubr.msk.f32.mxu0 %vm7073_vm0, %v344_v12  ;;  %v364_v52 = vmax.f32 %v332_v50, 0.0  ;;  %v365_v55 = vmax.f32 %v333_v53, 0.0  ;;  %v366_v56 = vmax.f32 %v334_v54, 0.0  ;;  %v335_v57 = vld [vmem:[%s5061_s12 + $0xd8] sm:$0xff]  ;;  %v336_v58 = vld [vmem:[%s5061_s12 + $0xe0] sm:$0xff]  ;;  %v337_v61 = vld [vmem:[%s5061_s12 + $0xe8] sm:$0xff] }
  0x1d   : > { %v367_v59 = vmax.f32 %v335_v57, 0.0  ;;  %v368_v60 = vmax.f32 %v336_v58, 0.0  ;;  %v338_v62 = vld [vmem:[%s5061_s12 + $0xf0] sm:$0xff]  ;;  %v369_v63 = vmax.f32 %v337_v61, 0.0  ;;  %v339_v1 = vld [vmem:[%s5061_s12 + $0xf8] sm:$0xff]  ;;  %v4985_v3 = vmov 0.0  }
  0x1e   : > { %v370_v0 = vmax.f32 %v338_v62, 0.0  ;;  %v371_v2 = vmax.f32 %v339_v1, 0.0  ;;  %765 = vst.msk [vmem:[#allocation2 + $0x10] sm:$0xff] %vm7077_vm1, %v4985_v3  ;;  %766 = vst.msk [vmem:[#allocation2 + $0x18] sm:$0xff] %vm7077_vm1, %v4985_v3  ;;  %v5137_v8 = vld [vmem:[%s7067_s2] ss:$0 sm:$0xff] }
  0x1f   : > { %4596 = vmatmul.mubr.msk.f32.gmra.mrb[4].mxu0 %vm7073_vm0, %v345_v15  ;;  %767 = vst.msk [vmem:[#allocation2 + $0x120] sm:$0xff] %vm7077_vm1, %v4985_v3  ;;  %768 = vst.msk [vmem:[#allocation2 + $0x128] sm:$0xff] %vm7077_vm1, %v4985_v3  ;;  %v5139_v10 = vshrl.u32 %v769_v7, 7  ;;  %v7189_v34 = vmov 0  ;;  %v4274_v1 = vld [vmem:[%s7068_s3 + $0x10] sm:$0xff]  ;;  %v7201_v7 = vmov 0 }
  0x20   : > { %4598 = vmatprep.mubr.msk.f32.mxu0 %vm7073_vm0, %v346_v16  ;;  %v7202_v7 = vsel %vm5213_vm8, 4294967295, %v7201_v7  ;;  %v7234_v61 = vmov 0 }
  0x21   : > { %v772_v17 = vadd.s32 16, %v5139_v10  ;;  %v774_v25 = vadd.s32 32, %v5139_v10  ;;  %v806_v41 = vand.u32 15, %v5139_v10  ;;  %v775_v54 = vadd.s32 40, %v5139_v10 }
  0x23   : > { %4599 = vmatmul.mubr.msk.f32.gmra.mrb[6].mxu0 %vm7073_vm0, %v347_v19  ;;  %vm5185_vm5 = vcmp.gt.s32.totalorder %v806_v41, 0 }
  0x24   : > { %4601 = vmatprep.mubr.msk.f32.mxu0 %vm7073_vm0, %v348_v20 }
  0x25   : > { %v1282_v4 = vld [vmem:[#allocation2 + $0x10] sm:$0xff]  ;;  %v1283_v5 = vld [vmem:[#allocation2 + $0x18] sm:$0xff] }
  0x26   : > { %1570 = vrot.lane.b32.xlu0 %v1282_v4, %s4986_s13  ;;  %v1314_v6 = vld [vmem:[#allocation2 + $0x11] sm:$0xff]  ;;  %1572 = vrot.lane.b32.xlu1 %v1283_v5, %s4986_s13 }
  0x27   : > { %4602 = vmatmul.mubr.msk.f32.gmra.mrb[8].mxu0 %vm7073_vm0, %v349_v23 }
  0x28   : > { %4604 = vmatprep.mubr.msk.f32.mxu0 %vm7073_vm0, %v350_v24  ;;  %v820_v24 = vand.u32 15, %v772_v17  ;;  %v773_v17 = vadd.s32 24, %v5139_v10 }
  0x2a   : > { %1698 = vrot.lane.b32.xlu0 %v1314_v6, %s4987_s14  ;;  %vm5154_vm2 = vcmp.gt.s32.totalorder %v820_v24, 0 }
  0x2b   : > { %4605 = vmatmul.mubr.msk.f32.gmra.mrb[10].mxu0 %vm7073_vm0, %v351_v27  ;;  %v7190_v34 = vsel %vm5154_vm2, 4294967295, %v7189_v34 }
  0x2c   : > { %4607 = vmatprep.mubr.msk.f32.mxu0 %vm7073_vm0, %v352_v28  ;;  %v771_v28 = vadd.s32 8, %v5139_v10  ;;  %7191 = vst [vmem:[#allocation3_spill] sm:$0xff] %v7190_v34 }
  0x2e   : > { %v813_v37 = vand.u32 15, %v771_v28 }
  0x2f   : > { %4608 = vmatmul.mubr.msk.f32.gmra.mrb[12].mxu0 %vm7073_vm0, %v353_v31 }
  0x30   : > { %4610 = vmatprep.mubr.msk.f32.mxu0 %vm7073_vm0, %v354_v32  ;;  %vm5175_vm4 = vcmp.lt.s32.totalorder %v813_v37, 15 }
  0x33   : > { %4611 = vmatmul.mubr.msk.f32.gmra.mrb[14].mxu0 %vm7073_vm0, %v355_v35  ;;  %v834_v35 = vand.u32 15, %v774_v25  ;;  %v7205_v25 = vmov 0 }
  0x34   : > { %4613 = vmatprep.mubr.msk.f32.mxu0 %vm7073_vm0, %v356_v36 }
  0x35   : > { %vm5170_vm3 = vcmp.gt.s32.totalorder %v834_v35, 0  ;;  %v7207_v35 = vmov 0 }
  0x37   : > { %4614 = vmatmul.mubr.msk.f32.gmra.mrb[16].mxu0 %vm7073_vm0, %v357_v39 }
  0x38   : > { %4616 = vmatprep.mubr.msk.f32.mxu0 %vm7073_vm0, %v358_v40 }
  0x3b   : > { %4617 = vmatmul.mubr.msk.f32.gmra.mrb[18].mxu0 %vm7073_vm0, %v359_v43 }
  0x3c   : > { %4619 = vmatprep.mubr.msk.f32.mxu0 %vm7073_vm0, %v360_v44 }
  0x3f   : > { %4620 = vmatmul.mubr.msk.f32.gmra.mrb[20].mxu0 %vm7073_vm0, %v361_v47 }
  0x40   : > { %4622 = vmatprep.mubr.msk.f32.mxu0 %vm7073_vm0, %v362_v48  ;;  %v7193_v48 = vmov 0 }
  0x41   : > { %v7194_v48 = vsel %vm5170_vm3, 4294967295, %v7193_v48 }
  0x43   : > { %4623 = vmatmul.mubr.msk.f32.gmra.mrb[22].mxu0 %vm7073_vm0, %v363_v51 }
  0x44   : > { %4625 = vmatprep.mubr.msk.f32.mxu0 %vm7073_vm0, %v364_v52 }
  0x47   : > { %4626 = vmatmul.mubr.msk.f32.gmra.mrb[24].mxu0 %vm7073_vm0, %v365_v55  ;;  %v7197_v55 = vmov 0 }
  0x48   : > { %4628 = vmatprep.mubr.msk.f32.mxu0 %vm7073_vm0, %v366_v56  ;;  %v7198_v55 = vsel %vm5185_vm5, 4294967295, %v7197_v55 }
  0x49   : > { %7199 = vst [vmem:[#allocation5_spill] sm:$0xff] %v7198_v55 }
  0x4b   : > { %4629 = vmatmul.mubr.msk.f32.gmra.mrb[26].mxu0 %vm7073_vm0, %v367_v59  ;;  %v777_v59 = vadd.s32 56, %v5139_v10 }
  0x4c   : > { %4631 = vmatprep.mubr.msk.f32.mxu0 %vm7073_vm0, %v368_v60 }
  0x4f   : > { %4632 = vmatmul.mubr.msk.f32.gmra.mrb[28].mxu0 %vm7073_vm0, %v369_v63 }
  0x50   : > { %4634 = vmatprep.mubr.msk.f32.mxu0 %vm7073_vm0, %v370_v0 }
  0x53   : > { %4635 = vmatmul.mubr.msk.f32.gmra.mrb[30].mxu0 %vm7073_vm0, %v371_v2  ;;  %v4275_v2 = vld [vmem:[%s7068_s3 + $0x18] sm:$0xf] }
  0x54   : > { %v4847_v5 = vpack.c.bf16 %v4275_v2, %v4274_v1  ;;  %v784_v2 = vadd.s32 112, %v5139_v10 }
  0x56   : > { %4849 = vmatprep.subr.msk.bf16.mxu0 %vm5213_vm8, %v4847_v5  ;;  %4865 = vmatprep.subr.msk.bf16.mxu1 %vm5213_vm8, %v4847_v5 }
  0x57   : > { %4852 = vmatpush3.bf16.msk.msra.mxu0 %vm5213_vm8, %v4847_v5  ;;  %4866 = vmatpush3.bf16.msk.msra.mxu1 %vm5213_vm8, %v4847_v5  ;;  %vm7237_vm8 = vcmask 31744  }
  0xea   : > { %v4591_v9 = vpop.f32.mrb[0].mxu0 }
  0xeb   : > { %v547_v11 = vadd.f32 %v4591_v9, %v5137_v8  ;;  %v541_v12 = vpop.f32.mrb[1].mxu0 }
  0xec   : > { %v542_v13 = vadd.f32 %v5137_v8, %v541_v12 }
  0xed   : > { %v701_v14 = vmax.f32 %v547_v11, 0.0  ;;  %v841_v11 = vand.u32 15, %v775_v54 }
  0xee   : > { %v700_v15 = vmax.f32 %v542_v13, 0.0  ;;  %v4594_v16 = vpop.f32.mrb[2].mxu0  ;;  %v7231_v13 = vmov 0 }
  0xef   : > { %734 = vst.msk [vmem:[#allocation2 + $0x28] sm:$0xff] %vm7077_vm1, %v701_v14  ;;  %v557_v18 = vadd.f32 %v4594_v16, %v5137_v8  ;;  %v551_v19 = vpop.f32.mrb[3].mxu0  ;;  %vm5242_vm9 = vcmp.lt.s32.totalorder %v841_v11, 15  ;;  %v788_v11 = vadd.s32 144, %v5139_v10 }
  0xf0   : > { %733 = vst.msk [vmem:[#allocation2 + $0x20] sm:$0xff] %vm7077_vm1, %v700_v15  ;;  %v552_v20 = vadd.f32 %v5137_v8, %v551_v19  ;;  %v7206_v25 = vsel %vm5242_vm9, 4294967295, %v7205_v25 }
  0xf1   : > { %v703_v21 = vmax.f32 %v557_v18, 0.0  ;;  %v855_v18 = vand.u32 15, %v777_v59  ;;  %v783_v59 = vadd.s32 104, %v5139_v10 }
  0xf2   : > { %v702_v22 = vmax.f32 %v552_v20, 0.0  ;;  %v4597_v23 = vpop.f32.mrb[4].mxu0 }
  0xf3   : > { %736 = vst.msk [vmem:[#allocation2 + $0x38] sm:$0xff] %vm7077_vm1, %v703_v21  ;;  %v567_v26 = vadd.f32 %v4597_v23, %v5137_v8  ;;  %v561_v27 = vpop.f32.mrb[5].mxu0  ;;  %vm5254_vm10 = vcmp.lt.s32.totalorder %v855_v18, 15  ;;  %v785_v18 = vadd.s32 120, %v5139_v10 }
  0xf4   : > { %735 = vst.msk [vmem:[#allocation2 + $0x30] sm:$0xff] %vm7077_vm1, %v702_v22  ;;  %v562_v29 = vadd.f32 %v5137_v8, %v561_v27  ;;  %v779_v22 = vadd.s32 72, %v5139_v10  ;;  %v7208_v35 = vsel %vm5254_vm10, 4294967295, %v7207_v35 }
  0xf5   : > { %v705_v30 = vmax.f32 %v567_v26, 0.0 }
  0xf6   : > { %v704_v31 = vmax.f32 %v562_v29, 0.0  ;;  %v1285_v32 = vld [vmem:[#allocation2 + $0x28] sm:$0xff]  ;;  %v4600_v33 = vpop.f32.mrb[6].mxu0 }
  0xf7   : > { %738 = vst.msk [vmem:[#allocation2 + $0x48] sm:$0xff] %vm7077_vm1, %v705_v30  ;;  %1576 = vrot.lane.b32.xlu1 %v1285_v32, %s4986_s13  ;;  %v1284_v36 = vld [vmem:[#allocation2 + $0x20] sm:$0xff]  ;;  %v577_v38 = vadd.f32 %v4600_v33, %v5137_v8  ;;  %v571_v39 = vpop.f32.mrb[7].mxu0  ;;  %v827_v33 = vand.u32 15, %v773_v17 }
  0xf8   : > { %737 = vst.msk [vmem:[#allocation2 + $0x40] sm:$0xff] %vm7077_vm1, %v704_v31  ;;  %1574 = vrot.lane.b32.xlu0 %v1284_v36, %s4986_s13  ;;  %v572_v40 = vadd.f32 %v5137_v8, %v571_v39  ;;  %v5165_v42 = vld [vmem:[#allocation2 + $0x1f] sm:$0xff]  ;;  %v781_v31 = vadd.s32 88, %v5139_v10 }
  0xf9   : > { %7192 = vst [vmem:[#allocation4_spill] sm:$0xff] %v5165_v42  ;;  %v707_v43 = vmax.f32 %v577_v38, 0.0  ;;  %v1316_v45 = vld [vmem:[#allocation2 + $0x21] sm:$0xff]  ;;  %v1315_v50 = vld [vmem:[#allocation2 + $0x19] sm:$0xff]  ;;  %v869_v38 = vand.u32 15, %v779_v22  ;;  %vm5272_vm11 = vcmp.lt.s32.totalorder %v827_v33, 15 }
  0xfa   : > { %v706_v46 = vmax.f32 %v572_v40, 0.0  ;;  %v4603_v47 = vpop.f32.mrb[8].mxu0  ;;  %v2817_v57 = vld [vmem:[#allocation2 + $0x38] sm:$0xff]  ;;  %v1507_v62 = vsel %vm5175_vm4, %v1315_v50, 0.0  ;;  %v883_v50 = vand.u32 15, %v781_v31  ;;  %v932_v31 = vand.u32 15, %v788_v11 }
  0xfb   : > { %1971 = vrot.lane.b32.xlu1 %v1316_v45, %s4987_s14  ;;  %740 = vst.msk [vmem:[#allocation2 + $0x58] sm:$0xff] %vm7077_vm1, %v707_v43  ;;  %v587_v51 = vadd.f32 %v4603_v47, %v5137_v8  ;;  %v581_v52 = vpop.f32.mrb[9].mxu0  ;;  %v5189_v56 = vld [vmem:[#allocation2 + $0x2f] sm:$0xff]  ;;  %vm5277_vm12 = vcmp.lt.s32.totalorder %v869_v38, 15  ;;  %v790_v33 = vadd.s32 160, %v5139_v10  ;;  %v7222_v11 = vmov 0 }
  0xfc   : > { %1702 = vrot.lane.b32.xlu0 %v1316_v45, %s4987_s14  ;;  %739 = vst.msk [vmem:[#allocation2 + $0x50] sm:$0xff] %vm7077_vm1, %v706_v46  ;;  %v582_v53 = vadd.f32 %v5137_v8, %v581_v52  ;;  %7200 = vst [vmem:[#allocation6_spill] sm:$0xff] %v5189_v56  ;;  %v1286_v16 = vld [vmem:[#allocation2 + $0x30] sm:$0xff]  ;;  %vm5297_vm13 = vcmp.lt.s32.totalorder %v883_v50, 15  ;;  %vm5343_vm7 = vcmp.gt.s32.totalorder %v932_v31, 0 }
  0xfd   : > { %v709_v58 = vmax.f32 %v587_v51, 0.0  ;;  %v2848_v28 = vld [vmem:[#allocation2 + $0x31] sm:$0xff]  ;;  %v1317_v52 = vld [vmem:[#allocation2 + $0x29] sm:$0xff] }
  0xfe   : > { %v708_v63 = vmax.f32 %v582_v53, 0.0  ;;  %v4606_v0 = vpop.f32.mrb[10].mxu0 }
  0xff   : > { %1700 = vrot.lane.b32.xlu1 %v1507_v62, %s4987_s14  ;;  %742 = vst.msk [vmem:[#allocation2 + $0x68] sm:$0xff] %vm7077_vm1, %v709_v58  ;;  %v597_v3 = vadd.f32 %v4606_v0, %v5137_v8  ;;  %v591_v4 = vpop.f32.mrb[11].mxu0  ;;  %v5217_v9 = vld [vmem:[#allocation2 + $0x3f] sm:$0xff] }
 0x100   : > { %2978 = vrot.lane.b32.xlu0 %v2817_v57, %s4986_s13  ;;  %741 = vst.msk [vmem:[#allocation2 + $0x60] sm:$0xff] %vm7077_vm1, %v708_v63  ;;  %v592_v6 = vadd.f32 %v5137_v8, %v591_v4  ;;  %7203 = vst [vmem:[#allocation7_spill] sm:$0xff] %v5217_v9 }
 0x101   : > { %v711_v12 = vmax.f32 %v597_v3, 0.0  ;;  %v1509_v3 = vsel %vm5272_vm11, %v1317_v52, 0.0 }
 0x102   : > { %v710_v14 = vmax.f32 %v592_v6, 0.0  ;;  %v4609_v15 = vpop.f32.mrb[12].mxu0 }
 0x103   : > { %1580 = vrot.lane.b32.xlu1 %v2817_v57, %s4986_s13  ;;  %744 = vst.msk [vmem:[#allocation2 + $0x78] sm:$0xff] %vm7077_vm1, %v711_v12  ;;  %v5233_v19 = vld [vmem:[#allocation2 + $0x49] sm:$0xff]  ;;  %v607_v20 = vadd.f32 %v4609_v15, %v5137_v8  ;;  %v601_v21 = vpop.f32.mrb[13].mxu0  ;;  %v1900_v12 = vsel %vm5175_vm4, %v1317_v52, 0.0  ;;  %v800_v52 = vadd.s32 240, %v5139_v10  ;;  %v5509_v50 = vld [vmem:[#allocation2 + $0x51] sm:$0xff] }
 0x104   : > { %1578 = vrot.lane.b32.xlu0 %v1286_v16, %s4986_s13  ;;  %743 = vst.msk [vmem:[#allocation2 + $0x70] sm:$0xff] %vm7077_vm1, %v710_v14  ;;  %v602_v23 = vadd.f32 %v5137_v8, %v601_v21  ;;  %v5240_v24 = vld [vmem:[#allocation2 + $0x4f] sm:$0xff] }
 0x105   : > { %7204 = vst [vmem:[#allocation8_spill] sm:$0xff] %v5240_v24  ;;  %v713_v26 = vmax.f32 %v607_v20, 0.0  ;;  %v1289_v20 = vld [vmem:[#allocation2 + $0x48] sm:$0xff] }
 0x106   : > { %v712_v29 = vmax.f32 %v602_v23, 0.0  ;;  %v4612_v30 = vpop.f32.mrb[14].mxu0  ;;  %v7258_v23 = vmov 0 }
 0x107   : > { %3104 = vrot.lane.b32.xlu1 %v2848_v28, %s4987_s14  ;;  %746 = vst.msk [vmem:[#allocation2 + $0x88] sm:$0xff] %vm7077_vm1, %v713_v26  ;;  %v617_v36 = vadd.f32 %v4612_v30, %v5137_v8  ;;  %v611_v37 = vpop.f32.mrb[15].mxu0  ;;  %v5260_v39 = vld [vmem:[#allocation2 + $0x59] sm:$0xff] }
 0x108   : > { %1706 = vrot.lane.b32.xlu0 %v2848_v28, %s4987_s14  ;;  %745 = vst.msk [vmem:[#allocation2 + $0x80] sm:$0xff] %vm7077_vm1, %v712_v29  ;;  %v612_v40 = vadd.f32 %v5137_v8, %v611_v37  ;;  %v1515_v43 = vsel %vm5277_vm12, %v5260_v39, 0.0 }
 0x109   : > { %v715_v45 = vmax.f32 %v617_v36, 0.0 }
 0x10a   : > { %v714_v46 = vmax.f32 %v612_v40, 0.0  ;;  %v4615_v47 = vpop.f32.mrb[16].mxu0  ;;  %v911_v40 = vand.u32 15, %v785_v18  ;;  %v5598_v63 = vld [vmem:[#allocation2 + $0x78] sm:$0xff] }
 0x10b   : > { %1975 = vrot.lane.b32.xlu1 %v2848_v28, %s4987_s14  ;;  %748 = vst.msk [vmem:[#allocation2 + $0x98] sm:$0xff] %vm7077_vm1, %v715_v45  ;;  %v627_v54 = vadd.f32 %v4615_v47, %v5137_v8  ;;  %v621_v57 = vpop.f32.mrb[17].mxu0  ;;  %v5282_v58 = vld [vmem:[#allocation2 + $0x69] sm:$0xff]  ;;  %v904_v28 = vand.u32 15, %v784_v2  ;;  %v7220_v2 = vmov 0 }
 0x10c   : > { %2976 = vrot.lane.b32.xlu0 %v1286_v16, %s4986_s13  ;;  %747 = vst.msk [vmem:[#allocation2 + $0x90] sm:$0xff] %vm7077_vm1, %v714_v46  ;;  %v622_v62 = vadd.f32 %v5137_v8, %v621_v57  ;;  %v897_v16 = vand.u32 15, %v783_v59  ;;  %v786_v46 = vadd.s32 128, %v5139_v10  ;;  %v7217_v57 = vmov 0  ;;  %v2850_v59 = vld [vmem:[#allocation2 + $0x41] sm:$0xff]  ;;  %v5600_v32 = vld [vmem:[#allocation2 + $0x70] sm:$0xff] }
 0x10d   : > { %v717_v1 = vmax.f32 %v627_v54, 0.0  ;;  %vm5339_vm15 = vcmp.gt.s32.totalorder %v904_v28, 0  ;;  %v7221_v2 = vsel %vm5343_vm7, 4294967295, %v7220_v2  ;;  %vm5350_vm0 = vcmp.lt.s32.totalorder %v911_v40, 15 }
 0x10e   : > { %v716_v4 = vmax.f32 %v622_v62, 0.0  ;;  %v4618_v6 = vpop.f32.mrb[18].mxu0  ;;  %vm5322_vm14 = vcmp.lt.s32.totalorder %v897_v16, 15  ;;  %v7218_v57 = vsel %vm5339_vm15, 4294967295, %v7217_v57  ;;  %v7223_v11 = vsel %vm5350_vm0, 4294967295, %v7222_v11 }
 0x10f   : > { %1704 = vrot.lane.b32.xlu1 %v1509_v3, %s4987_s14  ;;  %750 = vst.msk [vmem:[#allocation2 + $0xa8] sm:$0xff] %vm7077_vm1, %v717_v1  ;;  %v637_v14 = vadd.f32 %v4618_v6, %v5137_v8  ;;  %v631_v15 = vpop.f32.mrb[19].mxu0  ;;  %v5307_v17 = vld [vmem:[#allocation2 + $0x79] sm:$0xff]  ;;  %7219 = vst [vmem:[#allocation9_spill] sm:$0xff] %v7218_v57  ;;  %v946_v3 = vand.u32 15, %v790_v33  ;;  %v918_v18 = vand.u32 15, %v786_v46 }
 0x110   : > { %1973 = vrot.lane.b32.xlu0 %v1900_v12, %s4987_s14  ;;  %749 = vst.msk [vmem:[#allocation2 + $0xa0] sm:$0xff] %vm7077_vm1, %v716_v4  ;;  %v632_v21 = vadd.f32 %v5137_v8, %v631_v15  ;;  %v792_v4 = vadd.s32 176, %v5139_v10  ;;  %v1288_v6 = vld [vmem:[#allocation2 + $0x40] sm:$0xff]  ;;  %7224 = vst [vmem:[#allocation10_spill] sm:$0xff] %v7223_v11  ;;  %v787_v12 = vadd.s32 136, %v5139_v10  ;;  %v794_v33 = vadd.s32 192, %v5139_v10  ;;  %v5671_v11 = vpop.permute.xlu0 %1570 }
 0x111   : > { %v719_v26 = vmax.f32 %v637_v14, 0.0  ;;  %vm5377_vm6 = vcmp.gt.s32.totalorder %v946_v3, 0  ;;  %v7226_v46 = vmov 0  ;;  %vm5389_vm15 = vcmp.gt.s32.totalorder %v918_v18, 0  ;;  %v5616_v41 = vld [vmem:[#allocation2 + $0x80] sm:$0xff]  ;;  %7283 = vst [vmem:[#allocation34_spill] sm:$0xff] %v5671_v11 }
 0x112   : > { %v718_v29 = vmax.f32 %v632_v21, 0.0  ;;  %v4621_v30 = vpop.f32.mrb[20].mxu0  ;;  %v789_v21 = vadd.s32 152, %v5139_v10  ;;  %v7227_v46 = vsel %vm5377_vm6, 4294967295, %v7226_v46  ;;  %vm7255_vm7 = vcmask 31744   ;;  %v5630_v24 = vld [vmem:[#allocation2 + $0x98] sm:$0xff] }
 0x113   : > { %1584 = vrot.lane.b32.xlu1 %v1289_v20, %s4986_s13  ;;  %752 = vst.msk [vmem:[#allocation2 + $0xb8] sm:$0xff] %vm7077_vm1, %v719_v26  ;;  %v647_v37 = vadd.f32 %v4621_v30, %v5137_v8  ;;  %v641_v38 = vpop.f32.mrb[21].mxu0  ;;  %v5327_v45 = vld [vmem:[#allocation2 + $0x89] sm:$0xff]  ;;  %vm7256_vm6 = vmmov %vm7255_vm7  ;;  %v1519_v57 = vsel %vm5322_vm14, %v5307_v17, 0.0 }
 0x114   : > { %2982 = vrot.lane.b32.xlu0 %v1289_v20, %s4986_s13  ;;  %751 = vst.msk [vmem:[#allocation2 + $0xb0] sm:$0xff] %vm7077_vm1, %v718_v29  ;;  %v642_v47 = vadd.f32 %v5137_v8, %v641_v38  ;;  %v939_v3 = vand.u32 15, %v789_v21  ;;  %v791_v21 = vadd.s32 168, %v5139_v10  ;;  %v5688_v11 = vpop.permute.xlu0 %1698 }
 0x115   : > { %v721_v54 = vmax.f32 %v647_v37, 0.0  ;;  %7287 = vst [vmem:[#allocation38_spill] sm:$0xff] %v5688_v11  ;;  %v1867_v11 = vsel %vm5185_vm5, %v5165_v42, 0.0  ;;  %vm7323_vm5 = vcmask 64512  }
 0x116   : > { %v720_v62 = vmax.f32 %v642_v47, 0.0  ;;  %v4624_v1 = vpop.f32.mrb[22].mxu0  ;;  %v960_v47 = vand.u32 15, %v792_v4  ;;  %v7229_v4 = vmov 0  ;;  %v953_v27 = vand.u32 15, %v791_v21 }
 0x117   : > { %3108 = vrot.lane.b32.xlu1 %v2850_v59, %s4987_s14  ;;  %754 = vst.msk [vmem:[#allocation2 + $0xc8] sm:$0xff] %vm7077_vm1, %v721_v54  ;;  %v5355_v14 = vld [vmem:[#allocation2 + $0x99] sm:$0xff]  ;;  %v657_v15 = vadd.f32 %v4624_v1, %v5137_v8  ;;  %v651_v16 = vpop.f32.mrb[23].mxu0  ;;  %v7230_v4 = vsel %vm5389_vm15, 4294967295, %v7229_v4  ;;  %vm5422_vm15 = vcmp.lt.s32.totalorder %v939_v3, 15  ;;  %v793_v3 = vadd.s32 184, %v5139_v10 }
 0x118   : > { %1582 = vrot.lane.b32.xlu0 %v1288_v6, %s4986_s13  ;;  %753 = vst.msk [vmem:[#allocation2 + $0xc0] sm:$0xff] %vm7077_vm1, %v720_v62  ;;  %v652_v20 = vadd.f32 %v5137_v8, %v651_v16  ;;  %v5362_v26 = vld [vmem:[#allocation2 + $0x9f] sm:$0xff]  ;;  %v925_v62 = vand.u32 15, %v787_v12  ;;  %v6023_v53 = vld [vmem:[#allocation2 + $0xa7] sm:$0xff] }
 0x119   : > { %7225 = vst [vmem:[#allocation11_spill] sm:$0xff] %v5362_v26  ;;  %v723_v30 = vmax.f32 %v657_v15, 0.0  ;;  %v1319_v54 = vld [vmem:[#allocation2 + $0x39] sm:$0xff] }
 0x11a   : > { %v722_v38 = vmax.f32 %v652_v20, 0.0  ;;  %v4627_v40 = vpop.f32.mrb[24].mxu0  ;;  %v1511_v18 = vsel %vm5242_vm9, %v1319_v54, 0.0  ;;  %vm5412_vm3 = vcmp.lt.s32.totalorder %v925_v62, 15  ;;  %vm7241_vm9 = vmmov %vm7237_vm8 }
 0x11b   : > { %1979 = vrot.lane.b32.xlu1 %v2850_v59, %s4987_s14  ;;  %756 = vst.msk [vmem:[#allocation2 + $0xd8] sm:$0xff] %vm7077_vm1, %v723_v30  ;;  %v5383_v1 = vld [vmem:[#allocation2 + $0xa9] sm:$0xff]  ;;  %v667_v15 = vadd.f32 %v4627_v40, %v5137_v8  ;;  %v661_v16 = vpop.f32.mrb[25].mxu0  ;;  %v974_v40 = vand.u32 15, %v794_v33  ;;  %v7235_v61 = vsel %vm5412_vm3, 4294967295, %v7234_v61 }
 0x11c   : > { %7228 = vst [vmem:[#allocation12_spill] sm:$0xff] %v5383_v1  ;;  %1710 = vrot.lane.b32.xlu0 %v2850_v59, %s4987_s14  ;;  %755 = vst.msk [vmem:[#allocation2 + $0xd0] sm:$0xff] %vm7077_vm1, %v722_v38  ;;  %v662_v20 = vadd.f32 %v5137_v8, %v661_v16  ;;  %v5393_v37 = vld [vmem:[#allocation2 + $0xaf] sm:$0xff]  ;;  %vm5406_vm1 = vcmp.gt.s32.totalorder %v960_v47, 0  ;;  %v7238_v59 = vmov 0 }
 0x11d   : > { %v725_v30 = vmax.f32 %v667_v15, 0.0  ;;  %v7232_v13 = vsel %vm5406_vm1, 4294967295, %v7231_v13  ;;  %v796_v15 = vadd.s32 208, %v5139_v10  ;;  %7236 = vst [vmem:[#allocation14_spill] sm:$0xff] %v7235_v61  ;;  %v7239_v59 = vsel %vm5422_vm15, 4294967295, %v7238_v59 }
 0x11e   : > { %v724_v38 = vmax.f32 %v662_v20, 0.0  ;;  %v4630_v16 = vpop.f32.mrb[26].mxu0  ;;  %7233 = vst [vmem:[#allocation13_spill] sm:$0xff] %v7232_v13  ;;  %7240 = vst [vmem:[#allocation15_spill] sm:$0xff] %v7239_v59 }
 0x11f   : > { %1708 = vrot.lane.b32.xlu1 %v1511_v18, %s4987_s14  ;;  %758 = vst.msk [vmem:[#allocation2 + $0xe8] sm:$0xff] %vm7237_vm8, %v725_v30  ;;  %v5417_v33 = vld [vmem:[#allocation2 + $0xb9] sm:$0xff]  ;;  %v677_v20 = vadd.f32 %v4630_v16, %v5137_v8  ;;  %v671_v47 = vpop.f32.mrb[27].mxu0  ;;  %vm5436_vm8 = vcmp.gt.s32.totalorder %v974_v40, 0  ;;  %v988_v44 = vand.u32 15, %v796_v15  ;;  %v1902_v40 = vsel %vm5272_vm11, %v1319_v54, 0.0 }
 0x120   : > { %2980 = vrot.lane.b32.xlu0 %v1288_v6, %s4986_s13  ;;  %757 = vst.msk [vmem:[#allocation2 + $0xe0] sm:$0xff] %vm7241_vm9, %v724_v38  ;;  %v672_v62 = vadd.f32 %v5137_v8, %v671_v47  ;;  %v5428_v18 = vld [vmem:[#allocation2 + $0xbf] sm:$0xff]  ;;  %v7243_v6 = vmov 0  ;;  %v2913_v38 = vsel %vm5175_vm4, %v1319_v54, 0.0  ;;  %vm7247_vm4 = vmmov %vm7241_vm9  ;;  %v1290_v54 = vld [vmem:[#allocation2 + $0x50] sm:$0xff] }
 0x121   : > { %7242 = vst [vmem:[#allocation16_spill] sm:$0xff] %v5428_v18  ;;  %v727_v31 = vmax.f32 %v677_v20, 0.0  ;;  %v7244_v6 = vsel %vm5436_vm8, 4294967295, %v7243_v6  ;;  %v798_v20 = vadd.s32 224, %v5139_v10  ;;  %v5455_v15 = vld [vmem:[#allocation2 + $0x58] sm:$0xff]  ;;  %v5719_v42 = vld [vmem:[#allocation2 + $0xc1] sm:$0xff] }
 0x122   : > { %7245 = vst [vmem:[#allocation17_spill] sm:$0xff] %v7244_v6  ;;  %v726_v47 = vmax.f32 %v672_v62, 0.0  ;;  %v4633_v60 = vpop.f32.mrb[28].mxu0  ;;  %7292 = vst [vmem:[#allocation42_spill] sm:$0xff] %v5719_v42  ;;  %v5723_v55 = vld [vmem:[#allocation2 + $0xd8] sm:$0xff]  ;;  %v6114_v36 = vld [vmem:[#allocation2 + $0xc7] sm:$0xff] }
 0x123   : > { %3106 = vrot.lane.b32.xlu1 %v2913_v38, %s4987_s14  ;;  %760 = vst.msk [vmem:[#allocation2 + $0xf8] sm:$0xff] %vm7241_vm9, %v727_v31  ;;  %v5450_v30 = vld [vmem:[#allocation2 + $0xc9] sm:$0xff]  ;;  %v687_v49 = vadd.f32 %v4633_v60, %v5137_v8  ;;  %v681_v12 = vpop.f32.mrb[29].mxu0  ;;  %vm5470_vm9 = vcmp.gt.s32.totalorder %v988_v44, 0  ;;  %v1002_v16 = vand.u32 15, %v798_v20  ;;  %v967_v31 = vand.u32 15, %v793_v3 }
 0x124   : > { %7246 = vst [vmem:[#allocation18_spill] sm:$0xff] %v5450_v30  ;;  %1977 = vrot.lane.b32.xlu0 %v1902_v40, %s4987_s14  ;;  %759 = vst.msk [vmem:[#allocation2 + $0xf0] sm:$0xff] %vm7247_vm4, %v726_v47  ;;  %v682_v62 = vadd.f32 %v5137_v8, %v681_v12  ;;  %v5459_v38 = vld [vmem:[#allocation2 + $0xcf] sm:$0xff]  ;;  %v7249_v12 = vmov 0  ;;  %vm5477_vm4 = vcmp.lt.s32.totalorder %v953_v27, 15  ;;  %v795_v44 = vadd.s32 200, %v5139_v10 }
 0x125   : > { %7248 = vst [vmem:[#allocation19_spill] sm:$0xff] %v5459_v38  ;;  %v729_v21 = vmax.f32 %v687_v49, 0.0  ;;  %v7250_v12 = vsel %vm5470_vm9, 4294967295, %v7249_v12  ;;  %v7252_v49 = vmov 0  ;;  %v1016_v3 = vand.u32 15, %v800_v52  ;;  %7293 = vst [vmem:[#allocation43_spill] sm:$0xff] %v5723_v55 }
 0x126   : > { %v728_v29 = vmax.f32 %v682_v62, 0.0  ;;  %v4636_v47 = vpop.f32.mrb[30].mxu0  ;;  %7251 = vst [vmem:[#allocation20_spill] sm:$0xff] %v7250_v12  ;;  %v7253_v49 = vsel %vm5477_vm4, 4294967295, %v7252_v49  ;;  %v1916_v12 = vsel %vm5412_vm3, %v5383_v1, 0.0  ;;  %7373 = vst [vmem:[#allocation82_spill] sm:$0xff] %v6114_v36 }
 0x127   : > { %1588 = vrot.lane.b32.xlu1 %v5455_v15, %s4986_s13  ;;  %7254 = vst [vmem:[#allocation21_spill] sm:$0xff] %v7253_v49  ;;  %762 = vst.msk [vmem:[#allocation2 + $0x108] sm:$0xff] %vm7255_vm7, %v729_v21  ;;  %v5482_v40 = vld [vmem:[#allocation2 + $0xd9] sm:$0xff]  ;;  %v697_v62 = vadd.f32 %v4636_v47, %v5137_v8  ;;  %v691_v60 = vpop.f32.mrb[31].mxu0  ;;  %v1513_v21 = vsel %vm5254_vm10, %v5233_v19, 0.0  ;;  %vm5511_vm7 = vcmp.lt.s32.totalorder %v967_v31, 15 }
 0x128   : > { %1586 = vrot.lane.b32.xlu0 %v1290_v54, %s4986_s13  ;;  %761 = vst.msk [vmem:[#allocation2 + $0x100] sm:$0xff] %vm7256_vm6, %v728_v29  ;;  %v692_v20 = vadd.f32 %v5137_v8, %v691_v60  ;;  %v5489_v27 = vld [vmem:[#allocation2 + $0xdf] sm:$0xff]  ;;  %v799_v60 = vadd.s32 232, %v5139_v10  ;;  %vm5504_vm6 = vcmp.gt.s32.totalorder %v1002_v16, 0  ;;  %v981_v47 = vand.u32 15, %v795_v44 }
 0x129   : > { %7257 = vst [vmem:[#allocation22_spill] sm:$0xff] %v5489_v27  ;;  %v731_v28 = vmax.f32 %v697_v62, 0.0  ;;  %v7259_v23 = vsel %vm5504_vm6, 4294967295, %v7258_v23  ;;  %vm7263_vm10 = vcmask 31744   ;;  %v2915_v44 = vsel %vm5272_vm11, %v5233_v19, 0.0  ;;  %v5662_v27 = vld [vmem:[#allocation2 + $0xb8] sm:$0xff] }
 0x12a   : > { %v730_v8 = vmax.f32 %v692_v20, 0.0  ;;  %7260 = vst [vmem:[#allocation23_spill] sm:$0xff] %v7259_v23  ;;  %v797_v20 = vadd.s32 216, %v5139_v10  ;;  %vm7264_vm1 = vmmov %vm7263_vm10  ;;  %v7269_v16 = vmov 0  ;;  %v1523_v23 = vsel %vm5412_vm3, %v5355_v14, 0.0 }
 0x12b   : > { %1712 = vrot.lane.b32.xlu1 %v1513_v21, %s4987_s14  ;;  %764 = vst.msk [vmem:[#allocation2 + $0x118] sm:$0xff] %vm7263_vm10, %v731_v28  ;;  %v5516_v29 = vld [vmem:[#allocation2 + $0xe9] sm:$0xff]  ;;  %v1009_v21 = vand.u32 15, %v799_v60  ;;  %vm5541_vm10 = vcmp.lt.s32.totalorder %v981_v47, 15  ;;  %v5555_v60 = vld [vmem:[#allocation2 + $0x60] sm:$0xff]  ;;  %7282 = vst [vmem:[#allocation33_spill] sm:$0xff] %v5662_v27 }
 0x12c   : > { %1714 = vrot.lane.b32.xlu0 %v5509_v50, %s4987_s14  ;;  %763 = vst.msk [vmem:[#allocation2 + $0x110] sm:$0xff] %vm7264_vm1, %v730_v8  ;;  %v5522_v52 = vld [vmem:[#allocation2 + $0xef] sm:$0xff]  ;;  %vm5536_vm1 = vcmp.gt.s32.totalorder %v1016_v3, 0  ;;  %v7266_v8 = vmov 0  ;;  %v7270_v16 = vsel %vm5541_vm10, 4294967295, %v7269_v16  ;;  %v995_v31 = vand.u32 15, %v797_v20 }
 0x12d   : > { %7265 = vst [vmem:[#allocation24_spill] sm:$0xff] %v5522_v52  ;;  %v7267_v8 = vsel %vm5536_vm1, 4294967295, %v7266_v8  ;;  %7271 = vst [vmem:[#allocation26_spill] sm:$0xff] %v7270_v16  ;;  %v5548_v28 = vld [vmem:[#allocation2 + $0x68] sm:$0xff]  ;;  %vm5563_vm11 = vcmp.lt.s32.totalorder %v1009_v21, 15  ;;  %vm7138_vm1 = vcmask 97280  }
 0x12e   : > { %7268 = vst [vmem:[#allocation25_spill] sm:$0xff] %v7267_v8  ;;  %vm5571_vm8 = vcmp.lt.s32.totalorder %v995_v31, 15  ;;  %v5594_v47 = vld [vmem:[#allocation2 + $0x61] sm:$0xff]  ;;  %v1517_v31 = vsel %vm5297_vm13, %v5282_v58, 0.0  ;;  %vm7150_vm6 = vcmask 64512   ;;  %vm7290_vm3 = vcmask 31744  }
 0x12f   : > { %3110 = vrot.lane.b32.xlu1 %v2915_v44, %s4987_s14  ;;  %v5545_v0 = vld [vmem:[#allocation2 + $0xf9] sm:$0xff]  ;;  %v5614_v20 = vld [vmem:[#allocation2 + $0x88] sm:$0xff]  ;;  %v1533_v34 = vsel %vm5571_vm8, %v5516_v29, 0.0 }
 0x130   : > { %2984 = vrot.lane.b32.xlu0 %v1290_v54, %s4986_s13  ;;  %v5550_v51 = vld [vmem:[#allocation2 + $0xff] sm:$0xff]  ;;  %v7273_v54 = vmov 0  ;;  %v5650_v52 = vld [vmem:[#allocation2 + $0xa8] sm:$0xff] }
 0x131   : > { %7272 = vst [vmem:[#allocation27_spill] sm:$0xff] %v5550_v51  ;;  %v7274_v54 = vsel %vm5563_vm11, 4294967295, %v7273_v54  ;;  %v1521_v51 = vsel %vm5350_vm0, %v5327_v45, 0.0  ;;  %v5646_v8 = vld [vmem:[#allocation2 + $0xa1] sm:$0xff]  ;;  %7281 = vst [vmem:[#allocation32_spill] sm:$0xff] %v5650_v52 }
 0x132   : > { %7275 = vst [vmem:[#allocation28_spill] sm:$0xff] %v7274_v54  ;;  %v5567_v44 = vld [vmem:[#allocation2 + $0x119] sm:$0xff]  ;;  %7280 = vst [vmem:[#allocation31_spill] sm:$0xff] %v5646_v8 }
 0x133   : > { %7276 = vst [vmem:[#allocation29_spill] sm:$0xff] %v5567_v44  ;;  %1592 = vrot.lane.b32.xlu1 %v5548_v28, %s4986_s13  ;;  %v5575_v22 = vld [vmem:[#allocation2 + $0x109] sm:$0xff] }
 0x134   : > { %1590 = vrot.lane.b32.xlu0 %v5555_v60, %s4986_s13  ;;  %v5582_v21 = vld [vmem:[#allocation2 + $0x10f] sm:$0xff] }
 0x135   : > { %7279 = vst [vmem:[#allocation30_spill] sm:$0xff] %v5582_v21  ;;  %v5632_v21 = vld [vmem:[#allocation2 + $0x90] sm:$0xff] }
 0x137   : > { %1716 = vrot.lane.b32.xlu1 %v1515_v43, %s4987_s14  ;;  %v5610_v43 = vld [vmem:[#allocation2 + $0x71] sm:$0xff] }
 0x138   : > { %1718 = vrot.lane.b32.xlu0 %v5594_v47, %s4987_s14 }
 0x13b   : > { %1596 = vrot.lane.b32.xlu1 %v5598_v63, %s4986_s13 }
 0x13c   : > { %1594 = vrot.lane.b32.xlu0 %v5600_v32, %s4986_s13 }
 0x13f   : > { %1720 = vrot.lane.b32.xlu1 %v1517_v31, %s4987_s14  ;;  %v5626_v31 = vld [vmem:[#allocation2 + $0x81] sm:$0xff] }
 0x140   : > { %1722 = vrot.lane.b32.xlu0 %v5610_v43, %s4987_s14 }
 0x143   : > { %1600 = vrot.lane.b32.xlu1 %v5614_v20, %s4986_s13 }
 0x144   : > { %1598 = vrot.lane.b32.xlu0 %v5616_v41, %s4986_s13 }
 0x147   : > { %1724 = vrot.lane.b32.xlu1 %v1519_v57, %s4987_s14  ;;  %v5642_v57 = vld [vmem:[#allocation2 + $0x91] sm:$0xff] }
 0x148   : > { %1726 = vrot.lane.b32.xlu0 %v5626_v31, %s4987_s14 }
 0x14b   : > { %1604 = vrot.lane.b32.xlu1 %v5630_v24, %s4986_s13 }
 0x14c   : > { %1602 = vrot.lane.b32.xlu0 %v5632_v21, %s4986_s13 }
 0x14f   : > { %1728 = vrot.lane.b32.xlu1 %v1521_v51, %s4987_s14  ;;  %v5658_v51 = vld [vmem:[#allocation2 + $0xa0] sm:$0xff] }
 0x150   : > { %1730 = vrot.lane.b32.xlu0 %v5642_v57, %s4987_s14 }
 0x153   : > { %2003 = vrot.lane.b32.xlu1 %v5646_v8, %s4987_s14 }
 0x154   : > { %1608 = vrot.lane.b32.xlu0 %v5650_v52, %s4986_s13  ;;  %v5682_v52 = vld [vmem:[#allocation2 + $0xb1] sm:$0xff] }
 0x155   : > { %7285 = vst [vmem:[#allocation36_spill] sm:$0xff] %v5682_v52 }
 0x157   : > { %1732 = vrot.lane.b32.xlu1 %v1523_v23, %s4987_s14  ;;  %v5674_v23 = vld [vmem:[#allocation2 + $0xb0] sm:$0xff] }
 0x158   : > { %1606 = vrot.lane.b32.xlu0 %v5658_v51, %s4986_s13  ;;  %7284 = vst [vmem:[#allocation35_spill] sm:$0xff] %v5674_v23 }
 0x15b   : > { %1612 = vrot.lane.b32.xlu1 %v5662_v27, %s4986_s13  ;;  %v1525_v27 = vsel %vm5422_vm15, %v5383_v1, 0.0 }
 0x15c   : > { %1734 = vrot.lane.b32.xlu0 %v5646_v8, %s4987_s14  ;;  %v5684_v8 = vpop.permute.xlu1 %1572 }
 0x15d   : > { %7286 = vst [vmem:[#allocation37_spill] sm:$0xff] %v5684_v8  ;;  %v5702_v8 = vld [vmem:[#allocation2 + $0xc0] sm:$0xff] }
 0x15f   : > { %2005 = vrot.lane.b32.xlu1 %v1916_v12, %s4987_s14  ;;  %v5690_v12 = vld [vmem:[#allocation2 + $0xc8] sm:$0xff] }
 0x160   : > { %1610 = vrot.lane.b32.xlu0 %v5674_v23, %s4986_s13  ;;  %7288 = vst [vmem:[#allocation39_spill] sm:$0xff] %v5690_v12 }
 0x163   : > { %1736 = vrot.lane.b32.xlu1 %v1525_v27, %s4987_s14  ;;  %v1918_v27 = vsel %vm5422_vm15, %v5417_v33, 0.0 }
 0x164   : > { %2007 = vrot.lane.b32.xlu0 %v5682_v52, %s4987_s14 }
 0x167   : > { %1616 = vrot.lane.b32.xlu1 %v5690_v12, %s4986_s13 }
 0x168   : > { %1738 = vrot.lane.b32.xlu0 %v5682_v52, %s4987_s14 }
 0x169   : > { %v1577_v61 = vpop.permute.xlu1 %1576 }
 0x16a   : > { %v5696_v23 = vpop.permute.xlu0 %1574 }
 0x16b   : > { %7289 = vst [vmem:[#allocation40_spill] sm:$0xff] %v5696_v23  ;;  %2009 = vrot.lane.b32.xlu1 %v1918_v27, %s4987_s14  ;;  %v2067_v12 = vsel %vm7290_vm3, %v1867_v11, %v5696_v23  ;;  %v1527_v27 = vsel %vm5477_vm4, %v5417_v33, 0.0 }
 0x16c   : > { %1614 = vrot.lane.b32.xlu0 %v5702_v8, %s4986_s13 }
 0x16d   : > { %v1972_v52 = vpop.permute.xlu1 %1971 }
 0x16e   : > { %v2099_v59 = vsel %vm7150_vm6, %v2067_v12, %v1972_v52  ;;  %v5712_v1 = vpop.permute.xlu0 %1702 }
 0x16f   : > { %7291 = vst [vmem:[#allocation41_spill] sm:$0xff] %v5712_v1  ;;  %1740 = vrot.lane.b32.xlu1 %v1527_v27, %s4987_s14  ;;  %4641 = vmatprep.mubr.msk.f32.mxu0 %vm7138_vm1, %v2099_v59  ;;  %v1920_v59 = vsel %vm5477_vm4, %v5450_v30, 0.0  ;;  %v5739_v1 = vld [vmem:[#allocation2 + $0xd0] sm:$0xff]  ;;  %vm7305_vm1 = vmmov %vm7290_vm3 }
 0x170   : > { %2011 = vrot.lane.b32.xlu0 %v5719_v42, %s4987_s14  ;;  %7297 = vst [vmem:[#allocation47_spill] sm:$0xff] %v5739_v1 }
 0x171   : > { %v5725_v11 = vpop.permute.xlu1 %1700 }
 0x172   : > { %7294 = vst [vmem:[#allocation44_spill] sm:$0xff] %v5725_v11  ;;  %v5727_v52 = vpop.permute.xlu0 %2978  ;;  %v1529_v11 = vsel %vm5511_vm7, %v5450_v30, 0.0 }
 0x173   : > { %7295 = vst [vmem:[#allocation45_spill] sm:$0xff] %v5727_v52  ;;  %1620 = vrot.lane.b32.xlu1 %v5723_v55, %s4986_s13  ;;  %v5751_v55 = vld [vmem:[#allocation2 + $0xd1] sm:$0xff] }
 0x174   : > { %1742 = vrot.lane.b32.xlu0 %v5719_v42, %s4987_s14  ;;  %7300 = vst [vmem:[#allocation50_spill] sm:$0xff] %v5751_v55 }
 0x175   : > { %v1581_v12 = vpop.permute.xlu1 %1580 }
 0x176   : > { %v5733_v27 = vpop.permute.xlu0 %1578 }
 0x177   : > { %7296 = vst [vmem:[#allocation46_spill] sm:$0xff] %v5733_v27  ;;  %2013 = vrot.lane.b32.xlu1 %v1920_v59, %s4987_s14  ;;  %v5755_v59 = vld [vmem:[#allocation2 + $0xe8] sm:$0xff] }
 0x178   : > { %1618 = vrot.lane.b32.xlu0 %v5739_v1, %s4986_s13  ;;  %7301 = vst [vmem:[#allocation51_spill] sm:$0xff] %v5755_v59  ;;  %v1869_v1 = vsel %vm5154_vm2, %v5189_v56, 0.0 }
 0x179   : > { %v5743_v52 = vpop.permute.xlu1 %3104 }
 0x17a   : > { %7298 = vst [vmem:[#allocation48_spill] sm:$0xff] %v5743_v52  ;;  %v5745_v23 = vpop.permute.xlu0 %1706  ;;  %v1253_v52 = vld [vmem:[#allocation2 + $0x27] sm:$0xff] }
 0x17b   : > { %7299 = vst [vmem:[#allocation49_spill] sm:$0xff] %v5745_v23  ;;  %1744 = vrot.lane.b32.xlu1 %v1529_v11, %s4987_s14  ;;  %v5766_v11 = vsel %vm7290_vm3, %v1253_v52, %v1577_v61  ;;  %vm7306_vm3 = vcmask 97280  }
 0x17c   : > { %2015 = vrot.lane.b32.xlu0 %v5751_v55, %s4987_s14  ;;  %7304 = vst [vmem:[#allocation54_spill] sm:$0xff] %v5766_v11  ;;  %vm7308_vm2 = vmmov %vm7306_vm3 }
 0x17d   : > { %v1976_v49 = vpop.permute.xlu1 %1975 }
 0x17e   : > { %v5757_v42 = vpop.permute.xlu0 %2976 }
 0x17f   : > { %7302 = vst [vmem:[#allocation52_spill] sm:$0xff] %v5757_v42  ;;  %1624 = vrot.lane.b32.xlu1 %v5755_v59, %s4986_s13  ;;  %v1922_v42 = vsel %vm5511_vm7, %v5482_v40, 0.0  ;;  %v2069_v59 = vsel %vm7305_vm1, %v1869_v1, %v5733_v27  ;;  %v1531_v1 = vsel %vm5541_vm10, %v5482_v40, 0.0 }
 0x180   : > { %1746 = vrot.lane.b32.xlu0 %v5751_v55, %s4987_s14  ;;  %v2101_v61 = vsel %vm7150_vm6, %v2069_v59, %v1976_v49  ;;  %v5804_v49 = vld [vmem:[#allocation2 + $0xf8] sm:$0xff] }
 0x181   : > { %v5763_v23 = vpop.permute.xlu1 %1704  ;;  %7310 = vst [vmem:[#allocation57_spill] sm:$0xff] %v5804_v49 }
 0x182   : > { %7303 = vst [vmem:[#allocation53_spill] sm:$0xff] %v5763_v23  ;;  %v1974_v30 = vpop.permute.xlu0 %1973  ;;  %v5779_v23 = vld [vmem:[#allocation2 + $0xe0] sm:$0xff] }
 0x183   : > { %v2100_v55 = vsel %vm7150_vm6, %v5766_v11, %v1974_v30  ;;  %2017 = vrot.lane.b32.xlu1 %v1922_v42, %s4987_s14  ;;  %v5794_v42 = vld [vmem:[#allocation2 + $0xe1] sm:$0xff]  ;;  %vm7322_vm6 = vmmov %vm7305_vm1 }
 0x184   : > { %1622 = vrot.lane.b32.xlu0 %v5779_v23, %s4986_s13  ;;  %4642 = vmatmul.mubr.msk.f32.vlgmr.msra.gmra.mrb[32].mxu0 %vm7306_vm3, %v2100_v55  ;;  %v1859_v30 = vld [vmem:[%s7068_s3] sm:$0xff]  ;;  %v1860_v55 = vld [vmem:[%s7068_s3 + $0x8] sm:$0xf]  ;;  %vm7321_vm3 = vnez %v7194_v48 }
 0x185   : > { %v5785_v52 = vpop.permute.xlu1 %1584  ;;  %4644 = vmatprep.mubr.msk.f32.mxu0 %vm7308_vm2, %v2101_v61  ;;  %v5806_v59 = vpack.c.bf16 %v1860_v55, %v1859_v30  ;;  %vm7313_vm2 = vnez %v7202_v7  ;;  %v1924_v30 = vsel %vm5541_vm10, %v5516_v29, 0.0  ;;  %v5825_v55 = vld [vmem:[#allocation2 + $0xf0] sm:$0xff]  ;;  %vm7324_vm10 = vmmov %vm7323_vm5  ;;  %v7497_v7 = vld [vmem:[#allocation54_spill] sm:$0xff] }
 0x186   : > { %7307 = vst [vmem:[#allocation55_spill] sm:$0xff] %v5785_v52  ;;  %v5788_v56 = vpop.permute.xlu0 %2982  ;;  %7315 = vst [vmem:[#allocation61_spill] sm:$0xff] %v5825_v55  ;;  %v5843_v52 = vld [vmem:[#allocation2 + $0x37] sm:$0xff] }
 0x187   : > { %7309 = vst [vmem:[#allocation56_spill] sm:$0xff] %v5788_v56  ;;  %1748 = vrot.lane.b32.xlu1 %v1531_v1, %s4987_s14  ;;  %4855 = vmatprep.subr.msk.bf16.mxu1 %vm7313_vm2, %v5806_v59  ;;  %7318 = vst [vmem:[#allocation64_spill] sm:$0xff] %v5843_v52 }
 0x188   : > { %2019 = vrot.lane.b32.xlu0 %v5794_v42, %s4987_s14 }
 0x189   : > { %v5808_v61 = vpop.permute.xlu1 %3108 }
 0x18a   : > { %7311 = vst [vmem:[#allocation58_spill] sm:$0xff] %v5808_v61  ;;  %v5810_v1 = vpop.permute.xlu0 %1582 }
 0x18b   : > { %7312 = vst [vmem:[#allocation59_spill] sm:$0xff] %v5810_v1  ;;  %1628 = vrot.lane.b32.xlu1 %v5804_v49, %s4986_s13 }
 0x18c   : > { %1750 = vrot.lane.b32.xlu0 %v5794_v42, %s4987_s14 }
 0x18d   : > { %v1980_v56 = vpop.permute.xlu1 %1979 }
 0x18e   : > { %v5819_v11 = vpop.permute.xlu0 %1710 }
 0x18f   : > { %7314 = vst [vmem:[#allocation60_spill] sm:$0xff] %v5819_v11  ;;  %2021 = vrot.lane.b32.xlu1 %v1924_v30, %s4987_s14  ;;  %v5837_v11 = vld [vmem:[#allocation2 + $0xf1] sm:$0xff]  ;;  %v5841_v30 = vld [vmem:[#allocation2 + $0x108] sm:$0xff] }
 0x190   : > { %1626 = vrot.lane.b32.xlu0 %v5825_v55, %s4986_s13 }
 0x191   : > { %v5829_v61 = vpop.permute.xlu1 %1708 }
 0x192   : > { %7316 = vst [vmem:[#allocation62_spill] sm:$0xff] %v5829_v61  ;;  %v5831_v27 = vpop.permute.xlu0 %2980  ;;  %v1871_v61 = vsel %vm7321_vm3, %v5217_v9, 0.0  ;;  %v5886_v9 = vld [vmem:[#allocation2 + $0x101] sm:$0xff] }
 0x193   : > { %7317 = vst [vmem:[#allocation63_spill] sm:$0xff] %v5831_v27  ;;  %1752 = vrot.lane.b32.xlu1 %v1533_v34, %s4987_s14  ;;  %v5849_v27 = vsel %vm7305_vm1, %v5843_v52, %v1581_v12  ;;  %v2071_v49 = vsel %vm7322_vm6, %v1871_v61, %v5810_v1  ;;  %vm7325_vm1 = vcmask 97280   ;;  %v1926_v61 = vsel %vm5571_vm8, %v5545_v0, 0.0 }
 0x194   : > { %2023 = vrot.lane.b32.xlu0 %v5837_v11, %s4987_s14  ;;  %7320 = vst [vmem:[#allocation66_spill] sm:$0xff] %v5849_v27  ;;  %vm7327_vm3 = vmmov %vm7325_vm1  ;;  %vm7341_vm6 = vnez %v7206_v25 }
 0x195   : > { %v5845_v16 = vpop.permute.xlu1 %3106 }
 0x196   : > { %7319 = vst [vmem:[#allocation65_spill] sm:$0xff] %v5845_v16  ;;  %v1978_v34 = vpop.permute.xlu0 %1977  ;;  %v2103_v16 = vsel %vm7324_vm10, %v2071_v49, %v1980_v56  ;;  %v801_v49 = vadd.s32 248, %v5139_v10  ;;  %vm7345_vm10 = vnez %v7208_v35 }
 0x197   : > { %v2102_v55 = vsel %vm7323_vm5, %v5849_v27, %v1978_v34  ;;  %1632 = vrot.lane.b32.xlu1 %v5841_v30, %s4986_s13  ;;  %v5873_v34 = vld [vmem:[#allocation2 + $0x100] sm:$0xff] }
 0x198   : > { %1754 = vrot.lane.b32.xlu0 %v5837_v11, %s4987_s14  ;;  %4645 = vmatmul.mubr.msk.f32.gmra.mrb[34].mxu0 %vm7325_vm1, %v2102_v55  ;;  %vm7351_vm1 = vcmask 31744  }
 0x199   : > { %v5864_v12 = vpop.permute.xlu1 %1588  ;;  %4647 = vmatprep.mubr.msk.f32.mxu0 %vm7327_vm3, %v2103_v16  ;;  %v1535_v16 = vsel %vm5563_vm11, %v5545_v0, 0.0  ;;  %vm7349_vm3 = vnez %v7230_v4  ;;  %v7657_v4 = vld [vmem:[#allocation16_spill] sm:$0xff] }
 0x19a   : > { %7326 = vst [vmem:[#allocation67_spill] sm:$0xff] %v5864_v12  ;;  %v5867_v52 = vpop.permute.xlu0 %1586 }
 0x19b   : > { %7328 = vst [vmem:[#allocation68_spill] sm:$0xff] %v5867_v52  ;;  %2025 = vrot.lane.b32.xlu1 %v1926_v61, %s4987_s14  ;;  %v5890_v61 = vld [vmem:[#allocation2 + $0x118] sm:$0xff] }
 0x19c   : > { %1630 = vrot.lane.b32.xlu0 %v5873_v34, %s4986_s13 }
 0x19d   : > { %v5877_v56 = vpop.permute.xlu1 %1712 }
 0x19e   : > { %7329 = vst [vmem:[#allocation69_spill] sm:$0xff] %v5877_v56  ;;  %v5880_v55 = vpop.permute.xlu0 %1714  ;;  %v1023_v56 = vand.u32 15, %v801_v49 }
 0x19f   : > { %7330 = vst [vmem:[#allocation70_spill] sm:$0xff] %v5880_v55  ;;  %1756 = vrot.lane.b32.xlu1 %v1535_v16, %s4987_s14 }
 0x1a0   : > { %2027 = vrot.lane.b32.xlu0 %v5886_v9, %s4987_s14  ;;  %vm5902_vm5 = vcmp.lt.s32.totalorder %v1023_v56, 15  ;;  %v1928_v56 = vsel %vm5563_vm11, %v5575_v22, 0.0 }
 0x1a1   : > { %v5892_v12 = vpop.permute.xlu1 %3110  ;;  %v1930_v49 = vsel %vm5902_vm5, %v5567_v44, 0.0 }
 0x1a2   : > { %7331 = vst [vmem:[#allocation71_spill] sm:$0xff] %v5892_v12  ;;  %v5894_v27 = vpop.permute.xlu0 %2984  ;;  %v5912_v12 = vld [vmem:[#allocation2 + $0x110] sm:$0xff] }
 0x1a3   : > { %1935 = vrot.lane.b32.xlu1 %v5890_v61, %s4986_s13 }
 0x1a4   : > { %1758 = vrot.lane.b32.xlu0 %v5886_v9, %s4987_s14 }
 0x1a5   : > { %v5900_v55 = vpop.permute.xlu1 %1592 }
 0x1a6   : > { %7332 = vst [vmem:[#allocation72_spill] sm:$0xff] %v5900_v55  ;;  %v5906_v1 = vpop.permute.xlu0 %1590 }
 0x1a7   : > { %7335 = vst [vmem:[#allocation73_spill] sm:$0xff] %v5906_v1  ;;  %2033 = vrot.lane.b32.xlu1 %v1930_v49, %s4987_s14  ;;  %v5924_v1 = vld [vmem:[#allocation2 + $0x111] sm:$0xff] }
 0x1a8   : > { %1933 = vrot.lane.b32.xlu0 %v5912_v12, %s4986_s13 }
 0x1a9   : > { %v5916_v52 = vpop.permute.xlu1 %1716 }
 0x1aa   : > { %7336 = vst [vmem:[#allocation74_spill] sm:$0xff] %v5916_v52  ;;  %v5918_v55 = vpop.permute.xlu0 %1718 }
 0x1ab   : > { %7337 = vst [vmem:[#allocation75_spill] sm:$0xff] %v5918_v55  ;;  %2029 = vrot.lane.b32.xlu1 %v1928_v56, %s4987_s14  ;;  %v7342_v56 = vsel %vm7341_vm6, %v5260_v39, 0.0 }
 0x1ac   : > { %2031 = vrot.lane.b32.xlu0 %v5924_v1, %s4987_s14 }
 0x1ad   : > { %v5928_v49 = vpop.permute.xlu1 %1596 }
 0x1ae   : > { %7338 = vst [vmem:[#allocation76_spill] sm:$0xff] %v5928_v49  ;;  %v5930_v44 = vpop.permute.xlu0 %1594  ;;  %v7343_v49 = vsel %vm7341_vm6, %v5233_v19, 0.0  ;;  %vm7353_vm6 = vcmask 64512  }
 0x1af   : > { %7339 = vst [vmem:[#allocation77_spill] sm:$0xff] %v5930_v44  ;;  %3112 = vrot.lane.b32.xlu1 %v5509_v50, %s4987_s14 }
 0x1b0   : > { %2986 = vrot.lane.b32.xlu0 %v5455_v15, %s4986_s13 }
 0x1b1   : > { %v5936_v55 = vpop.permute.xlu1 %1720 }
 0x1b2   : > { %v5938_v52 = vpop.permute.xlu0 %1722 }
 0x1b3   : > { %7340 = vst [vmem:[#allocation78_spill] sm:$0xff] %v5938_v52  ;;  %3114 = vrot.lane.b32.xlu1 %v7342_v56, %s4987_s14 }
 0x1b4   : > { %1981 = vrot.lane.b32.xlu0 %v7343_v49, %s4987_s14 }
 0x1b5   : > { %v5950_v44 = vpop.permute.xlu1 %1600 }
 0x1b6   : > { %v5952_v54 = vpop.permute.xlu0 %1598 }
 0x1b7   : > { %1983 = vrot.lane.b32.xlu1 %v5509_v50, %s4987_s14  ;;  %v7346_v50 = vsel %vm7345_vm10, %v5282_v58, 0.0 }
 0x1b8   : > { %2988 = vrot.lane.b32.xlu0 %v5555_v60, %s4986_s13  ;;  %v7347_v60 = vsel %vm7345_vm10, %v5260_v39, 0.0  ;;  %vm7354_vm10 = vcmask 97280  }
 0x1b9   : > { %v5958_v15 = vpop.permute.xlu1 %1724 }
 0x1ba   : > { %v5960_v52 = vpop.permute.xlu0 %1726 }
 0x1bb   : > { %3116 = vrot.lane.b32.xlu1 %v5594_v47, %s4987_s14 }
 0x1bc   : > { %2990 = vrot.lane.b32.xlu0 %v5548_v28, %s4986_s13 }
 0x1bd   : > { %v5966_v19 = vpop.permute.xlu1 %1604 }
 0x1be   : > { %7344 = vst [vmem:[#allocation79_spill] sm:$0xff] %v5966_v19  ;;  %v5968_v25 = vpop.permute.xlu0 %1602 }
 0x1bf   : > { %3118 = vrot.lane.b32.xlu1 %v7346_v50, %s4987_s14  ;;  %v1883_v50 = vsel %vm7349_vm3, %v5362_v26, 0.0 }
 0x1c0   : > { %1985 = vrot.lane.b32.xlu0 %v7347_v60, %s4987_s14 }
 0x1c1   : > { %v5980_v49 = vpop.permute.xlu1 %1728 }
 0x1c2   : > { %v5982_v56 = vpop.permute.xlu0 %1730 }
 0x1c3   : > { %1987 = vrot.lane.b32.xlu1 %v5594_v47, %s4987_s14 }
 0x1c4   : > { %2992 = vrot.lane.b32.xlu0 %v5600_v32, %s4986_s13  ;;  %v7350_v32 = vsel %vm5277_vm12, %v5307_v17, 0.0 }
 0x1c5   : > { %v2004_v28 = vpop.permute.xlu1 %2003 }
 0x1c6   : > { %v1609_v19 = vpop.permute.xlu0 %1608 }
 0x1c7   : > { %3120 = vrot.lane.b32.xlu1 %v5610_v43, %s4987_s14 }
 0x1c8   : > { %2994 = vrot.lane.b32.xlu0 %v5598_v63, %s4986_s13  ;;  %v7352_v63 = vsel %vm5277_vm12, %v5282_v58, 0.0  ;;  %vm7355_vm12 = vmmov %vm7351_vm1 }
 0x1c9   : > { %v5992_v35 = vpop.permute.xlu1 %1732  ;;  %v6029_v58 = vsel %vm7355_vm12, %v6023_v53, %v1609_v19 }
 0x1ca   : > { %7348 = vst [vmem:[#allocation80_spill] sm:$0xff] %v5992_v35  ;;  %v5994_v39 = vpop.permute.xlu0 %1606 }
 0x1cb   : > { %3122 = vrot.lane.b32.xlu1 %v7350_v32, %s4987_s14  ;;  %v2083_v47 = vsel %vm7351_vm1, %v1883_v50, %v5994_v39  ;;  %v4342_v32 = vld [vmem:[%s7068_s3 + $0x20] sm:$0xff]  ;;  %v4343_v50 = vld [vmem:[%s7068_s3 + $0x28] sm:$0xf]  ;;  %vm7356_vm1 = vmmov %vm7353_vm6 }
 0x1cc   : > { %1989 = vrot.lane.b32.xlu0 %v7352_v63, %s4987_s14  ;;  %v2115_v60 = vsel %vm7353_vm6, %v2083_v47, %v2004_v28  ;;  %v6031_v47 = vpack.c.bf16 %v4343_v50, %v4342_v32  ;;  %vm7357_vm6 = vmmov %vm7354_vm10  ;;  %v7360_v50 = vsel %vm5297_vm13, %v5307_v17, 0.0 }
 0x1cd   : > { %v1613_v35 = vpop.permute.xlu1 %1612  ;;  %4665 = vmatprep.mubr.msk.f32.mxu1 %vm7354_vm10, %v2115_v60  ;;  %vm7358_vm10 = vnez %v7221_v2 }
 0x1ce   : > { %v6013_v26 = vpop.permute.xlu0 %1734 }
 0x1cf   : > { %1991 = vrot.lane.b32.xlu1 %v5610_v43, %s4987_s14 }
 0x1d0   : > { %2996 = vrot.lane.b32.xlu0 %v5616_v41, %s4986_s13  ;;  %v1885_v41 = vsel %vm7358_vm10, %v5393_v37, 0.0 }
 0x1d1   : > { %v2006_v28 = vpop.permute.xlu1 %2005 }
 0x1d2   : > { %v2116_v63 = vsel %vm7356_vm1, %v6029_v58, %v2006_v28  ;;  %v6035_v60 = vpop.permute.xlu0 %1610 }
 0x1d3   : > { %3124 = vrot.lane.b32.xlu1 %v5626_v31, %s4987_s14  ;;  %4666 = vmatmul.mubr.msk.f32.vlgmr.msra.gmra.mrb[0].mxu1 %vm7357_vm6, %v2116_v63  ;;  %v2085_v19 = vsel %vm7355_vm12, %v1885_v41, %v6035_v60  ;;  %v6071_v41 = vld [vmem:[#allocation2 + $0xb7] sm:$0xff] }
 0x1d4   : > { %2998 = vrot.lane.b32.xlu0 %v5614_v20, %s4986_s13  ;;  %4858 = vmatpush3.bf16.msk.msra.mxu1 %vm7313_vm2, %v5806_v59  ;;  %v7359_v59 = vsel %vm5297_vm13, %v5327_v45, 0.0  ;;  %7361 = vst [vmem:[#allocation81_spill] sm:$0xff] %v6071_v41  ;;  %vm7362_vm13 = vmmov %vm7356_vm1 }
 0x1d5   : > { %v6048_v43 = vpop.permute.xlu1 %1736  ;;  %4861 = vmatprep.subr.msk.bf16.mxu1 %vm7313_vm2, %v6031_v47  ;;  %vm7365_vm10 = vmmov %vm7362_vm13 }
 0x1d6   : > { %v2008_v32 = vpop.permute.xlu0 %2007 }
 0x1d7   : > { %v2117_v20 = vsel %vm7356_vm1, %v2085_v19, %v2008_v32  ;;  %3126 = vrot.lane.b32.xlu1 %v7359_v59, %s4987_s14  ;;  %v6077_v19 = vsel %vm7355_vm12, %v6071_v41, %v1613_v35  ;;  %vm7363_vm1 = vmmov %vm7357_vm6 }
 0x1d8   : > { %1993 = vrot.lane.b32.xlu0 %v7360_v50, %s4987_s14  ;;  %4668 = vmatprep.mubr.msk.f32.mxu1 %vm7357_vm6, %v2117_v20  ;;  %vm7364_vm6 = vnez %v7227_v46  ;;  %v7366_v50 = vsel %vm5322_vm14, %v5355_v14, 0.0 }
 0x1d9   : > { %v1617_v28 = vpop.permute.xlu1 %1616 }
 0x1da   : > { %v6067_v63 = vpop.permute.xlu0 %1738 }
 0x1db   : > { %1995 = vrot.lane.b32.xlu1 %v5626_v31, %s4987_s14 }
 0x1dc   : > { %3000 = vrot.lane.b32.xlu0 %v5632_v21, %s4986_s13  ;;  %v1887_v21 = vsel %vm7364_vm6, %v5428_v18, 0.0  ;;  %vm7380_vm6 = vcmask 97280  }
 0x1dd   : > { %v2010_v5 = vpop.permute.xlu1 %2009 }
 0x1de   : > { %v2118_v17 = vsel %vm7362_vm13, %v6077_v19, %v2010_v5  ;;  %v1615_v32 = vpop.permute.xlu0 %1614  ;;  %vm7368_vm13 = vmmov %vm7363_vm1 }
 0x1df   : > { %3128 = vrot.lane.b32.xlu1 %v5642_v57, %s4987_s14  ;;  %4669 = vmatmul.mubr.msk.f32.gmra.mrb[2].mxu1 %vm7363_vm1, %v2118_v17  ;;  %v2087_v35 = vsel %vm7355_vm12, %v1887_v21, %v1615_v32  ;;  %vm7369_vm1 = vnez %v7232_v13 }
 0x1e0   : > { %3002 = vrot.lane.b32.xlu0 %v5630_v24, %s4986_s13  ;;  %v7367_v24 = vsel %vm5322_vm14, %v5327_v45, 0.0  ;;  %v7370_v17 = vsel %vm7369_vm1, %v5428_v18, 0.0 }
 0x1e1   : > { %v6089_v31 = vpop.permute.xlu1 %1740 }
 0x1e2   : > { %v2012_v20 = vpop.permute.xlu0 %2011 }
 0x1e3   : > { %v2119_v59 = vsel %vm7365_vm10, %v2087_v35, %v2012_v20  ;;  %3130 = vrot.lane.b32.xlu1 %v7366_v50, %s4987_s14  ;;  %vm7371_vm10 = vmmov %vm7355_vm12  ;;  %vm7372_vm12 = vcmask 64512  }
 0x1e4   : > { %1997 = vrot.lane.b32.xlu0 %v7367_v24, %s4987_s14  ;;  %4671 = vmatprep.mubr.msk.f32.mxu1 %vm7368_vm13, %v2119_v59  ;;  %v1816_v21 = vsel %vm7371_vm10, %v7370_v17, %v1615_v32  ;;  %vm7374_vm14 = vmmov %vm7371_vm10  ;;  %vm7376_vm10 = vnez %v7244_v6 }
 0x1e5   : > { %v1621_v5 = vpop.permute.xlu1 %1620  ;;  %v1817_v45 = vsel %vm7374_vm14, %v6114_v36, %v1617_v28  ;;  %vm7375_vm13 = vmmov %vm7372_vm12  ;;  %v7377_v32 = vsel %vm7376_vm10, %v5459_v38, 0.0  ;;  %v1889_v28 = vsel %vm7369_vm1, %v5459_v38, 0.0 }
 0x1e6   : > { %v1743_v35 = vpop.permute.xlu0 %1742 }
 0x1e7   : > { %v6110_v20 = vsel %vm7372_vm12, %v1816_v21, %v1743_v35  ;;  %1999 = vrot.lane.b32.xlu1 %v5642_v57, %s4987_s14  ;;  %vm7378_vm12 = vmmov %vm7374_vm14  ;;  %v7379_v57 = vld [vmem:[#allocation31_spill] sm:$0xff] }
 0x1e8   : > { %3004 = vrot.lane.b32.xlu0 %v5658_v51, %s4986_s13  ;;  %v7381_v51 = vld [vmem:[#allocation32_spill] sm:$0xff]  ;;  %vm7382_vm14 = vmmov %vm7378_vm12 }
 0x1e9   : > { %v2014_v59 = vpop.permute.xlu1 %2013 }
 0x1ea   : > { %v2120_v50 = vsel %vm7375_vm13, %v1817_v45, %v2014_v59  ;;  %v1619_v24 = vpop.permute.xlu0 %1618 }
 0x1eb   : > { %v1818_v17 = vsel %vm7378_vm12, %v7377_v32, %v1619_v24  ;;  %3132 = vrot.lane.b32.xlu1 %v7379_v57, %s4987_s14  ;;  %4672 = vmatmul.mubr.msk.f32.gmra.mrb[4].mxu1 %vm7380_vm6, %v2120_v50  ;;  %v2089_v35 = vsel %vm7382_vm14, %v1889_v28, %v1619_v24  ;;  %v1537_v32 = vsel %vm5902_vm5, %v5575_v22, 0.0  ;;  %vm7383_vm12 = vmmov %vm7375_vm13 }
 0x1ec   : > { %3006 = vrot.lane.b32.xlu0 %v7381_v51, %s4986_s13  ;;  %v7385_v51 = vsel %vm5350_vm0, %v5355_v14, 0.0  ;;  %vm7386_vm14 = vmmov %vm7383_vm12 }
 0x1ed   : > { %v1745_v21 = vpop.permute.xlu1 %1744 }
 0x1ee   : > { %v6136_v59 = vsel %vm7375_vm13, %v1817_v45, %v1745_v21  ;;  %v2016_v36 = vpop.permute.xlu0 %2015  ;;  %v7387_v21 = vld [vmem:[#allocation12_spill] sm:$0xff]  ;;  %vm7391_vm13 = vcmask 31744  }
 0x1ef   : > { %v2121_v50 = vsel %vm7383_vm12, %v2089_v35, %v2016_v36  ;;  %1760 = vrot.lane.b32.xlu1 %v1537_v32, %s4987_s14  ;;  %v7388_v36 = vsel %vm5350_vm0, %v7387_v21, 0.0  ;;  %v6157_v35 = vld [vmem:[#allocation2 + $0xd7] sm:$0xff]  ;;  %v7390_v32 = vld [vmem:[#allocation35_spill] sm:$0xff]  ;;  %vm7397_vm0 = vcmask 97280  }
 0x1f0   : > { %2001 = vrot.lane.b32.xlu0 %v7385_v51, %s4987_s14  ;;  %4674 = vmatprep.mubr.msk.f32.mxu1 %vm7380_vm6, %v2121_v50  ;;  %7389 = vst [vmem:[#allocation31_spill] sm:$0xff] %v6157_v35  ;;  %v1819_v14 = vsel %vm7391_vm13, %v6157_v35, %v1621_v5  ;;  %vm7395_vm6 = vmmov %vm7391_vm13  ;;  %v7396_v21 = vld [vmem:[#allocation33_spill] sm:$0xff] }
 0x1f1   : > { %v1625_v24 = vpop.permute.xlu1 %1624  ;;  %vm7400_vm13 = vmmov %vm7383_vm12 }
 0x1f2   : > { %v1747_v45 = vpop.permute.xlu0 %1746 }
 0x1f3   : > { %v6150_v28 = vsel %vm7386_vm14, %v1818_v17, %v1747_v45  ;;  %3134 = vrot.lane.b32.xlu1 %v7388_v36, %s4987_s14  ;;  %v7393_v45 = vld [vmem:[#allocation22_spill] sm:$0xff]  ;;  %v7398_v36 = vld [vmem:[#allocation36_spill] sm:$0xff]  ;;  %vm7399_vm14 = vmmov %vm7395_vm6 }
 0x1f4   : > { %3008 = vrot.lane.b32.xlu0 %v7390_v32, %s4986_s13  ;;  %v7394_v38 = vsel %vm5470_vm9, %v7393_v45, 0.0  ;;  %v1891_v5 = vsel %vm7376_vm10, %v7393_v45, 0.0 }
 0x1f5   : > { %v2018_v50 = vpop.permute.xlu1 %2017 }
 0x1f6   : > { %v2122_v51 = vsel %vm7383_vm12, %v1819_v14, %v2018_v50  ;;  %v1623_v13 = vpop.permute.xlu0 %1622 }
 0x1f7   : > { %v1820_v57 = vsel %vm7395_vm6, %v7394_v38, %v1623_v13  ;;  %3010 = vrot.lane.b32.xlu1 %v7396_v21, %s4986_s13  ;;  %4675 = vmatmul.mubr.msk.f32.gmra.mrb[6].mxu1 %vm7397_vm0, %v2122_v51  ;;  %v2091_v50 = vsel %vm7399_vm14, %v1891_v5, %v1623_v13  ;;  %v7401_v21 = vld [vmem:[#allocation14_spill] sm:$0xff]  ;;  %vm7404_vm14 = vmmov %vm7383_vm12 }
 0x1f8   : > { %3136 = vrot.lane.b32.xlu0 %v7398_v36, %s4987_s14  ;;  %vm7402_vm6 = vnez %v7401_v21  ;;  %v7407_v5 = vld [vmem:[#allocation42_spill] sm:$0xff]  ;;  %v7411_v21 = vld [vmem:[#allocation24_spill] sm:$0xff] }
 0x1f9   : > { %v1749_v32 = vpop.permute.xlu1 %1748  ;;  %v7403_v51 = vsel %vm7402_vm6, %v5417_v33, 0.0 }
 0x1fa   : > { %v6179_v35 = vsel %vm7400_vm13, %v1819_v14, %v1749_v32  ;;  %v2020_v18 = vpop.permute.xlu0 %2019  ;;  %v7405_v14 = vld [vmem:[#allocation39_spill] sm:$0xff]  ;;  %vm7408_vm13 = vcmask 31744  }
 0x1fb   : > { %v2123_v38 = vsel %vm7383_vm12, %v2091_v50, %v2020_v18  ;;  %3138 = vrot.lane.b32.xlu1 %v7403_v51, %s4987_s14  ;;  %v6195_v18 = vld [vmem:[#allocation2 + $0xe7] sm:$0xff] }
 0x1fc   : > { %3012 = vrot.lane.b32.xlu0 %v5702_v8, %s4986_s13  ;;  %4677 = vmatprep.mubr.msk.f32.mxu1 %vm7397_vm0, %v2123_v38  ;;  %7406 = vst [vmem:[#allocation32_spill] sm:$0xff] %v6195_v18  ;;  %v1821_v33 = vsel %vm7408_vm13, %v6195_v18, %v1625_v24  ;;  %v7409_v38 = vld [vmem:[#allocation23_spill] sm:$0xff]  ;;  %vm7413_vm0 = vmmov %vm7408_vm13 }
 0x1fd   : > { %v1629_v36 = vpop.permute.xlu1 %1628  ;;  %vm7410_vm6 = vnez %v7409_v38  ;;  %v7418_v24 = vld [vmem:[#allocation47_spill] sm:$0xff]  ;;  %vm7419_vm13 = vmmov %vm7413_vm0 }
 0x1fe   : > { %v1751_v6 = vpop.permute.xlu0 %1750 }
 0x1ff   : > { %v6191_v13 = vsel %vm7404_vm14, %v1820_v57, %v1751_v6  ;;  %3014 = vrot.lane.b32.xlu1 %v7405_v14, %s4986_s13  ;;  %v7412_v6 = vsel %vm7410_vm6, %v7411_v21, 0.0  ;;  %v7415_v14 = vld [vmem:[#allocation18_spill] sm:$0xff]  ;;  %vm7417_vm14 = vcmask 97280  }
 0x200   : > { %3140 = vrot.lane.b32.xlu0 %v7407_v5, %s4987_s14  ;;  %v7416_v45 = vsel %vm5422_vm15, %v7415_v14, 0.0  ;;  %v1893_v5 = vsel %vm5470_vm9, %v7411_v21, 0.0  ;;  %vm7423_vm15 = vmmov %vm7417_vm14 }
 0x201   : > { %v2022_v32 = vpop.permute.xlu1 %2021 }
 0x202   : > { %v2124_v8 = vsel %vm7383_vm12, %v1821_v33, %v2022_v32  ;;  %v1627_v50 = vpop.permute.xlu0 %1626 }
 0x203   : > { %v1822_v57 = vsel %vm7413_vm0, %v7412_v6, %v1627_v50  ;;  %3142 = vrot.lane.b32.xlu1 %v7416_v45, %s4987_s14  ;;  %4678 = vmatmul.mubr.msk.f32.gmra.mrb[8].mxu1 %vm7417_vm14, %v2124_v8  ;;  %v2093_v18 = vsel %vm7419_vm13, %v1893_v5, %v1627_v50  ;;  %vm7420_vm0 = vmmov %vm7383_vm12  ;;  %v7421_v45 = vld [vmem:[#allocation43_spill] sm:$0xff]  ;;  %v7422_v8 = vld [vmem:[#allocation50_spill] sm:$0xff] }
 0x204   : > { %3016 = vrot.lane.b32.xlu0 %v7418_v24, %s4986_s13  ;;  %vm7424_vm14 = vmmov %vm7420_vm0 }
 0x205   : > { %v1753_v32 = vpop.permute.xlu1 %1752 }
 0x206   : > { %v6220_v6 = vsel %vm7383_vm12, %v1821_v33, %v1753_v32  ;;  %v2024_v41 = vpop.permute.xlu0 %2023  ;;  %v7426_v33 = vsel %vm5477_vm4, %v5482_v40, 0.0  ;;  %vm7428_vm12 = vmmov %vm7420_vm0  ;;  %v7434_v40 = vld [vmem:[#allocation51_spill] sm:$0xff]  ;;  %vm7435_vm4 = vcmask 97280  }
 0x207   : > { %v2125_v51 = vsel %vm7420_vm0, %v2093_v18, %v2024_v41  ;;  %3018 = vrot.lane.b32.xlu1 %v7421_v45, %s4986_s13  ;;  %v6236_v41 = vld [vmem:[#allocation2 + $0xf7] sm:$0xff]  ;;  %v7431_v45 = vld [vmem:[#allocation27_spill] sm:$0xff] }
 0x208   : > { %3144 = vrot.lane.b32.xlu0 %v7422_v8, %s4987_s14  ;;  %4680 = vmatprep.mubr.msk.f32.mxu1 %vm7423_vm15, %v2125_v51  ;;  %7427 = vst [vmem:[#allocation10_spill] sm:$0xff] %v6236_v41  ;;  %v1823_v18 = vsel %vm7419_vm13, %v6236_v41, %v1629_v36  ;;  %vm7433_vm15 = vmmov %vm7419_vm13 }
 0x209   : > { %v1633_v14 = vpop.permute.xlu1 %1632 }
 0x20a   : > { %v1755_v24 = vpop.permute.xlu0 %1754 }
 0x20b   : > { %v6229_v17 = vsel %vm7424_vm14, %v1822_v57, %v1755_v24  ;;  %3146 = vrot.lane.b32.xlu1 %v7426_v33, %s4987_s14  ;;  %v7429_v57 = vld [vmem:[#allocation25_spill] sm:$0xff]  ;;  %vm7436_vm14 = vmmov %vm7419_vm13 }
 0x20c   : > { %3020 = vrot.lane.b32.xlu0 %v5779_v23, %s4986_s13  ;;  %vm7430_vm0 = vnez %v7429_v57  ;;  %v1895_v23 = vsel %vm7410_vm6, %v7431_v45, 0.0  ;;  %vm7437_vm13 = vmmov %vm7428_vm12  ;;  %v6304_v57 = vld [vmem:[#allocation2 + $0x117] sm:$0xff]  ;;  %vm7490_vm6 = vcmask 31744  }
 0x20d   : > { %v2026_v5 = vpop.permute.xlu1 %2025  ;;  %v7432_v8 = vsel %vm7430_vm0, %v7431_v45, 0.0  ;;  %7456 = vst [vmem:[#allocation35_spill] sm:$0xff] %v6304_v57 }
 0x20e   : > { %v2126_v32 = vsel %vm7428_vm12, %v1823_v18, %v2026_v5  ;;  %v1631_v51 = vpop.permute.xlu0 %1630 }
 0x20f   : > { %v1824_v24 = vsel %vm7433_vm15, %v7432_v8, %v1631_v51  ;;  %3022 = vrot.lane.b32.xlu1 %v7434_v40, %s4986_s13  ;;  %4681 = vmatmul.mubr.msk.f32.gmra.mrb[10].mxu1 %vm7435_vm4, %v2126_v32  ;;  %v2095_v50 = vsel %vm7436_vm14, %v1895_v23, %v1631_v51  ;;  %v7438_v32 = vsel %vm5511_vm7, %v5516_v29, 0.0  ;;  %vm7440_vm15 = vmmov %vm7435_vm4  ;;  %v1250_v23 = vld [vmem:[#allocation2 + $0xf] sm:$0xff] }
 0x210   : > { %3148 = vrot.lane.b32.xlu0 %v5794_v42, %s4987_s14  ;;  %v7439_v42 = vld [vmem:[#allocation61_spill] sm:$0xff]  ;;  %vm7441_vm4 = vmmov %vm7428_vm12 }
 0x211   : > { %v1757_v36 = vpop.permute.xlu1 %1756 }
 0x212   : > { %v6258_v33 = vsel %vm7437_vm13, %v1823_v18, %v1757_v36  ;;  %v2028_v5 = vpop.permute.xlu0 %2027  ;;  %v7442_v18 = vld [vmem:[#allocation57_spill] sm:$0xff]  ;;  %v7443_v36 = vld [vmem:[#allocation26_spill] sm:$0xff]  ;;  %vm7449_vm13 = vcmask 31744  }
 0x213   : > { %v2127_v8 = vsel %vm7428_vm12, %v2095_v50, %v2028_v5  ;;  %3150 = vrot.lane.b32.xlu1 %v7438_v32, %s4987_s14  ;;  %vm7444_vm7 = vnez %v7443_v36  ;;  %v6281_v5 = vld [vmem:[#allocation2 + $0x107] sm:$0xff]  ;;  %vm7451_vm12 = vmmov %vm7449_vm13 }
 0x214   : > { %3024 = vrot.lane.b32.xlu0 %v7439_v42, %s4986_s13  ;;  %4683 = vmatprep.mubr.msk.f32.mxu1 %vm7440_vm15, %v2127_v8  ;;  %v7445_v50 = vsel %vm7444_vm7, %v5545_v0, 0.0  ;;  %7446 = vst [vmem:[#allocation12_spill] sm:$0xff] %v6281_v5  ;;  %v7450_v8 = vld [vmem:[#allocation30_spill] sm:$0xff]  ;;  %vm7452_vm15 = vmmov %vm7441_vm4  ;;  %vm7453_vm7 = vcmask 97280  }
 0x215   : > { %v1936_v40 = vpop.permute.xlu1 %1935  ;;  %v1897_v32 = vsel %vm7430_vm0, %v7450_v8, 0.0 }
 0x216   : > { %v1759_v38 = vpop.permute.xlu0 %1758 }
 0x217   : > { %v6270_v51 = vsel %vm7441_vm4, %v1824_v24, %v1759_v38  ;;  %3026 = vrot.lane.b32.xlu1 %v7442_v18, %s4986_s13  ;;  %v7447_v38 = vld [vmem:[#allocation5_spill] sm:$0xff] }
 0x218   : > { %3152 = vrot.lane.b32.xlu0 %v5837_v11, %s4987_s14  ;;  %vm7448_vm14 = vnez %v7447_v38  ;;  %v6289_v11 = vsel %vm7449_vm13, %v6281_v5, %v1633_v14  ;;  %v7454_v14 = vld [vmem:[#allocation34_spill] sm:$0xff]  ;;  %vm7455_vm13 = vmmov %vm7451_vm12 }
 0x219   : > { %v2034_v62 = vpop.permute.xlu1 %2033  ;;  %v1410_v24 = vsel %vm7448_vm14, %v1250_v23, 0.0 }
 0x21a   : > { %v1934_v29 = vpop.permute.xlu0 %1933  ;;  %v1794_v23 = vsel %vm7455_vm13, %v1410_v24, %v7454_v14  ;;  %v7465_v14 = vld [vmem:[#allocation38_spill] sm:$0xff] }
 0x21b   : > { %3154 = vrot.lane.b32.xlu1 %v7445_v50, %s4987_s14  ;;  %v2097_v0 = vsel %vm7451_vm12, %v1897_v32, %v1934_v29  ;;  %vm7457_vm12 = vmmov %vm7453_vm7  ;;  %v7459_v29 = vld [vmem:[#allocation8_spill] sm:$0xff] }
 0x21c   : > { %3028 = vrot.lane.b32.xlu0 %v5873_v34, %s4986_s13  ;;  %v776_v34 = vadd.s32 48, %v5139_v10 }
 0x21d   : > { %v2030_v42 = vpop.permute.xlu1 %2029 }
 0x21e   : > { %v2128_v18 = vsel %vm7452_vm15, %v6289_v11, %v2030_v42  ;;  %v2032_v36 = vpop.permute.xlu0 %2031  ;;  %vm7458_vm15 = vnez %v7194_v48  ;;  %v848_v8 = vand.u32 15, %v776_v34  ;;  %v7503_v48 = vld [vmem:[#allocation49_spill] sm:$0xff] }
 0x21f   : > { %v2129_v50 = vsel %vm7441_vm4, %v2097_v0, %v2032_v36  ;;  %3030 = vrot.lane.b32.xlu1 %v5841_v30, %s4986_s13  ;;  %4684 = vmatmul.mubr.msk.f32.gmra.mrb[12].mxu1 %vm7453_vm7, %v2128_v18  ;;  %v7460_v32 = vsel %vm7458_vm15, %v7459_v29, 0.0  ;;  %vm7461_vm4 = vmmov %vm7455_vm13  ;;  %v1251_v18 = vld [vmem:[#allocation2 + $0x17] sm:$0xff]  ;;  %vm7463_vm7 = vcmask 64512  }
 0x220   : > { %3156 = vrot.lane.b32.xlu0 %v5886_v9, %s4987_s14  ;;  %4686 = vmatprep.mubr.msk.f32.mxu1 %vm7457_vm12, %v2129_v50  ;;  %v3204_v42 = vsel %vm7461_vm4, %v7460_v32, %v5894_v27  ;;  %vm7462_vm0 = vmmov %vm7461_vm4  ;;  %v7467_v27 = vsel %vm5571_vm8, %v5575_v22, 0.0  ;;  %vm7468_vm4 = vcmask 97280   ;;  %v7473_v22 = vld [vmem:[#allocation44_spill] sm:$0xff] }
 0x221   : > { %v2098_v30 = vsel %vm7462_vm0, %v6304_v57, %v1936_v40  ;;  %v3113_v0 = vpop.permute.xlu1 %3112  ;;  %vm7464_vm13 = vmmov %vm7463_vm7  ;;  %v6329_v40 = vld [vmem:[#allocation2 + $0x57] sm:$0xff] }
 0x222   : > { %v2130_v24 = vsel %vm7463_vm7, %v2098_v30, %v2034_v62  ;;  %v6319_v36 = vsel %vm7464_vm13, %v3204_v42, %v3113_v0  ;;  %v2987_v9 = vpop.permute.xlu0 %2986  ;;  %vm7466_vm12 = vmmov %vm7463_vm7  ;;  %v7470_v62 = vld [vmem:[#allocation37_spill] sm:$0xff]  ;;  %vm7471_vm7 = vcmask 31744   ;;  %v7475_v42 = vld [vmem:[#allocation55_spill] sm:$0xff] }
 0x223   : > { %v1827_v50 = vsel %vm7466_vm12, %v1794_v23, %v7465_v14  ;;  %3158 = vrot.lane.b32.xlu1 %v7467_v27, %s4987_s14  ;;  %4687 = vmatmul.mubr.msk.f32.gmra.mrb[14].mxu1 %vm7468_vm4, %v2130_v24  ;;  %vm7469_vm0 = vmmov %vm7468_vm4  ;;  %v1795_v29 = vsel %vm7471_vm7, %v1251_v18, %v7470_v62  ;;  %v6336_v23 = vld [vmem:[#allocation2 + $0x47] sm:$0xff]  ;;  %v778_v62 = vadd.s32 64, %v5139_v10  ;;  %v7496_v57 = vld [vmem:[#allocation53_spill] sm:$0xff] }
 0x224   : > { %3032 = vrot.lane.b32.xlu0 %v5912_v12, %s4986_s13  ;;  %4693 = vmatprep.mubr.msk.f32.mxu1 %vm7469_vm0, %v1827_v50  ;;  %vm7472_vm13 = vmmov %vm7471_vm7  ;;  %v7478_v24 = vld [vmem:[#allocation40_spill] sm:$0xff]  ;;  %v7479_v18 = vld [vmem:[#allocation3_spill] sm:$0xff] }
 0x225   : > { %v3205_v3 = vsel %vm7472_vm13, %v6329_v40, %v2987_v9  ;;  %v3115_v34 = vpop.permute.xlu1 %3114  ;;  %vm7474_vm8 = vmmov %vm7466_vm12  ;;  %vm7480_vm0 = vnez %v7479_v18  ;;  %v7481_v14 = vld [vmem:[#allocation4_spill] sm:$0xff]  ;;  %vm6356_vm13 = vcmp.gt.s32.totalorder %v848_v8, 0  ;;  %v862_v5 = vand.u32 15, %v778_v62 }
 0x226   : > { %v1828_v32 = vsel %vm7474_vm8, %v1795_v29, %v7473_v22  ;;  %vm7476_vm12 = vmmov %vm7471_vm7  ;;  %v1982_v0 = vpop.permute.xlu0 %1981  ;;  %v7482_v50 = vsel %vm7480_vm0, %v7481_v14, 0.0  ;;  %v6361_v29 = vld [vmem:[#allocation2 + $0x5f] sm:$0xff]  ;;  %v780_v14 = vadd.s32 80, %v5139_v10  ;;  %v7514_v27 = vld [vmem:[#allocation60_spill] sm:$0xff] }
 0x227   : > { %v6345_v30 = vsel %vm7476_vm12, %v6336_v23, %v7475_v42  ;;  %vm7477_vm4 = vmmov %vm7474_vm8  ;;  %v1796_v9 = vsel %vm7471_vm7, %v7482_v50, %v7478_v24  ;;  %3034 = vrot.lane.b32.xlu1 %v5890_v61, %s4986_s13  ;;  %vm7486_vm12 = vcmask 97280   ;;  %v4959_v42 = vld [vmem:[#allocation2 + $0x4f] sm:$0xff]  ;;  %v2878_v62 = vld [vmem:[#allocation2 + $0x121] sm:$0xff] }
 0x228   : > { %v6348_v12 = vsel %vm7477_vm4, %v3205_v3, %v3115_v34  ;;  %vm7485_vm8 = vmmov %vm7477_vm4  ;;  %4694 = vmatmul.mubr.msk.f32.vlgmr.msra.gmra.mrb[16].mxu1 %vm7486_vm12, %v1828_v32  ;;  %v7487_v34 = vld [vmem:[#allocation41_spill] sm:$0xff]  ;;  %v1873_v8 = vsel %vm6356_vm13, %v4959_v42, 0.0  ;;  %3160 = vrot.lane.b32.xlu0 %v5924_v1, %s4987_s14  ;;  %v7489_v24 = vld [vmem:[#allocation68_spill] sm:$0xff]  ;;  %v2886_v1 = vsel %vm6356_vm13, %v6361_v29, 0.0 }
 0x229   : > { %v2104_v3 = vsel %vm7485_vm8, %v6345_v30, %v1982_v0  ;;  %v1829_v22 = vsel %vm7477_vm4, %v1796_v9, %v7487_v34  ;;  %vm7488_vm7 = vmmov %vm7486_vm12  ;;  %v2073_v0 = vsel %vm7490_vm6, %v1873_v8, %v7489_v24  ;;  %v1984_v61 = vpop.permute.xlu1 %1983  ;;  %4864 = vmatpush3.bf16.msk.msra.mxu1 %vm7313_vm2, %v6031_v47  ;;  %v2846_v32 = vld [vmem:[#allocation2 + $0x120] sm:$0xff]  ;;  %v7494_v34 = vld [vmem:[#allocation6_spill] sm:$0xff] }
 0x22a   : > { %4648 = vmatmul.mubr.msk.f32.gmra.mrb[36].mxu0 %vm7488_vm7, %v2104_v3  ;;  %vm7491_vm8 = vmmov %vm7488_vm7  ;;  %v2989_v9 = vpop.permute.xlu0 %2988  ;;  %v7493_v3 = vld [vmem:[#allocation46_spill] sm:$0xff] }
 0x22b   : > { %4696 = vmatprep.mubr.msk.f32.mxu1 %vm7491_vm8, %v1829_v22  ;;  %vm7492_vm12 = vmmov %vm7477_vm4  ;;  %v7495_v22 = vsel %vm7458_vm15, %v7494_v34, 0.0 }
 0x22c   : > { %v2105_v50 = vsel %vm7492_vm12, %v2073_v0, %v1984_v61  ;;  %v1798_v8 = vsel %vm7490_vm6, %v7495_v22, %v7493_v3  ;;  %vm7498_vm2 = vmmov %vm7477_vm4  ;;  %v7501_v61 = vld [vmem:[#allocation29_spill] sm:$0xff]  ;;  %3036 = vrot.lane.b32.xlu0 %v2846_v32, %s4986_s13  ;;  %v2847_v3 = vld [vmem:[#allocation2 + $0x128] sm:$0xff] }
 0x22d   : > { %v1830_v47 = vsel %vm7498_vm2, %v7497_v7, %v7496_v57  ;;  %vm7499_vm4 = vmmov %vm7490_vm6  ;;  %v7502_v41 = vsel %vm5563_vm11, %v7501_v61, 0.0  ;;  %4650 = vmatprep.mubr.msk.f32.mxu0 %vm7488_vm7, %v2105_v50  ;;  %v3117_v57 = vpop.permute.xlu1 %3116  ;;  %v7510_v0 = vld [vmem:[#allocation62_spill] sm:$0xff] }
 0x22e   : > { %v3206_v45 = vsel %vm7499_vm4, %v2886_v1, %v2989_v9  ;;  %3162 = vrot.lane.b32.xlu1 %v7502_v41, %s4987_s14  ;;  %vm7504_vm8 = vmmov %vm7498_vm2  ;;  %v2879_v1 = vld [vmem:[#allocation2 + $0x129] sm:$0xff]  ;;  %v4960_v9 = vld [vmem:[#allocation2 + $0x3f] sm:$0xff]  ;;  %v876_v41 = vand.u32 15, %v780_v14  ;;  %v2991_v7 = vpop.permute.xlu0 %2990 }
 0x22f   : > { %v1831_v21 = vsel %vm7504_vm8, %v1798_v8, %v7503_v48  ;;  %vm7505_vm15 = vmmov %vm7488_vm7  ;;  %v1416_v22 = vsel %vm6356_vm13, %v4960_v9, 0.0  ;;  %v7508_v8 = vld [vmem:[#allocation59_spill] sm:$0xff]  ;;  %v7511_v32 = vld [vmem:[#allocation66_spill] sm:$0xff]  ;;  %v782_v48 = vadd.s32 96, %v5139_v10 }
 0x230   : > { %4697 = vmatmul.mubr.msk.f32.gmra.mrb[18].mxu1 %vm7505_vm15, %v1830_v47  ;;  %vm7506_vm12 = vmmov %vm7488_vm7  ;;  %v1832_v61 = vsel %vm7498_vm2, %v7511_v32, %v7510_v0  ;;  %v1261_v14 = vld [vmem:[#allocation2 + $0x67] sm:$0xff]  ;;  %3164 = vrot.lane.b32.xlu0 %v2878_v62, %s4987_s14 }
 0x231   : > { %4699 = vmatprep.mubr.msk.f32.mxu1 %vm7506_vm12, %v1831_v21  ;;  %vm7507_vm11 = vmmov %vm7498_vm2  ;;  %v3119_v9 = vpop.permute.xlu1 %3118  ;;  %v890_v0 = vand.u32 15, %v782_v48 }
 0x232   : > { %v6410_v50 = vsel %vm7507_vm11, %v3206_v45, %v3117_v57  ;;  %vm7509_vm6 = vmmov %vm7499_vm4  ;;  %vm6417_vm4 = vcmp.gt.s32.totalorder %v862_v5, 0  ;;  %3038 = vrot.lane.b32.xlu1 %v2847_v3, %s4986_s13  ;;  %v2943_v57 = vsel %vm5902_vm5, %v2879_v1, 0.0  ;;  %vm6436_vm11 = vcmp.gt.s32.totalorder %v876_v41, 0  ;;  %v1986_v16 = vpop.permute.xlu0 %1985 }
 0x233   : > { %v1800_v47 = vsel %vm7509_vm6, %v1416_v22, %v7508_v8  ;;  %vm7515_vm13 = vmmov %vm7498_vm2  ;;  %v7518_v22 = vld [vmem:[#allocation67_spill] sm:$0xff]  ;;  %v1418_v3 = vsel %vm6417_vm4, %v4959_v42, 0.0  ;;  %v7526_v42 = vld [vmem:[#allocation70_spill] sm:$0xff]  ;;  %v1875_v32 = vsel %vm6417_vm4, %v6361_v29, 0.0  ;;  %v1420_v48 = vsel %vm6436_vm11, %v6361_v29, 0.0 }
 0x234   : > { %v1833_v45 = vsel %vm7515_vm13, %v1800_v47, %v7514_v27  ;;  %4700 = vmatmul.mubr.msk.f32.gmra.mrb[20].mxu1 %vm7488_vm7, %v1832_v61  ;;  %vm7516_vm8 = vmmov %vm7509_vm6 }
 0x235   : > { %v3207_v5 = vsel %vm7516_vm8, %v1261_v14, %v2991_v7  ;;  %vm7517_vm15 = vmmov %vm7488_vm7  ;;  %v7524_v7 = vld [vmem:[#allocation69_spill] sm:$0xff] }
 0x236   : > { %4702 = vmatprep.mubr.msk.f32.mxu1 %vm7517_vm15, %v1833_v45  ;;  %vm7519_vm12 = vmmov %vm7509_vm6  ;;  %v1834_v47 = vsel %vm7498_vm2, %v6345_v30, %v7524_v7  ;;  %3166 = vrot.lane.b32.xlu1 %v2943_v57, %s4987_s14  ;;  %v1988_v30 = vpop.permute.xlu1 %1987  ;;  %v6464_v45 = vpop.permute.xlu0 %2992  ;;  %v7543_v7 = vld [vmem:[#allocation72_spill] sm:$0xff] }
 0x237   : > { %v1803_v10 = vsel %vm7519_vm12, %v6329_v40, %v7518_v22  ;;  %vm7522_vm6 = vmmov %vm7498_vm2 }
 0x238   : > { %v6441_v62 = vsel %vm7522_vm6, %v3207_v5, %v3119_v9  ;;  %vm7523_vm5 = vmmov %vm7516_vm8  ;;  %v7535_v5 = vld [vmem:[#allocation74_spill] sm:$0xff] }
 0x239   : > { %v1802_v1 = vsel %vm7523_vm5, %v1418_v3, %v7489_v24  ;;  %vm7525_vm13 = vmmov %vm7498_vm2  ;;  %v7530_v24 = vld [vmem:[#allocation73_spill] sm:$0xff] }
 0x23a   : > { %v2106_v40 = vsel %vm7525_vm13, %v1803_v10, %v1986_v16  ;;  %vm7527_vm7 = vmmov %vm7498_vm2  ;;  %v6474_v3 = vld [vmem:[#allocation2 + $0x6f] sm:$0xff]  ;;  %v7540_v16 = vld [vmem:[#allocation75_spill] sm:$0xff] }
 0x23b   : > { %v1835_v41 = vsel %vm7527_vm7, %v1802_v1, %v7526_v42  ;;  %vm7528_vm8 = vmmov %vm7517_vm15  ;;  %vm6470_vm7 = vcmp.gt.s32.totalorder %v890_v0, 0  ;;  %v6481_v1 = vpop.permute.xlu1 %3120  ;;  %v6488_v0 = vpop.permute.xlu0 %2994 }
 0x23c   : > { %4703 = vmatmul.mubr.msk.f32.gmra.mrb[22].mxu1 %vm7528_vm8, %v1834_v47  ;;  %vm7529_vm15 = vmmov %vm7528_vm8  ;;  %v1422_v47 = vsel %vm6470_vm7, %v6474_v3, 0.0 }
 0x23d   : > { %4651 = vmatmul.mubr.msk.f32.gmra.mrb[38].mxu0 %vm7529_vm15, %v2106_v40  ;;  %vm7531_vm12 = vmmov %vm7523_vm5  ;;  %v7545_v40 = vld [vmem:[#allocation77_spill] sm:$0xff] }
 0x23e   : > { %v2075_v61 = vsel %vm7531_vm12, %v1875_v32, %v7530_v24  ;;  %vm7532_vm6 = vmmov %vm7528_vm8  ;;  %v6494_v32 = vld [vmem:[#allocation2 + $0x7f] sm:$0xff] }
 0x23f   : > { %4705 = vmatprep.mubr.msk.f32.mxu1 %vm7532_vm6, %v1835_v41  ;;  %vm7533_vm5 = vmmov %vm7498_vm2  ;;  %v2890_v21 = vsel %vm6436_vm11, %v6494_v32, 0.0 }
 0x240   : > { %v2107_v27 = vsel %vm7533_vm5, %v2075_v61, %v1988_v30  ;;  %vm7534_vm2 = vmmov %vm7531_vm12  ;;  %v6502_v30 = vpop.permute.xlu1 %3122 }
 0x241   : > { %v1804_v57 = vsel %vm7534_vm2, %v1420_v48, %v7530_v24  ;;  %vm7536_vm13 = vmmov %vm7533_vm5  ;;  %v1806_v42 = vsel %vm7534_vm2, %v1422_v47, %v7545_v40  ;;  %v7546_v24 = vld [vmem:[#allocation78_spill] sm:$0xff]  ;;  %v7550_v48 = vld [vmem:[#allocation76_spill] sm:$0xff]  ;;  %v1877_v47 = vsel %vm6436_vm11, %v6474_v3, 0.0 }
 0x242   : > { %v1836_v9 = vsel %vm7536_vm13, %v1803_v10, %v7535_v5  ;;  %vm7539_vm8 = vmmov %vm7532_vm6  ;;  %v1990_v5 = vpop.permute.xlu0 %1989 }
 0x243   : > { %4653 = vmatprep.mubr.msk.f32.mxu0 %vm7539_vm8, %v2107_v27  ;;  %vm7541_vm15 = vmmov %vm7533_vm5 }
 0x244   : > { %v1837_v29 = vsel %vm7541_vm15, %v1804_v57, %v7540_v16  ;;  %vm7542_vm12 = vmmov %vm7532_vm6  ;;  %v7552_v57 = vld [vmem:[#allocation9_spill] sm:$0xff] }
 0x245   : > { %4706 = vmatmul.mubr.msk.f32.gmra.mrb[24].mxu1 %vm7542_vm12, %v1836_v9  ;;  %vm7544_vm5 = vmmov %vm7534_vm2 }
 0x246   : > { %4708 = vmatprep.mubr.msk.f32.mxu1 %vm7532_vm6, %v1837_v29  ;;  %v1805_v10 = vsel %vm7544_vm5, %v1261_v14, %v7543_v7  ;;  %vm7547_vm8 = vmmov %vm7536_vm13  ;;  %v6499_v14 = vld [vmem:[#allocation2 + $0x77] sm:$0xff]  ;;  %vm7553_vm5 = vnez %v7552_v57  ;;  %v6514_v29 = vld [vmem:[#allocation2 + $0x8f] sm:$0xff]  ;;  %v7649_v57 = vsel %vm7349_vm3, %v5393_v37, 0.0 }
 0x247   : > { %v1838_v41 = vsel %vm7536_vm13, %v1805_v10, %v5936_v55  ;;  %v1839_v61 = vsel %vm7547_vm8, %v1806_v42, %v7546_v24  ;;  %vm7548_vm15 = vmmov %vm7532_vm6  ;;  %v1424_v55 = vsel %vm7553_vm5, %v6494_v32, 0.0  ;;  %v2108_v7 = vsel %vm7547_vm8, %v1805_v10, %v1990_v5  ;;  %v6526_v24 = vld [vmem:[#allocation2 + $0x87] sm:$0xff] }
 0x248   : > { %vm7549_vm12 = vmmov %vm7532_vm6  ;;  %v1808_v9 = vsel %vm7534_vm2, %v1424_v55, %v5952_v54 }
 0x249   : > { %4709 = vmatmul.mubr.msk.f32.gmra.mrb[26].mxu1 %vm7548_vm15, %v1838_v41  ;;  %vm7551_vm6 = vmmov %vm7534_vm2  ;;  %v2077_v41 = vsel %vm7534_vm2, %v1877_v47, %v7545_v40 }
 0x24a   : > { %4711 = vmatprep.mubr.msk.f32.mxu1 %vm7549_vm12, %v1839_v61  ;;  %v1807_v27 = vsel %vm7551_vm6, %v6499_v14, %v7550_v48  ;;  %vm7554_vm13 = vmmov %vm7547_vm8  ;;  %v6536_v48 = vpop.permute.xlu0 %2996 }
 0x24b   : > { %v1840_v16 = vsel %vm7554_vm13, %v1807_v27, %v5958_v15  ;;  %vm7555_vm15 = vmmov %vm7547_vm8  ;;  %v1992_v15 = vpop.permute.xlu1 %1991 }
 0x24c   : > { %v1841_v42 = vsel %vm7555_vm15, %v1808_v9, %v5960_v52  ;;  %vm7556_vm6 = vmmov %vm7549_vm12  ;;  %v1426_v52 = vsel %vm7349_vm3, %v6514_v29, 0.0  ;;  %v2109_v61 = vsel %vm7555_vm15, %v2077_v41, %v1992_v15 }
 0x24d   : > { %4712 = vmatmul.mubr.msk.f32.gmra.mrb[28].mxu1 %vm7549_vm12, %v1840_v16  ;;  %4654 = vmatmul.mubr.msk.f32.gmra.mrb[40].mxu0 %vm7556_vm6, %v2108_v7  ;;  %vm7557_vm13 = vmmov %vm7556_vm6  ;;  %v7565_v16 = vld [vmem:[#allocation79_spill] sm:$0xff] }
 0x24e   : > { %4714 = vmatprep.mubr.msk.f32.mxu1 %vm7557_vm13, %v1841_v42  ;;  %vm7558_vm8 = vmmov %vm7534_vm2  ;;  %v6554_v47 = vpop.permute.xlu0 %2998 }
 0x24f   : > { %v1809_v10 = vsel %vm7558_vm8, %v6526_v24, %v5950_v44  ;;  %vm7559_vm12 = vmmov %vm7534_vm2  ;;  %v6546_v44 = vld [vmem:[#allocation2 + $0x97] sm:$0xff]  ;;  %v6549_v9 = vpop.permute.xlu1 %3124 }
 0x250   : > { %v1810_v40 = vsel %vm7559_vm12, %v1426_v52, %v5968_v25  ;;  %vm7560_vm6 = vmmov %vm7555_vm15 }
 0x251   : > { %v1842_v55 = vsel %vm7560_vm6, %v1809_v10, %v5980_v49  ;;  %vm7561_vm2 = vmmov %vm7557_vm13  ;;  %v7567_v49 = vld [vmem:[#allocation80_spill] sm:$0xff] }
 0x252   : > { %4656 = vmatprep.mubr.msk.f32.mxu0 %vm7561_vm2, %v2109_v61  ;;  %vm7562_vm13 = vmmov %vm7560_vm6 }
 0x253   : > { %v1843_v5 = vsel %vm7562_vm13, %v1810_v40, %v5982_v56  ;;  %vm7563_vm8 = vmmov %vm7561_vm2  ;;  %v7570_v56 = vld [vmem:[#allocation11_spill] sm:$0xff]  ;;  %v6568_v61 = vpop.permute.xlu1 %3126  ;;  %v1994_v40 = vpop.permute.xlu0 %1993 }
 0x254   : > { %4715 = vmatmul.mubr.msk.f32.gmra.mrb[30].mxu1 %vm7563_vm8, %v1842_v55  ;;  %vm7564_vm9 = vmmov %vm7561_vm2 }
 0x255   : > { %4717 = vmatprep.mubr.msk.f32.mxu1 %vm7564_vm9, %v1843_v5  ;;  %vm7566_vm15 = vmmov %vm7559_vm12 }
 0x256   : > { %v1811_v7 = vsel %vm7566_vm15, %v6546_v44, %v7565_v16  ;;  %vm7568_vm12 = vmmov %vm7560_vm6  ;;  %vm7569_vm6 = vnez %v7221_v2  ;;  %v1879_v16 = vsel %vm6470_vm7, %v6494_v32, 0.0  ;;  %v7667_v2 = vld [vmem:[#allocation19_spill] sm:$0xff] }
 0x257   : > { %v1844_v42 = vsel %vm7568_vm12, %v1811_v7, %v7567_v49  ;;  %v7571_v41 = vsel %vm7569_vm6, %v7570_v56, 0.0  ;;  %vm7572_vm2 = vmmov %vm7566_vm15  ;;  %vm7575_vm15 = vnez %v7227_v46 }
 0x258   : > { %v1812_v15 = vsel %vm7572_vm2, %v7571_v41, %v5994_v39  ;;  %vm7573_vm9 = vmmov %vm7568_vm12  ;;  %v7576_v55 = vsel %vm7575_vm15, %v5393_v37, 0.0 }
 0x259   : > { %v1845_v52 = vsel %vm7573_vm9, %v1812_v15, %v6013_v26  ;;  %vm7574_vm13 = vmmov %vm7563_vm8  ;;  %v6611_v15 = vpop.f32.mrb[32].mxu0 }
 0x25a   : > { %4718 = vmatmul.mubr.msk.f32.gmra.mrb[0].mxu1 %vm7574_vm13, %v1844_v42  ;;  %vm7577_vm12 = vmmov %vm7572_vm2  ;;  %v1996_v42 = vpop.permute.xlu1 %1995 }
 0x25b   : > { %4720 = vmatprep.mubr.msk.f32.mxu1 %vm7563_vm8, %v1845_v52  ;;  %v1814_v5 = vsel %vm7577_vm12, %v7576_v55, %v6035_v60  ;;  %vm7578_vm2 = vmmov %vm7573_vm9  ;;  %v6618_v52 = vpop.f32.mrb[33].mxu0 }
 0x25c   : > { %v1846_v39 = vsel %vm7578_vm2, %v6029_v58, %v6048_v43  ;;  %vm7579_vm10 = vmmov %vm7578_vm2  ;;  %v6591_v43 = vpop.permute.xlu0 %3000 }
 0x25d   : > { %v2110_v26 = vsel %vm7579_vm10, %v1807_v27, %v1994_v40  ;;  %vm7580_vm9 = vmmov %vm7578_vm2 }
 0x25e   : > { %v1847_v49 = vsel %vm7580_vm9, %v1814_v5, %v6067_v63  ;;  %vm7581_vm13 = vmmov %vm7563_vm8  ;;  %4657 = vmatmul.mubr.msk.f32.gmra.mrb[42].mxu0 %vm7563_vm8, %v2110_v26  ;;  %v6600_v63 = vpop.permute.xlu1 %3128 }
 0x25f   : > { %4721 = vmatmul.mubr.msk.f32.gmra.mrb[2].mxu1 %vm7581_vm13, %v1846_v39  ;;  %vm7582_vm1 = vmmov %vm7577_vm12 }
 0x260   : > { %v2079_v60 = vsel %vm7582_vm1, %v1879_v16, %v5952_v54  ;;  %vm7583_vm12 = vmmov %vm7563_vm8  ;;  %v6602_v54 = vpop.permute.xlu0 %3002  ;;  %v7609_v16 = vld [vmem:[#allocation7_spill] sm:$0xff] }
 0x261   : > { %4723 = vmatprep.mubr.msk.f32.mxu1 %vm7583_vm12, %v1847_v49  ;;  %v2111_v58 = vsel %vm7578_vm2, %v2079_v60, %v1996_v42  ;;  %vm7584_vm10 = vmmov %vm7578_vm2  ;;  %v7610_v49 = vsel %vm7480_vm0, %v7609_v16, 0.0  ;;  %v7613_v60 = vld [vmem:[#allocation45_spill] sm:$0xff]  ;;  %v7614_v42 = vld [vmem:[#allocation64_spill] sm:$0xff] }
 0x262   : > { %v1848_v27 = vsel %vm7584_vm10, %v6077_v19, %v6089_v31  ;;  %vm7585_vm15 = vmmov %vm7563_vm8  ;;  %v6608_v41 = vpop.permute.xlu1 %3130  ;;  %vm7593_vm10 = vcmask 31744   ;;  %v7654_v16 = vld [vmem:[#allocation81_spill] sm:$0xff] }
 0x263   : > { %4659 = vmatprep.mubr.msk.f32.mxu0 %vm7585_vm15, %v2111_v58  ;;  %vm7586_vm9 = vmmov %vm7563_vm8 }
 0x264   : > { %4724 = vmatmul.mubr.msk.f32.gmra.mrb[4].mxu1 %vm7586_vm9, %v1848_v27  ;;  %vm7587_vm13 = vmmov %vm7563_vm8  ;;  %v1998_v19 = vpop.permute.xlu0 %1997  ;;  %v7615_v27 = vld [vmem:[#allocation65_spill] sm:$0xff] }
 0x265   : > { %4726 = vmatprep.mubr.msk.f32.mxu1 %vm7587_vm13, %v6110_v20  ;;  %vm7588_vm1 = vmmov %vm7563_vm8  ;;  %v1881_v20 = vsel %vm7553_vm5, %v6514_v29, 0.0 }
 0x266   : > { %vm7589_vm8 = vmmov %vm7588_vm1 }
 0x267   : > { %vm7590_vm12 = vmmov %vm7578_vm2 }
 0x268   : > { %4727 = vmatmul.mubr.msk.f32.gmra.mrb[6].mxu1 %vm7588_vm1, %v6136_v59  ;;  %v2112_v31 = vsel %vm7590_vm12, %v1809_v10, %v1998_v19  ;;  %vm7591_vm15 = vmmov %vm7588_vm1  ;;  %v2081_v59 = vsel %vm7593_vm10, %v1881_v20, %v5968_v25  ;;  %v6626_v40 = vpop.permute.xlu0 %3004  ;;  %v7599_v25 = vld [vmem:[#allocation52_spill] sm:$0xff] }
 0x269   : > { %4729 = vmatprep.mubr.msk.f32.mxu1 %vm7589_vm8, %v6150_v28  ;;  %vm7592_vm2 = vmmov %vm7588_vm1  ;;  %v2000_v28 = vpop.permute.xlu1 %1999 }
 0x26a   : > { %4660 = vmatmul.mubr.msk.f32.gmra.mrb[44].mxu0 %vm7592_vm2, %v2112_v31  ;;  %vm7594_vm9 = vmmov %vm7588_vm1  ;;  %v7618_v31 = vld [vmem:[#allocation58_spill] sm:$0xff] }
 0x26b   : > { %vm7595_vm13 = vmmov %vm7590_vm12 }
 0x26c   : > { %4730 = vmatmul.mubr.msk.f32.gmra.mrb[8].mxu1 %vm7591_vm15, %v6179_v35  ;;  %v2113_v10 = vsel %vm7595_vm13, %v2081_v59, %v2000_v28  ;;  %vm7596_vm8 = vmmov %vm7588_vm1  ;;  %v6635_v55 = vpop.permute.xlu0 %3006  ;;  %v7620_v59 = vld [vmem:[#allocation56_spill] sm:$0xff] }
 0x26d   : > { %4732 = vmatprep.mubr.msk.f32.mxu1 %vm7594_vm9, %v6191_v13  ;;  %4662 = vmatprep.mubr.msk.f32.mxu0 %vm7588_vm1, %v2113_v10  ;;  %vm7597_vm12 = vmmov %vm7588_vm1  ;;  %v6633_v35 = vpop.permute.xlu1 %3132  ;;  %v7600_v13 = vsel %vm7448_vm14, %v7494_v34, 0.0  ;;  %v7608_v34 = vld [vmem:[#allocation63_spill] sm:$0xff] }
 0x26e   : > { %vm7598_vm15 = vmmov %vm7588_vm1 }
 0x26f   : > { %vm7601_vm2 = vmmov %vm7593_vm10 }
 0x270   : > { %4733 = vmatmul.mubr.msk.f32.gmra.mrb[10].mxu1 %vm7596_vm8, %v6220_v6  ;;  %v3200_v5 = vsel %vm7601_vm2, %v7600_v13, %v7599_v25  ;;  %vm7602_vm10 = vmmov %vm7588_vm1  ;;  %v2002_v39 = vpop.permute.xlu0 %2001  ;;  %v7622_v25 = vld [vmem:[#allocation71_spill] sm:$0xff] }
 0x271   : > { %4735 = vmatprep.mubr.msk.f32.mxu1 %vm7597_vm12, %v6229_v17  ;;  %v1761_v6 = vpop.permute.xlu1 %1760  ;;  %vm7603_vm9 = vmmov %vm7595_vm13 }
 0x272   : > { %v1858_v17 = vsel %vm7603_vm9, %v6289_v11, %v1761_v6  ;;  %vm7604_vm13 = vmmov %vm7603_vm9 }
 0x273   : > { %v2114_v26 = vsel %vm7604_vm13, %v1811_v7, %v2002_v39  ;;  %vm7605_vm8 = vmmov %vm7588_vm1  ;;  %v3201_v7 = vsel %vm7601_vm2, %v7614_v42, %v7613_v60  ;;  %v7663_v42 = vld [vmem:[#allocation82_spill] sm:$0xff] }
 0x274   : > { %4736 = vmatmul.mubr.msk.f32.gmra.mrb[12].mxu1 %vm7598_vm15, %v6258_v33  ;;  %4663 = vmatmul.mubr.msk.f32.gmra.mrb[46].mxu0 %vm7605_vm8, %v2114_v26  ;;  %v7606_v33 = vld [vmem:[#allocation48_spill] sm:$0xff]  ;;  %vm7607_vm12 = vmmov %vm7603_vm9  ;;  %v3009_v58 = vpop.permute.xlu0 %3008  ;;  %v2888_v26 = vsel %vm6417_vm4, %v6474_v3, 0.0 }
 0x275   : > { %4738 = vmatprep.mubr.msk.f32.mxu1 %vm7602_vm10, %v6270_v51  ;;  %v3232_v38 = vsel %vm7607_vm12, %v3200_v5, %v7606_v33  ;;  %vm7611_vm14 = vmmov %vm7601_vm2  ;;  %v3135_v11 = vpop.permute.xlu1 %3134  ;;  %v6675_v5 = vpop.f32.mrb[34].mxu0 }
 0x276   : > { %v3202_v51 = vsel %vm7611_vm14, %v7610_v49, %v7608_v34  ;;  %vm7612_vm15 = vmmov %vm7588_vm1  ;;  %v6678_v6 = vpop.f32.mrb[35].mxu0 }
 0x277   : > { %vm7616_vm10 = vmmov %vm7603_vm9 }
 0x278   : > { %4739 = vmatmul.mubr.msk.f32.gmra.mrb[14].mxu1 %vm7588_vm1, %v1858_v17  ;;  %v3233_v19 = vsel %vm7616_vm10, %v3201_v7, %v7615_v27  ;;  %vm7617_vm9 = vmmov %vm7588_vm1  ;;  %v3137_v10 = vpop.permute.xlu0 %3136 }
 0x279   : > { %4745 = vmatprep.mubr.msk.f32.mxu1 %vm7612_vm15, %v3232_v38  ;;  %vm7619_vm13 = vmmov %vm7616_vm10  ;;  %v3011_v20 = vpop.permute.xlu1 %3010 }
 0x27a   : > { %v3234_v18 = vsel %vm7619_vm13, %v3202_v51, %v7618_v31  ;;  %vm7621_vm0 = vmmov %vm7601_vm2  ;;  %v7658_v51 = vsel %vm7569_vm6, %v7657_v4, 0.0  ;;  %v7720_v4 = vld [vmem:[#allocation25_spill] sm:$0xff] }
 0x27b   : > { %v3203_v28 = vsel %vm7621_vm0, %v6336_v23, %v7620_v59  ;;  %vm7623_vm8 = vmmov %vm7616_vm10  ;;  %v3213_v22 = vsel %vm7621_vm0, %v6546_v44, %v6602_v54  ;;  %v7673_v59 = vld [vmem:[#allocation31_spill] sm:$0xff] }
 0x27c   : > { %4746 = vmatmul.mubr.msk.f32.vlgmr.msra.gmra.mrb[16].mxu1 %vm7617_vm9, %v3233_v19  ;;  %v3235_v13 = vsel %vm7623_vm8, %v3203_v28, %v7622_v25  ;;  %vm7624_vm12 = vmmov %vm7588_vm1  ;;  %v3013_v39 = vpop.permute.xlu0 %3012 }
 0x27d   : > { %4748 = vmatprep.mubr.msk.f32.mxu1 %vm7588_vm1, %v3234_v18  ;;  %vm7625_vm14 = vmmov %vm7588_vm1  ;;  %v3139_v17 = vpop.permute.xlu1 %3138 }
 0x27e   : > { %vm7626_vm15 = vmmov %vm7588_vm1 }
 0x27f   : > { %vm7627_vm2 = vmmov %vm7588_vm1 }
 0x280   : > { %4749 = vmatmul.mubr.msk.f32.gmra.mrb[18].mxu1 %vm7624_vm12, %v3235_v13  ;;  %v3141_v33 = vpop.permute.xlu0 %3140  ;;  %vm7628_vm10 = vmmov %vm7621_vm0  ;;  %v7676_v13 = vld [vmem:[#allocation13_spill] sm:$0xff] }
 0x281   : > { %4751 = vmatprep.mubr.msk.f32.mxu1 %vm7625_vm14, %v6319_v36  ;;  %v3015_v23 = vpop.permute.xlu1 %3014  ;;  %v3208_v38 = vsel %vm7628_vm10, %v2888_v26, %v6464_v45  ;;  %vm7629_vm9 = vmmov %vm7623_vm8 }
 0x282   : > { %v3240_v36 = vsel %vm7629_vm9, %v3208_v38, %v6481_v1  ;;  %vm7630_vm13 = vmmov %vm7588_vm1 }
 0x283   : > { %vm7631_vm4 = vmmov %vm7623_vm8 }
 0x284   : > { %4752 = vmatmul.mubr.msk.f32.gmra.mrb[20].mxu1 %vm7626_vm15, %v6348_v12  ;;  %v3017_v3 = vpop.permute.xlu0 %3016  ;;  %vm7632_vm8 = vmmov %vm7621_vm0 }
 0x285   : > { %4754 = vmatprep.mubr.msk.f32.mxu1 %vm7627_vm2, %v6410_v50  ;;  %v3143_v12 = vpop.permute.xlu1 %3142  ;;  %v3209_v50 = vsel %vm7621_vm0, %v6499_v14, %v6488_v0  ;;  %v3210_v1 = vsel %vm7632_vm8, %v2890_v21, %v6536_v48  ;;  %vm7633_vm12 = vmmov %vm7631_vm4  ;;  %v2892_v0 = vsel %vm6470_vm7, %v6514_v29, 0.0  ;;  %v7689_v21 = vld [vmem:[#allocation24_spill] sm:$0xff] }
 0x286   : > { %v3241_v45 = vsel %vm7631_vm4, %v3209_v50, %v6502_v30  ;;  %vm7634_vm14 = vmmov %vm7588_vm1  ;;  %v7687_v50 = vld [vmem:[#allocation17_spill] sm:$0xff] }
 0x287   : > { %vm7635_vm15 = vmmov %vm7588_vm1 }
 0x288   : > { %4755 = vmatmul.mubr.msk.f32.gmra.mrb[22].mxu1 %vm7630_vm13, %v6441_v62  ;;  %v3242_v62 = vsel %vm7633_vm12, %v3210_v1, %v6549_v9  ;;  %vm7636_vm2 = vmmov %vm7621_vm0  ;;  %v3145_v32 = vpop.permute.xlu0 %3144 }
 0x289   : > { %4757 = vmatprep.mubr.msk.f32.mxu1 %vm7588_vm1, %v3240_v36  ;;  %v3019_v34 = vpop.permute.xlu1 %3018  ;;  %v3211_v8 = vsel %vm7636_vm2, %v6526_v24, %v6554_v47  ;;  %vm7637_vm11 = vmmov %vm7631_vm4  ;;  %v7642_v47 = vsel %vm7553_vm5, %v7570_v56, 0.0 }
 0x28a   : > { %v3243_v14 = vsel %vm7637_vm11, %v3211_v8, %v6568_v61  ;;  %vm7638_vm10 = vmmov %vm7621_vm0 }
 0x28b   : > { %v3212_v30 = vsel %vm7638_vm10, %v2892_v0, %v6591_v43  ;;  %vm7639_vm9 = vmmov %vm7631_vm4 }
 0x28c   : > { %4758 = vmatmul.mubr.msk.f32.gmra.mrb[24].mxu1 %vm7634_vm14, %v3241_v45  ;;  %v3244_v48 = vsel %vm7639_vm9, %v3212_v30, %v6600_v63  ;;  %vm7640_vm13 = vmmov %vm7588_vm1  ;;  %v3021_v29 = vpop.permute.xlu0 %3020  ;;  %v7700_v30 = vld [vmem:[#allocation27_spill] sm:$0xff] }
 0x28d   : > { %4760 = vmatprep.mubr.msk.f32.mxu1 %vm7635_vm15, %v3242_v62  ;;  %v3147_v9 = vpop.permute.xlu1 %3146  ;;  %vm7641_vm7 = vmmov %vm7631_vm4 }
 0x28e   : > { %v3245_v24 = vsel %vm7641_vm7, %v3213_v22, %v6608_v41  ;;  %vm7643_vm4 = vmmov %vm7621_vm0 }
 0x28f   : > { %v3214_v61 = vsel %vm7643_vm4, %v7642_v47, %v6626_v40  ;;  %vm7644_vm8 = vmmov %vm7641_vm7 }
 0x290   : > { %4761 = vmatmul.mubr.msk.f32.gmra.mrb[26].mxu1 %vm7640_vm13, %v3243_v14  ;;  %v3246_v43 = vsel %vm7644_vm8, %v3214_v61, %v6633_v35  ;;  %vm7645_vm12 = vmmov %vm7588_vm1  ;;  %v3149_v54 = vpop.permute.xlu0 %3148  ;;  %v7698_v14 = vld [vmem:[#allocation20_spill] sm:$0xff]  ;;  %v7708_v61 = vld [vmem:[#allocation23_spill] sm:$0xff] }
 0x291   : > { %4763 = vmatprep.mubr.msk.f32.mxu1 %vm7588_vm1, %v3244_v48  ;;  %vm7646_vm14 = vmmov %vm7588_vm1  ;;  %v3023_v63 = vpop.permute.xlu1 %3022 }
 0x292   : > { %vm7647_vm15 = vmmov %vm7621_vm0 }
 0x293   : > { %v3215_v44 = vsel %vm7647_vm15, %v6023_v53, %v6635_v55  ;;  %vm7648_vm2 = vmmov %vm7641_vm7 }
 0x294   : > { %4764 = vmatmul.mubr.msk.f32.gmra.mrb[28].mxu1 %vm7645_vm12, %v3245_v24  ;;  %v3247_v41 = vsel %vm7648_vm2, %v3215_v44, %v3135_v11  ;;  %vm7650_vm5 = vmmov %vm7621_vm0  ;;  %v3025_v53 = vpop.permute.xlu0 %3024  ;;  %v7706_v24 = vld [vmem:[#allocation12_spill] sm:$0xff] }
 0x295   : > { %4766 = vmatprep.mubr.msk.f32.mxu1 %vm7646_vm14, %v3246_v43  ;;  %v3216_v56 = vsel %vm7650_vm5, %v7649_v57, %v3009_v58  ;;  %vm7651_vm11 = vmmov %vm7648_vm2  ;;  %v3151_v35 = vpop.permute.xlu1 %3150  ;;  %vm7666_vm14 = vnez %v7227_v46  ;;  %v7678_v46 = vld [vmem:[#allocation22_spill] sm:$0xff] }
 0x296   : > { %v3248_v40 = vsel %vm7651_vm11, %v3216_v56, %v3137_v10  ;;  %vm7652_vm10 = vmmov %vm7588_vm1  ;;  %v7668_v19 = vsel %vm7666_vm14, %v7667_v2, 0.0  ;;  %v7710_v43 = vld [vmem:[#allocation30_spill] sm:$0xff]  ;;  %v7715_v56 = vld [vmem:[#allocation35_spill] sm:$0xff] }
 0x297   : > { %vm7653_vm9 = vmmov %vm7588_vm1 }
 0x298   : > { %4767 = vmatmul.mubr.msk.f32.gmra.mrb[30].mxu1 %vm7652_vm10, %v3247_v41  ;;  %vm7655_vm13 = vmmov %vm7621_vm0  ;;  %v3153_v58 = vpop.permute.xlu0 %3152 }
 0x299   : > { %4769 = vmatprep.mubr.msk.f32.mxu1 %vm7653_vm9, %v3248_v40  ;;  %v3217_v49 = vsel %vm7655_vm13, %v7654_v16, %v3011_v20  ;;  %vm7656_vm1 = vmmov %vm7648_vm2  ;;  %v3027_v60 = vpop.permute.xlu1 %3026 }
 0x29a   : > { %v3249_v55 = vsel %vm7656_vm1, %v3217_v49, %v3139_v17  ;;  %vm7659_vm3 = vmmov %vm7621_vm0  ;;  %v2814_v49 = vld [vmem:[#allocation2 + $0x11f] sm:$0xff] }
 0x29b   : > { %v3218_v37 = vsel %vm7659_vm3, %v7658_v51, %v3013_v39  ;;  %vm7660_vm0 = vmmov %vm7656_vm1 }
 0x29c   : > { %v3250_v11 = vsel %vm7660_vm0, %v3218_v37, %v3141_v33  ;;  %vm7661_vm7 = vmmov %vm7653_vm9  ;;  %v3029_v10 = vpop.permute.xlu0 %3028  ;;  %vm7677_vm9 = vnez %v7676_v13  ;;  %v7684_v33 = vld [vmem:[#allocation32_spill] sm:$0xff] }
 0x29d   : > { %4770 = vmatmul.mubr.msk.f32.gmra.mrb[0].mxu1 %vm7661_vm7, %v3249_v55  ;;  %vm7662_vm4 = vmmov %vm7661_vm7  ;;  %v3155_v20 = vpop.permute.xlu1 %3154  ;;  %v7679_v17 = vsel %vm7677_vm9, %v7678_v46, 0.0  ;;  %v306_v55 = vld [vmem:[%s7070_s5] sm:$0xf] }
 0x29e   : > { %4772 = vmatprep.mubr.msk.f32.mxu1 %vm7662_vm4, %v3250_v11  ;;  %vm7664_vm8 = vmmov %vm7659_vm3 }
 0x29f   : > { %v3219_v7 = vsel %vm7664_vm8, %v7663_v42, %v3015_v23  ;;  %vm7665_vm12 = vmmov %vm7660_vm0  ;;  %vm7688_vm8 = vnez %v7687_v50 }
 0x2a0   : > { %v3251_v27 = vsel %vm7665_vm12, %v3219_v7, %v3143_v12  ;;  %vm7669_vm6 = vmmov %vm7659_vm3  ;;  %v3157_v36 = vpop.permute.xlu0 %3156 }
 0x2a1   : > { %v3220_v31 = vsel %vm7669_vm6, %v7668_v19, %v3017_v3  ;;  %vm7670_vm15 = vmmov %vm7660_vm0  ;;  %v3031_v26 = vpop.permute.xlu1 %3030  ;;  %v7690_v3 = vsel %vm7688_vm8, %v7689_v21, 0.0 }
 0x2a2   : > { %v3252_v18 = vsel %vm7670_vm15, %v3220_v31, %v3145_v32  ;;  %vm7671_vm2 = vmmov %vm7662_vm4 }
 0x2a3   : > { %4773 = vmatmul.mubr.msk.f32.gmra.mrb[2].mxu1 %vm7671_vm2, %v3251_v27  ;;  %vm7672_vm5 = vmmov %vm7671_vm2 }
 0x2a4   : > { %4775 = vmatprep.mubr.msk.f32.mxu1 %vm7672_vm5, %v3252_v18  ;;  %vm7674_vm11 = vmmov %vm7659_vm3  ;;  %v3033_v0 = vpop.permute.xlu0 %3032 }
 0x2a5   : > { %v3221_v28 = vsel %vm7674_vm11, %v7673_v59, %v3019_v34  ;;  %vm7675_vm10 = vmmov %vm7660_vm0  ;;  %v3159_v62 = vpop.permute.xlu1 %3158  ;;  %v7695_v34 = vld [vmem:[#allocation10_spill] sm:$0xff]  ;;  %vm7699_vm11 = vnez %v7698_v14 }
 0x2a6   : > { %v3253_v25 = vsel %vm7675_vm10, %v3221_v28, %v3147_v9  ;;  %vm7680_vm13 = vmmov %vm7659_vm3  ;;  %v7701_v48 = vsel %vm7699_vm11, %v7700_v30, 0.0  ;;  %vm7722_vm11 = vcmask 1043456  }
 0x2a7   : > { %v3222_v39 = vsel %vm7680_vm13, %v7679_v17, %v3021_v29  ;;  %vm7681_vm1 = vmmov %vm7660_vm0  ;;  %4793 = vmatprep.subr.msk.mxu0 %vm7722_vm11, %v306_v55 }
 0x2a8   : > { %v3254_v23 = vsel %vm7681_vm1, %v3222_v39, %v3149_v54  ;;  %vm7682_vm3 = vmmov %vm7671_vm2  ;;  %v3161_v54 = vpop.permute.xlu0 %3160 }
 0x2a9   : > { %4776 = vmatmul.mubr.msk.f32.gmra.mrb[4].mxu1 %vm7682_vm3, %v3253_v25  ;;  %vm7683_vm0 = vmmov %vm7671_vm2  ;;  %v3035_v29 = vpop.permute.xlu1 %3034 }
 0x2aa   : > { %4778 = vmatprep.mubr.msk.f32.mxu1 %vm7683_vm0, %v3254_v23  ;;  %vm7685_vm7 = vmmov %vm7669_vm6  ;;  %v6843_v23 = vld [vmem:[%s7069_s4] ss:$0 sm:$0xff] }
 0x2ab   : > { %v3223_v38 = vsel %vm7685_vm7, %v7684_v33, %v3023_v63  ;;  %vm7686_vm4 = vmmov %vm7681_vm1 }
 0x2ac   : > { %v3255_v12 = vsel %vm7686_vm4, %v3223_v38, %v3151_v35  ;;  %vm7691_vm12 = vmmov %vm7669_vm6 }
 0x2ad   : > { %v3224_v45 = vsel %vm7691_vm12, %v7690_v3, %v3025_v53  ;;  %vm7692_vm14 = vmmov %vm7681_vm1  ;;  %v3163_v35 = vpop.permute.xlu1 %3162  ;;  %v3037_v53 = vpop.permute.xlu0 %3036 }
 0x2ae   : > { %v3256_v1 = vsel %vm7692_vm14, %v3224_v45, %v3153_v58  ;;  %vm7693_vm6 = vmmov %vm7683_vm0 }
 0x2af   : > { %4779 = vmatmul.mubr.msk.f32.gmra.mrb[6].mxu1 %vm7693_vm6, %v3255_v12  ;;  %vm7694_vm15 = vmmov %vm7683_vm0 }
 0x2b0   : > { %4781 = vmatprep.mubr.msk.f32.mxu1 %vm7694_vm15, %v3256_v1  ;;  %vm7696_vm2 = vmmov %vm7685_vm7 }
 0x2b1   : > { %v3225_v8 = vsel %vm7696_vm2, %v7695_v34, %v3027_v60  ;;  %vm7697_vm5 = vmmov %vm7681_vm1  ;;  %v3039_v37 = vpop.permute.xlu1 %3038  ;;  %v2815_v60 = vld [vmem:[#allocation2 + $0x127] sm:$0xff]  ;;  %v3165_v42 = vpop.permute.xlu0 %3164 }
 0x2b2   : > { %v3257_v32 = vsel %vm7697_vm5, %v3225_v8, %v3155_v20  ;;  %vm7702_vm10 = vmmov %vm7696_vm2  ;;  %vm7721_vm5 = vnez %v7720_v4 }
 0x2b3   : > { %v3226_v9 = vsel %vm7702_vm10, %v7701_v48, %v3029_v10  ;;  %vm7703_vm9 = vmmov %vm7681_vm1  ;;  %v2910_v51 = vsel %vm7721_vm5, %v2814_v49, 0.0 }
 0x2b4   : > { %v3258_v22 = vsel %vm7703_vm9, %v3226_v9, %v3157_v36  ;;  %vm7704_vm13 = vmmov %vm7683_vm0 }
 0x2b5   : > { %4782 = vmatmul.mubr.msk.f32.gmra.mrb[8].mxu1 %vm7704_vm13, %v3257_v32  ;;  %vm7705_vm1 = vmmov %vm7683_vm0  ;;  %vm7709_vm0 = vnez %v7708_v61  ;;  %v3167_v27 = vpop.permute.xlu1 %3166 }
 0x2b6   : > { %4784 = vmatprep.mubr.msk.f32.mxu1 %vm7705_vm1, %v3258_v22  ;;  %vm7707_vm3 = vmmov %vm7696_vm2  ;;  %v7711_v63 = vsel %vm7709_vm0, %v7710_v43, 0.0 }
 0x2b7   : > { %v3227_v47 = vsel %vm7707_vm3, %v7706_v24, %v3031_v26  ;;  %vm7712_vm7 = vmmov %vm7696_vm2  ;;  %v3231_v58 = vsel %vm7707_vm3, %v2815_v60, %v3039_v37 }
 0x2b8   : > { %v3228_v44 = vsel %vm7712_vm7, %v7711_v63, %v3033_v0  ;;  %v3259_v41 = vsel %vm7686_vm4, %v3227_v47, %v3159_v62  ;;  %vm7713_vm8 = vmmov %vm7686_vm4 }
 0x2b9   : > { %v3260_v57 = vsel %vm7713_vm8, %v3228_v44, %v3161_v54  ;;  %vm7714_vm12 = vmmov %vm7705_vm1 }
 0x2ba   : > { %4785 = vmatmul.mubr.msk.f32.gmra.mrb[10].mxu1 %vm7714_vm12, %v3259_v41  ;;  %vm7716_vm14 = vmmov %vm7696_vm2 }
 0x2bb   : > { %v3229_v40 = vsel %vm7716_vm14, %v7715_v56, %v3035_v29  ;;  %vm7717_vm6 = vmmov %vm7705_vm1 }
 0x2bc   : > { %4787 = vmatprep.mubr.msk.f32.mxu1 %vm7717_vm6, %v3260_v57  ;;  %vm7718_vm15 = vmmov %vm7686_vm4 }
 0x2bd   : > { %v3261_v16 = vsel %vm7718_vm15, %v3229_v40, %v3163_v35  ;;  %vm7719_vm2 = vmmov %vm7705_vm1 }
 0x2be   : > { %4788 = vmatmul.mubr.msk.f32.gmra.mrb[12].mxu1 %vm7719_vm2, %v3261_v16  ;;  %vm7723_vm10 = vmmov %vm7707_vm3 }
 0x2bf   : > { %v3230_v11 = vsel %vm7723_vm10, %v2910_v51, %v3037_v53  ;;  %vm7724_vm9 = vmmov %vm7722_vm11 }
 0x2c0   : > { %4794 = vmatpush3.msk.msra.mxu0 %vm7724_vm9, %v306_v55  ;;  %vm7725_vm13 = vmmov %vm7686_vm4 }
 0x2c1   : > { %v3262_v7 = vsel %vm7725_vm13, %v3230_v11, %v3165_v42  ;;  %vm7726_vm0 = vmmov %vm7686_vm4 }
 0x2c2   : > { %4790 = vmatprep.mubr.msk.f32.mxu1 %vm7705_vm1, %v3262_v7  ;;  %v3263_v2 = vsel %vm7726_vm0, %v3231_v58, %v3167_v27  ;;  %vm7727_vm7 = vmmov %vm7705_vm1 }
 0x2c3   : > { %4791 = vmatmul.mubr.msk.f32.gmra.mrb[14].mxu1 %vm7727_vm7, %v3263_v2  ;;  %vm7728_vm4 = vmmov %vm7707_vm3 }
 0x2c4   : > { %vm7729_vm8 = vmmov %vm7707_vm3 }
 0x2c5   : > { %vm7730_vm12 = vmmov %vm7707_vm3 }
 0x2c6   : > { %vm7731_vm14 = vmmov %vm7707_vm3 }
 0x2c7   : > { %vm7732_vm6 = vmmov %vm7707_vm3 }
 0x2c8   : > { %vm7733_vm15 = vmmov %vm7707_vm3 }
 0x2c9   : > { %vm7734_vm2 = vmmov %vm7707_vm3 }
 0x2ca   : > { %vm7735_vm5 = vmmov %vm7734_vm2 }
 0x2cb   : > { %vm7736_vm11 = vmmov %vm7734_vm2 }
 0x2cc   : > { %vm7737_vm10 = vmmov %vm7734_vm2 }
 0x2cd   : > { %vm7738_vm9 = vmmov %vm7734_vm2 }
 0x2ce   : > { %vm7739_vm13 = vmmov %vm7734_vm2 }
 0x2cf   : > { %vm7740_vm1 = vmmov %vm7734_vm2 }
 0x2d0   : > { %vm7741_vm3 = vmmov %vm7740_vm1 }
 0x2d1   : > { %vm7742_vm0 = vmmov %vm7740_vm1 }
 0x2d2   : > { %vm7743_vm7 = vmmov %vm7742_vm0 }
 0x2fd   : > { %v4649_v19 = vpop.f32.mrb[36].mxu0 }
 0x2fe   : > { %v2321_v31 = vpop.f32.mrb[37].mxu0 }
 0x310   : > { %v4652_v18 = vpop.f32.mrb[38].mxu0 }
 0x311   : > { %v2331_v20 = vpop.f32.mrb[39].mxu0 }
 0x320   : > { %v4655_v59 = vpop.f32.mrb[40].mxu0 }
 0x321   : > { %v2341_v28 = vpop.f32.mrb[41].mxu0 }
 0x331   : > { %v4658_v10 = vpop.f32.mrb[42].mxu0 }
 0x332   : > { %v2351_v25 = vpop.f32.mrb[43].mxu0 }
 0x33d   : > { %v4661_v13 = vpop.f32.mrb[44].mxu0 }
 0x33e   : > { %v6834_v46 = vpop.f32.mrb[45].mxu0 }
 0x347   : > { %v6836_v17 = vpop.f32.mrb[46].mxu0 }
 0x348   : > { %v6838_v39 = vpop.f32.mrb[47].mxu0 }
 0x34f   : > { %v4747_v26 = vpop.f32.mrb[16].mxu1 }
 0x350   : > { %v4867_v33 = vadd.f32 %v4747_v26, %v6611_v15  ;;  %v3432_v38 = vpop.f32.mrb[17].mxu1 }
 0x351   : > { %v4868_v36 = vadd.f32 %v3432_v38, %v6618_v52 }
 0x352   : > { %v3630_v12 = vadd.f32 %v4867_v33, %v6843_v23 }
 0x353   : > { %v3629_v50 = vadd.f32 %v4868_v36, %v6843_v23  ;;  %v4750_v21 = vpop.f32.mrb[18].mxu1 }
 0x354   : > { %v4869_v3 = vadd.f32 %v4750_v21, %v6675_v5  ;;  %v3442_v45 = vpop.f32.mrb[19].mxu1  ;;  %v3662_v34 = vmax.f32 %v3630_v12, 0.0 }
 0x355   : > { %v3661_v1 = vmax.f32 %v3629_v50, 0.0  ;;  %v4870_v62 = vadd.f32 %v3442_v45, %v6678_v6 }
 0x356   : > { %v3632_v8 = vadd.f32 %v4869_v3, %v6843_v23 }
 0x357   : > { %v3631_v0 = vadd.f32 %v4870_v62, %v6843_v23  ;;  %v4753_v15 = vpop.f32.mrb[20].mxu1  ;;  %4795 = vmatprep.mubr.msk.f32.mxu0 %vm7728_vm4, %v3661_v1  ;;  %vm7744_vm4 = vmmov %vm7742_vm0 }
 0x358   : > { %v4871_v52 = vadd.f32 %v4753_v15, %v4649_v19  ;;  %v3452_v32 = vpop.f32.mrb[21].mxu1  ;;  %4796 = vmatmul.mubr.msk.f32.vlgmr.msra.gmra.mrb[48].mxu0 %vm7729_vm8, %v3662_v34  ;;  %v3664_v48 = vmax.f32 %v3632_v8, 0.0  ;;  %vm7745_vm8 = vmmov %vm7742_vm0 }
 0x359   : > { %v3663_v14 = vmax.f32 %v3631_v0, 0.0  ;;  %v4872_v30 = vadd.f32 %v3452_v32, %v2321_v31 }
 0x35a   : > { %v3634_v5 = vadd.f32 %v4871_v52, %v6843_v23 }
 0x35b   : > { %v3633_v9 = vadd.f32 %v4872_v30, %v6843_v23  ;;  %v4756_v6 = vpop.f32.mrb[22].mxu1  ;;  %4798 = vmatprep.mubr.msk.f32.mxu0 %vm7730_vm12, %v3663_v14  ;;  %vm7746_vm12 = vmmov %vm7742_vm0 }
 0x35c   : > { %v4873_v22 = vadd.f32 %v4756_v6, %v4652_v18  ;;  %v3462_v29 = vpop.f32.mrb[23].mxu1  ;;  %4799 = vmatmul.mubr.msk.f32.gmra.mrb[50].mxu0 %vm7731_vm14, %v3664_v48  ;;  %v3666_v61 = vmax.f32 %v3634_v5, 0.0  ;;  %vm7747_vm14 = vmmov %vm7742_vm0 }
 0x35d   : > { %v3665_v24 = vmax.f32 %v3633_v9, 0.0  ;;  %v4874_v47 = vadd.f32 %v3462_v29, %v2331_v20 }
 0x35e   : > { %v3636_v43 = vadd.f32 %v4873_v22, %v6843_v23 }
 0x35f   : > { %v3635_v63 = vadd.f32 %v4874_v47, %v6843_v23  ;;  %v4759_v44 = vpop.f32.mrb[24].mxu1  ;;  %4801 = vmatprep.mubr.msk.f32.mxu0 %vm7732_vm6, %v3665_v24  ;;  %vm7748_vm6 = vmmov %vm7742_vm0 }
 0x360   : > { %v4875_v54 = vadd.f32 %v4759_v44, %v4655_v59  ;;  %v3472_v41 = vpop.f32.mrb[25].mxu1  ;;  %4802 = vmatmul.mubr.msk.f32.gmra.mrb[52].mxu0 %vm7733_vm15, %v3666_v61  ;;  %v3668_v40 = vmax.f32 %v3636_v43, 0.0  ;;  %vm7749_vm15 = vmmov %vm7742_vm0 }
 0x361   : > { %v3667_v57 = vmax.f32 %v3635_v63, 0.0  ;;  %v4876_v56 = vadd.f32 %v3472_v41, %v2341_v28 }
 0x362   : > { %v3638_v35 = vadd.f32 %v4875_v54, %v6843_v23 }
 0x363   : > { %v3637_v16 = vadd.f32 %v4876_v56, %v6843_v23  ;;  %v4762_v49 = vpop.f32.mrb[26].mxu1  ;;  %4804 = vmatprep.mubr.msk.f32.mxu0 %vm7734_vm2, %v3667_v57  ;;  %vm7750_vm2 = vmmov %vm7742_vm0 }
 0x364   : > { %v4877_v53 = vadd.f32 %v4762_v49, %v4658_v10  ;;  %v3482_v55 = vpop.f32.mrb[27].mxu1  ;;  %4805 = vmatmul.mubr.msk.f32.gmra.mrb[54].mxu0 %vm7735_vm5, %v3668_v40  ;;  %v3670_v37 = vmax.f32 %v3638_v35, 0.0  ;;  %vm7751_vm5 = vmmov %vm7742_vm0 }
 0x365   : > { %v3669_v4 = vmax.f32 %v3637_v16, 0.0  ;;  %v4878_v51 = vadd.f32 %v3482_v55, %v2351_v25 }
 0x366   : > { %v3640_v11 = vadd.f32 %v4877_v53, %v6843_v23 }
 0x367   : > { %v3639_v60 = vadd.f32 %v4878_v51, %v6843_v23  ;;  %v4765_v42 = vpop.f32.mrb[28].mxu1  ;;  %4807 = vmatprep.mubr.msk.f32.mxu0 %vm7736_vm11, %v3669_v4  ;;  %vm7752_vm11 = vmmov %vm7742_vm0 }
 0x368   : > { %v4879_v7 = vadd.f32 %v4765_v42, %v4661_v13  ;;  %v3492_v58 = vpop.f32.mrb[29].mxu1  ;;  %4808 = vmatmul.mubr.msk.f32.gmra.mrb[56].mxu0 %vm7737_vm10, %v3670_v37  ;;  %v3672_v19 = vmax.f32 %v3640_v11, 0.0  ;;  %vm7753_vm10 = vmmov %vm7742_vm0 }
 0x369   : > { %v3671_v27 = vmax.f32 %v3639_v60, 0.0  ;;  %v4880_v2 = vadd.f32 %v3492_v58, %v6834_v46 }
 0x36a   : > { %v3642_v31 = vadd.f32 %v4879_v7, %v6843_v23 }
 0x36b   : > { %v3641_v18 = vadd.f32 %v4880_v2, %v6843_v23  ;;  %v4768_v20 = vpop.f32.mrb[30].mxu1  ;;  %4810 = vmatprep.mubr.msk.f32.mxu0 %vm7738_vm9, %v3671_v27  ;;  %vm7754_vm9 = vmmov %vm7742_vm0  ;;  %v4024_v27 = vld [vmem:[%s5061_s12 + $0x8] sm:$0xff]  ;;  %v4023_v2 = vld [vmem:[%s5061_s12] sm:$0xff] }
 0x36c   : > { %v4881_v59 = vadd.f32 %v4768_v20, %v6836_v17  ;;  %v3502_v28 = vpop.f32.mrb[31].mxu1  ;;  %4811 = vmatmul.mubr.msk.f32.gmra.mrb[58].mxu0 %vm7739_vm13, %v3672_v19  ;;  %v3674_v13 = vmax.f32 %v3642_v31, 0.0  ;;  %vm7755_vm13 = vmmov %vm7742_vm0  ;;  %v6921_v19 = vld [vmem:[%s7071_s6] ss:$0 sm:$0xff]  ;;  %v4056_v31 = vmax.f32 %v4024_v27, 0.0  ;;  %v4026_v20 = vld [vmem:[%s5061_s12 + $0x18] sm:$0xff] }
 0x36d   : > { %v3673_v10 = vmax.f32 %v3641_v18, 0.0  ;;  %v4882_v25 = vadd.f32 %v3502_v28, %v6838_v39 }
 0x36e   : > { %v3644_v26 = vadd.f32 %v4881_v59, %v6843_v23 }
 0x36f   : > { %v3643_v46 = vadd.f32 %v4882_v25, %v6843_v23  ;;  %4813 = vmatprep.mubr.msk.f32.mxu0 %vm7740_vm1, %v3673_v10  ;;  %vm7756_vm1 = vmmov %vm7742_vm0  ;;  %v4025_v10 = vld [vmem:[%s5061_s12 + $0x10] sm:$0xff] }
 0x370   : > { %v4771_v33 = vpop.f32.mrb[0].mxu1  ;;  %4814 = vmatmul.mubr.msk.f32.gmra.mrb[60].mxu0 %vm7741_vm3, %v3674_v13  ;;  %v3676_v12 = vmax.f32 %v3644_v26, 0.0  ;;  %vm7757_vm3 = vmmov %vm7742_vm0  ;;  %v4058_v26 = vmax.f32 %v4026_v20, 0.0  ;;  %v4037_v20 = vld [vmem:[%s5061_s12 + $0x70] sm:$0xff] }
 0x371   : > { %v3512_v38 = vpop.f32.mrb[1].mxu1  ;;  %v3675_v36 = vmax.f32 %v3643_v46, 0.0  ;;  %v3646_v50 = vadd.f32 %v4771_v33, %v6843_v23 }
 0x372   : > { %v3645_v17 = vadd.f32 %v6843_v23, %v3512_v38  ;;  %v4057_v38 = vmax.f32 %v4025_v10, 0.0 }
 0x373   : > { %4816 = vmatprep.mubr.msk.f32.mxu0 %vm7742_vm0, %v3675_v36  ;;  %v3678_v1 = vmax.f32 %v3646_v50, 0.0  ;;  %v4028_v36 = vld [vmem:[%s5061_s12 + $0x28] sm:$0xff]  ;;  %v4027_v50 = vld [vmem:[%s5061_s12 + $0x20] sm:$0xff] }
 0x374   : > { %v3677_v21 = vmax.f32 %v3645_v17, 0.0  ;;  %4817 = vmatmul.mubr.msk.f32.gmra.mrb[62].mxu0 %vm7743_vm7, %v3676_v12  ;;  %vm7758_vm7 = vmmov %vm7742_vm0 }
 0x376   : > { %v4774_v3 = vpop.f32.mrb[2].mxu1  ;;  %4819 = vmatprep.mubr.msk.f32.mxu0 %vm7744_vm4, %v3677_v21  ;;  %vm7759_vm4 = vcmask 130048  }
 0x377   : > { %v3522_v39 = vpop.f32.mrb[3].mxu1  ;;  %v3648_v62 = vadd.f32 %v4774_v3, %v6843_v23 }
 0x378   : > { %v3647_v45 = vadd.f32 %v6843_v23, %v3522_v39  ;;  %4820 = vmatmul.mubr.msk.f32.gmra.mrb[64].mxu0 %vm7745_vm8, %v3678_v1  ;;  %vm7760_vm8 = vmmov %vm7759_vm4  ;;  %v4060_v39 = vmax.f32 %v4028_v36, 0.0  ;;  %v4039_v36 = vld [vmem:[%s5061_s12 + $0x80] sm:$0xff] }
 0x379   : > { %v3680_v52 = vmax.f32 %v3648_v62, 0.0  ;;  %v4059_v62 = vmax.f32 %v4027_v50, 0.0 }
 0x37a   : > { %v3679_v34 = vmax.f32 %v3647_v45, 0.0 }
 0x37c   : > { %v4777_v8 = vpop.f32.mrb[4].mxu1  ;;  %4822 = vmatprep.mubr.msk.f32.mxu0 %vm7746_vm12, %v3679_v34  ;;  %v4030_v34 = vld [vmem:[%s5061_s12 + $0x38] sm:$0xff]  ;;  %vm7761_vm12 = vmmov %vm7759_vm4 }
 0x37d   : > { %v3532_v0 = vpop.f32.mrb[5].mxu1  ;;  %v3650_v32 = vadd.f32 %v4777_v8, %v6843_v23  ;;  %4823 = vmatmul.mubr.msk.f32.gmra.mrb[66].mxu0 %vm7747_vm14, %v3680_v52  ;;  %vm7762_vm14 = vmmov %vm7759_vm4 }
 0x37e   : > { %v3649_v15 = vadd.f32 %v6843_v23, %v3532_v0 }
 0x37f   : > { %v3682_v9 = vmax.f32 %v3650_v32, 0.0 }
 0x380   : > { %v3681_v14 = vmax.f32 %v3649_v15, 0.0  ;;  %v4029_v15 = vld [vmem:[%s5061_s12 + $0x30] sm:$0xff] }
 0x382   : > { %v4780_v30 = vpop.f32.mrb[6].mxu1  ;;  %4825 = vmatprep.mubr.msk.f32.mxu0 %vm7748_vm6, %v3681_v14  ;;  %v4062_v14 = vmax.f32 %v4030_v34, 0.0  ;;  %vm7763_vm6 = vmmov %vm7759_vm4  ;;  %v4041_v34 = vld [vmem:[%s5061_s12 + $0x90] sm:$0xff] }
 0x383   : > { %v3542_v48 = vpop.f32.mrb[7].mxu1  ;;  %v3652_v6 = vadd.f32 %v4780_v30, %v6843_v23  ;;  %4826 = vmatmul.mubr.msk.f32.gmra.mrb[68].mxu0 %vm7749_vm15, %v3682_v9  ;;  %v4032_v9 = vld [vmem:[%s5061_s12 + $0x48] sm:$0xff]  ;;  %vm7764_vm15 = vmmov %vm7759_vm4 }
 0x384   : > { %v3651_v5 = vadd.f32 %v6843_v23, %v3542_v48 }
 0x385   : > { %v3684_v61 = vmax.f32 %v3652_v6, 0.0 }
 0x386   : > { %v3683_v22 = vmax.f32 %v3651_v5, 0.0  ;;  %v4061_v5 = vmax.f32 %v4029_v15, 0.0 }
 0x388   : > { %v4783_v29 = vpop.f32.mrb[8].mxu1  ;;  %4828 = vmatprep.mubr.msk.f32.mxu0 %vm7750_vm2, %v3683_v22  ;;  %vm7765_vm2 = vmmov %vm7759_vm4 }
 0x389   : > { %v3552_v24 = vpop.f32.mrb[9].mxu1  ;;  %v3654_v43 = vadd.f32 %v4783_v29, %v6843_v23  ;;  %4829 = vmatmul.mubr.msk.f32.gmra.mrb[70].mxu0 %vm7751_vm5, %v3684_v61  ;;  %v4031_v29 = vld [vmem:[%s5061_s12 + $0x40] sm:$0xff]  ;;  %v4064_v61 = vmax.f32 %v4032_v9, 0.0  ;;  %vm7766_vm5 = vmmov %vm7765_vm2 }
 0x38a   : > { %v3653_v47 = vadd.f32 %v6843_v23, %v3552_v24  ;;  %v4043_v9 = vld [vmem:[%s5061_s12 + $0xa0] sm:$0xff] }
 0x38b   : > { %v3686_v57 = vmax.f32 %v3654_v43, 0.0 }
 0x38c   : > { %v3685_v63 = vmax.f32 %v3653_v47, 0.0 }
 0x38d   : > { %v4786_v44 = vpop.f32.mrb[10].mxu1 }
 0x38e   : > { %v3562_v54 = vpop.f32.mrb[11].mxu1  ;;  %4831 = vmatprep.mubr.msk.f32.mxu0 %vm7752_vm11, %v3685_v63  ;;  %v3656_v56 = vadd.f32 %v4786_v44, %v6843_v23  ;;  %v4063_v44 = vmax.f32 %v4031_v29, 0.0  ;;  %vm7767_vm11 = vmmov %vm7765_vm2 }
 0x38f   : > { %v3655_v41 = vadd.f32 %v6843_v23, %v3562_v54  ;;  %4832 = vmatmul.mubr.msk.f32.gmra.mrb[72].mxu0 %vm7753_vm10, %v3686_v57  ;;  %v4034_v54 = vld [vmem:[%s5061_s12 + $0x58] sm:$0xff]  ;;  %vm7768_vm10 = vmmov %vm7765_vm2 }
 0x390   : > { %v3688_v53 = vmax.f32 %v3656_v56, 0.0  ;;  %v4033_v56 = vld [vmem:[%s5061_s12 + $0x50] sm:$0xff] }
 0x391   : > { %v3687_v40 = vmax.f32 %v3655_v41, 0.0  ;;  %v4789_v35 = vpop.f32.mrb[12].mxu1 }
 0x392   : > { %v3572_v16 = vpop.f32.mrb[13].mxu1  ;;  %v3658_v55 = vadd.f32 %v4789_v35, %v6843_v23 }
 0x393   : > { %v3657_v49 = vadd.f32 %v6843_v23, %v3572_v16  ;;  %4834 = vmatprep.mubr.msk.f32.mxu0 %vm7754_vm9, %v3687_v40  ;;  %v4066_v16 = vmax.f32 %v4034_v54, 0.0  ;;  %vm7769_vm9 = vmmov %vm7765_vm2  ;;  %v4045_v54 = vld [vmem:[%s5061_s12 + $0xb0] sm:$0xff] }
 0x394   : > { %4835 = vmatmul.mubr.msk.f32.gmra.mrb[74].mxu0 %vm7755_vm13, %v3688_v53  ;;  %v3690_v51 = vmax.f32 %v3658_v55, 0.0  ;;  %v4065_v55 = vmax.f32 %v4033_v56, 0.0  ;;  %vm7770_vm13 = vmmov %vm7765_vm2 }
 0x395   : > { %v3689_v4 = vmax.f32 %v3657_v49, 0.0 }
 0x396   : > { %v4792_v37 = vpop.f32.mrb[14].mxu1 }
 0x397   : > { %4837 = vmatprep.mubr.msk.f32.mxu0 %vm7756_vm1, %v3689_v4  ;;  %v3660_v11 = vadd.f32 %v4792_v37, %v6843_v23  ;;  %v3582_v60 = vpop.f32.mrb[15].mxu1  ;;  %v4036_v4 = vld [vmem:[%s5061_s12 + $0x68] sm:$0xff]  ;;  %vm7771_vm1 = vmmov %vm7765_vm2 }
 0x398   : > { %v3659_v42 = vadd.f32 %v6843_v23, %v3582_v60  ;;  %4838 = vmatmul.mubr.msk.f32.gmra.mrb[76].mxu0 %vm7757_vm3, %v3690_v51  ;;  %v4055_v23 = vmax.f32 %v4023_v2, 0.0  ;;  %vm7772_vm3 = vmmov %vm7771_vm1 }
 0x399   : > { %v3692_v58 = vmax.f32 %v3660_v11, 0.0  ;;  %v4035_v11 = vld [vmem:[%s5061_s12 + $0x60] sm:$0xff] }
 0x39a   : > { %v3691_v7 = vmax.f32 %v3659_v42, 0.0  ;;  %v4067_v2 = vmax.f32 %v4035_v11, 0.0 }
 0x39c   : > { %4840 = vmatprep.mubr.msk.f32.mxu0 %vm7742_vm0, %v3691_v7  ;;  %v4068_v7 = vmax.f32 %v4036_v4, 0.0  ;;  %vm7773_vm0 = vmmov %vm7771_vm1  ;;  %v4047_v4 = vld [vmem:[%s5061_s12 + $0xc0] sm:$0xff] }
 0x39d   : > { %4841 = vmatmul.mubr.msk.f32.gmra.mrb[78].mxu0 %vm7758_vm7, %v3692_v58  ;;  %vm7774_vm7 = vmmov %vm7773_vm0 }
 0x42b   : > { %v4797_v18 = vpop.f32.mrb[48].mxu0 }
 0x42c   : > { %v3870_v59 = vadd.f32 %v4797_v18, %v6921_v19  ;;  %v3864_v28 = vpop.f32.mrb[49].mxu0 }
 0x42d   : > { %v3865_v25 = vadd.f32 %v6921_v19, %v3864_v28 }
 0x42e   : > { %v4088_v13 = vadd.f32 %v4056_v31, %v3870_v59  ;;  %v4038_v31 = vld [vmem:[%s5061_s12 + $0x78] sm:$0xff] }
 0x42f   : > { %v4087_v46 = vadd.f32 %v4055_v23, %v3865_v25  ;;  %v4800_v33 = vpop.f32.mrb[50].mxu0  ;;  %v4070_v10 = vmax.f32 %v4038_v31, 0.0  ;;  %v4049_v31 = vld [vmem:[%s5061_s12 + $0xd0] sm:$0xff] }
 0x430   : > { %4120 = vst.msk [vmem:[%s6931_s20 + $0x8] sm:$0xff] %vm7759_vm4, %v4088_v13  ;;  %v3880_v17 = vadd.f32 %v4800_v33, %v6921_v19  ;;  %v3874_v12 = vpop.f32.mrb[51].mxu0  ;;  %vm7775_vm4 = vmmov %vm7773_vm0 }
 0x431   : > { %4119 = vst.msk [vmem:[%s6931_s20] sm:$0xff] %vm7760_vm8, %v4087_v46  ;;  %v3875_v21 = vadd.f32 %v6921_v19, %v3874_v12  ;;  %v4040_v46 = vld [vmem:[%s5061_s12 + $0x88] sm:$0xff]  ;;  %vm7776_vm8 = vmmov %vm7773_vm0 }
 0x432   : > { %v4090_v3 = vadd.f32 %v4058_v26, %v3880_v17  ;;  %v4069_v26 = vmax.f32 %v4037_v20, 0.0  ;;  %v4072_v50 = vmax.f32 %v4040_v46, 0.0  ;;  %v4051_v46 = vld [vmem:[%s5061_s12 + $0xe0] sm:$0xff] }
 0x433   : > { %v4089_v45 = vadd.f32 %v4057_v38, %v3875_v21  ;;  %v4803_v1 = vpop.f32.mrb[52].mxu0 }
 0x434   : > { %4122 = vst.msk [vmem:[%s6931_s20 + $0x18] sm:$0xff] %vm7761_vm12, %v4090_v3  ;;  %v3890_v8 = vadd.f32 %v4803_v1, %v6921_v19  ;;  %v3884_v0 = vpop.f32.mrb[53].mxu0  ;;  %vm7777_vm12 = vmmov %vm7773_vm0 }
 0x435   : > { %4121 = vst.msk [vmem:[%s6931_s20 + $0x10] sm:$0xff] %vm7762_vm14, %v4089_v45  ;;  %v3885_v52 = vadd.f32 %v6921_v19, %v3884_v0  ;;  %v4042_v45 = vld [vmem:[%s5061_s12 + $0x98] sm:$0xff]  ;;  %vm7778_vm14 = vmmov %vm7773_vm0 }
 0x436   : > { %v4092_v32 = vadd.f32 %v4060_v39, %v3890_v8  ;;  %v4071_v39 = vmax.f32 %v4039_v36, 0.0  ;;  %v4074_v15 = vmax.f32 %v4042_v45, 0.0 }
 0x437   : > { %v4091_v30 = vadd.f32 %v4059_v62, %v3885_v52  ;;  %v4806_v48 = vpop.f32.mrb[54].mxu0 }
 0x438   : > { %4124 = vst.msk [vmem:[%s6931_s20 + $0x28] sm:$0xff] %vm7763_vm6, %v4092_v32  ;;  %v3900_v6 = vadd.f32 %v4806_v48, %v6921_v19  ;;  %v3894_v22 = vpop.f32.mrb[55].mxu0  ;;  %vm7779_vm6 = vmmov %vm7773_vm0 }
 0x439   : > { %4123 = vst.msk [vmem:[%s6931_s20 + $0x20] sm:$0xff] %vm7764_vm15, %v4091_v30  ;;  %v3895_v24 = vadd.f32 %v6921_v19, %v3894_v22  ;;  %v4044_v30 = vld [vmem:[%s5061_s12 + $0xa8] sm:$0xff]  ;;  %vm7780_vm15 = vmmov %vm7773_vm0 }
 0x43a   : > { %v4094_v47 = vadd.f32 %v4062_v14, %v3900_v6  ;;  %v4073_v14 = vmax.f32 %v4041_v34, 0.0  ;;  %v4076_v29 = vmax.f32 %v4044_v30, 0.0 }
 0x43b   : > { %v4093_v43 = vadd.f32 %v4061_v5, %v3895_v24  ;;  %v4809_v63 = vpop.f32.mrb[56].mxu0 }
 0x43c   : > { %4126 = vst.msk [vmem:[%s6931_s20 + $0x38] sm:$0xff] %vm7765_vm2, %v4094_v47  ;;  %v3910_v41 = vadd.f32 %v4809_v63, %v6921_v19  ;;  %v3904_v57 = vpop.f32.mrb[57].mxu0  ;;  %vm7781_vm2 = vmmov %vm7773_vm0 }
 0x43d   : > { %4125 = vst.msk [vmem:[%s6931_s20 + $0x30] sm:$0xff] %vm7766_vm5, %v4093_v43  ;;  %v3905_v40 = vadd.f32 %v6921_v19, %v3904_v57  ;;  %v4046_v43 = vld [vmem:[%s5061_s12 + $0xb8] sm:$0xff]  ;;  %vm7782_vm5 = vmmov %vm7773_vm0 }
 0x43e   : > { %v4096_v35 = vadd.f32 %v4064_v61, %v3910_v41  ;;  %v4075_v61 = vmax.f32 %v4043_v9, 0.0  ;;  %v4078_v56 = vmax.f32 %v4046_v43, 0.0 }
 0x43f   : > { %v4095_v49 = vadd.f32 %v4063_v44, %v3905_v40  ;;  %v4812_v53 = vpop.f32.mrb[58].mxu0 }
 0x440   : > { %4128 = vst.msk [vmem:[%s6931_s20 + $0x48] sm:$0xff] %vm7767_vm11, %v4096_v35  ;;  %v3920_v51 = vadd.f32 %v4812_v53, %v6921_v19  ;;  %v3914_v37 = vpop.f32.mrb[59].mxu0  ;;  %vm7783_vm11 = vmmov %vm7773_vm0 }
 0x441   : > { %4127 = vst.msk [vmem:[%s6931_s20 + $0x40] sm:$0xff] %vm7768_vm10, %v4095_v49  ;;  %v3915_v60 = vadd.f32 %v6921_v19, %v3914_v37  ;;  %v4048_v49 = vld [vmem:[%s5061_s12 + $0xc8] sm:$0xff]  ;;  %vm7784_vm10 = vmmov %vm7773_vm0 }
 0x442   : > { %v4098_v42 = vadd.f32 %v4066_v16, %v3920_v51  ;;  %v4077_v16 = vmax.f32 %v4045_v54, 0.0  ;;  %v4080_v11 = vmax.f32 %v4048_v49, 0.0 }
 0x443   : > { %v4097_v58 = vadd.f32 %v4065_v55, %v3915_v60  ;;  %v4815_v27 = vpop.f32.mrb[60].mxu0 }
 0x444   : > { %4130 = vst.msk [vmem:[%s6931_s20 + $0x58] sm:$0xff] %vm7769_vm9, %v4098_v42  ;;  %v3930_v18 = vadd.f32 %v4815_v27, %v6921_v19  ;;  %v3924_v23 = vpop.f32.mrb[61].mxu0  ;;  %vm7785_vm9 = vmmov %vm7773_vm0 }
 0x445   : > { %4129 = vst.msk [vmem:[%s6931_s20 + $0x50] sm:$0xff] %vm7770_vm13, %v4097_v58  ;;  %v3925_v59 = vadd.f32 %v6921_v19, %v3924_v23  ;;  %v4050_v58 = vld [vmem:[%s5061_s12 + $0xd8] sm:$0xff]  ;;  %vm7786_vm13 = vmmov %vm7773_vm0 }
 0x446   : > { %v4100_v28 = vadd.f32 %v4068_v7, %v3930_v18  ;;  %v4079_v7 = vmax.f32 %v4047_v4, 0.0  ;;  %v4082_v20 = vmax.f32 %v4050_v58, 0.0 }
 0x447   : > { %v4099_v25 = vadd.f32 %v4067_v2, %v3925_v59  ;;  %v4818_v13 = vpop.f32.mrb[62].mxu0 }
 0x448   : > { %4132 = vst.msk [vmem:[%s6931_s20 + $0x68] sm:$0xff] %vm7771_vm1, %v4100_v28  ;;  %v3940_v33 = vadd.f32 %v4818_v13, %v6921_v19  ;;  %v3934_v38 = vpop.f32.mrb[63].mxu0  ;;  %vm7787_vm1 = vmmov %vm7773_vm0 }
 0x449   : > { %4131 = vst.msk [vmem:[%s6931_s20 + $0x60] sm:$0xff] %vm7772_vm3, %v4099_v25  ;;  %v3935_v17 = vadd.f32 %v6921_v19, %v3934_v38  ;;  %v4052_v25 = vld [vmem:[%s5061_s12 + $0xe8] sm:$0xff]  ;;  %vm7788_vm3 = vmmov %vm7773_vm0 }
 0x44a   : > { %v4102_v12 = vadd.f32 %v4070_v10, %v3940_v33  ;;  %v4081_v10 = vmax.f32 %v4049_v31, 0.0  ;;  %v4084_v36 = vmax.f32 %v4052_v25, 0.0 }
 0x44b   : > { %v4101_v21 = vadd.f32 %v4069_v26, %v3935_v17  ;;  %v4821_v3 = vpop.f32.mrb[64].mxu0 }
 0x44c   : > { %4134 = vst.msk [vmem:[%s6931_s20 + $0x78] sm:$0xff] %vm7773_vm0, %v4102_v12  ;;  %v3950_v1 = vadd.f32 %v4821_v3, %v6921_v19  ;;  %v3944_v62 = vpop.f32.mrb[65].mxu0 }
 0x44d   : > { %4133 = vst.msk [vmem:[%s6931_s20 + $0x70] sm:$0xff] %vm7774_vm7, %v4101_v21  ;;  %v3945_v8 = vadd.f32 %v6921_v19, %v3944_v62  ;;  %vm7789_vm7 = vmmov %vm7773_vm0 }
 0x44e   : > { %v4104_v0 = vadd.f32 %v4072_v50, %v3950_v1  ;;  %v4083_v50 = vmax.f32 %v4051_v46, 0.0  ;;  %v4053_v1 = vld [vmem:[%s5061_s12 + $0xf0] sm:$0xff] }
 0x44f   : > { %v4103_v52 = vadd.f32 %v4071_v39, %v3945_v8  ;;  %v4054_v39 = vld [vmem:[%s5061_s12 + $0xf8] sm:$0xff] }
 0x450   : > { %v4824_v32 = vpop.f32.mrb[66].mxu0  ;;  %4136 = vst.msk [vmem:[%s6931_s20 + $0x88] sm:$0xff] %vm7775_vm4, %v4104_v0  ;;  %v4086_v8 = vmax.f32 %v4054_v39, 0.0 }
 0x451   : > { %v3960_v48 = vadd.f32 %v4824_v32, %v6921_v19  ;;  %v3954_v5 = vpop.f32.mrb[67].mxu0  ;;  %4135 = vst.msk [vmem:[%s6931_s20 + $0x80] sm:$0xff] %vm7776_vm8, %v4103_v52 }
 0x452   : > { %v3955_v6 = vadd.f32 %v6921_v19, %v3954_v5 }
 0x453   : > { %v4106_v22 = vadd.f32 %v4074_v15, %v3960_v48  ;;  %v4085_v15 = vmax.f32 %v4053_v1, 0.0 }
 0x454   : > { %v4105_v24 = vadd.f32 %v4073_v14, %v3955_v6 }
 0x455   : > { %4138 = vst.msk [vmem:[%s6931_s20 + $0x98] sm:$0xff] %vm7777_vm12, %v4106_v22 }
 0x456   : > { %v4827_v47 = vpop.f32.mrb[68].mxu0  ;;  %4137 = vst.msk [vmem:[%s6931_s20 + $0x90] sm:$0xff] %vm7778_vm14, %v4105_v24 }
 0x457   : > { %v3970_v63 = vadd.f32 %v4827_v47, %v6921_v19  ;;  %v3964_v44 = vpop.f32.mrb[69].mxu0 }
 0x458   : > { %v3965_v41 = vadd.f32 %v6921_v19, %v3964_v44 }
 0x459   : > { %v4108_v57 = vadd.f32 %v4076_v29, %v3970_v63 }
 0x45a   : > { %v4107_v40 = vadd.f32 %v4075_v61, %v3965_v41 }
 0x45b   : > { %4140 = vst.msk [vmem:[%s6931_s20 + $0xa8] sm:$0xff] %vm7779_vm6, %v4108_v57 }
 0x45c   : > { %v4830_v35 = vpop.f32.mrb[70].mxu0  ;;  %4139 = vst.msk [vmem:[%s6931_s20 + $0xa0] sm:$0xff] %vm7780_vm15, %v4107_v40 }
 0x45d   : > { %v3980_v53 = vadd.f32 %v4830_v35, %v6921_v19  ;;  %v3974_v55 = vpop.f32.mrb[71].mxu0 }
 0x45e   : > { %v3975_v51 = vadd.f32 %v6921_v19, %v3974_v55 }
 0x45f   : > { %v4110_v37 = vadd.f32 %v4078_v56, %v3980_v53 }
 0x460   : > { %v4109_v60 = vadd.f32 %v4077_v16, %v3975_v51 }
 0x461   : > { %4142 = vst.msk [vmem:[%s6931_s20 + $0xb8] sm:$0xff] %vm7781_vm2, %v4110_v37 }
 0x462   : > { %v4833_v42 = vpop.f32.mrb[72].mxu0  ;;  %4141 = vst.msk [vmem:[%s6931_s20 + $0xb0] sm:$0xff] %vm7782_vm5, %v4109_v60 }
 0x463   : > { %v3990_v27 = vadd.f32 %v4833_v42, %v6921_v19  ;;  %v3984_v2 = vpop.f32.mrb[73].mxu0 }
 0x464   : > { %v3985_v18 = vadd.f32 %v6921_v19, %v3984_v2 }
 0x465   : > { %v4112_v23 = vadd.f32 %v4080_v11, %v3990_v27 }
 0x466   : > { %v4111_v59 = vadd.f32 %v4079_v7, %v3985_v18 }
 0x467   : > { %v4836_v28 = vpop.f32.mrb[74].mxu0  ;;  %4144 = vst.msk [vmem:[%s6931_s20 + $0xc8] sm:$0xff] %vm7783_vm11, %v4112_v23 }
 0x468   : > { %v4000_v13 = vadd.f32 %v4836_v28, %v6921_v19  ;;  %v3994_v26 = vpop.f32.mrb[75].mxu0  ;;  %4143 = vst.msk [vmem:[%s6931_s20 + $0xc0] sm:$0xff] %vm7784_vm10, %v4111_v59 }
 0x469   : > { %v3995_v33 = vadd.f32 %v6921_v19, %v3994_v26 }
 0x46a   : > { %v4114_v38 = vadd.f32 %v4082_v20, %v4000_v13 }
 0x46b   : > { %v4113_v17 = vadd.f32 %v4081_v10, %v3995_v33  ;;  %v4839_v12 = vpop.f32.mrb[76].mxu0 }
 0x46c   : > { %4146 = vst.msk [vmem:[%s6931_s20 + $0xd8] sm:$0xff] %vm7785_vm9, %v4114_v38  ;;  %v4010_v21 = vadd.f32 %v4839_v12, %v6921_v19  ;;  %v4004_v3 = vpop.f32.mrb[77].mxu0 }
 0x46d   : > { %4145 = vst.msk [vmem:[%s6931_s20 + $0xd0] sm:$0xff] %vm7786_vm13, %v4113_v17  ;;  %v4005_v45 = vadd.f32 %v6921_v19, %v4004_v3 }
 0x46e   : > { %v4116_v62 = vadd.f32 %v4084_v36, %v4010_v21 }
 0x46f   : > { %v4115_v34 = vadd.f32 %v4083_v50, %v4005_v45 }
 0x470   : > { %4148 = vst.msk [vmem:[%s6931_s20 + $0xe8] sm:$0xff] %vm7787_vm1, %v4116_v62  ;;  %v4842_v0 = vpop.f32.mrb[78].mxu0 }
 0x471   : > { %4147 = vst.msk [vmem:[%s6931_s20 + $0xe0] sm:$0xff] %vm7788_vm3, %v4115_v34  ;;  %v4020_v52 = vadd.f32 %v4842_v0, %v6921_v19  ;;  %v4014_v32 = vpop.f32.mrb[79].mxu0 }
 0x472   : > { %v4015_v14 = vadd.f32 %v6921_v19, %v4014_v32 }
 0x473   : > { %v4118_v30 = vadd.f32 %v4086_v8, %v4020_v52 }
 0x474   : > { %v4117_v48 = vadd.f32 %v4085_v15, %v4015_v14 }
 0x475   : > { %4150 = vst.msk [vmem:[%s6931_s20 + $0xf8] sm:$0xff] %vm7773_vm0, %v4118_v30 }
 0x476   : > { %4149 = vst.msk [vmem:[%s6931_s20 + $0xf0] sm:$0xff] %vm7789_vm7, %v4117_v48 }
 0x477 PF: > { %s17_s26 = sadd.s32 1, %s4983_s26   ;;  %s7790_s24 = smov %s4979_s25 }
 0x478   : > { %p14_p5 = scmp.ge.s32.totalorder %s17_s26, 4   ;;  %s7791_s25 = smov %s7793_s27 }
 0x47a   :  { %16 = sbr.rel (!%p14_p5) target bundleno = 2 (0x2), region = 80 }

</bundles_post_ra>
